<compile_context>
chip_gen: v6e
topology: v6e:2x2x1
jax: 0.10.0
libtpu: 0.0.40
codegen_flags: <defaults>
</compile_context>

<pallas_src>
import functools

import jax
import jax.numpy as jnp
from jax.experimental import pallas as pl
from jax.experimental.pallas import tpu as pltpu

NUM_RES = 6                      # PE resolutions
IN_DIM = 2
PE_DIM = 4 * NUM_RES + IN_DIM    # 26
K_PAD = 32                       # PE feature dim zero-padded to a sublane-friendly K
WIDTH = 256
OUT_DIM = 3
OUT_PAD = 8                      # output rows padded to one full sublane tile


def _fcnet_kernel(xT_ref,
                  w0_ref, b0_ref,
                  w1_ref, b1_ref,
                  w2_ref, b2_ref,
                  wo_ref, bo_ref,
                  oT_ref,
                  feat_ref):
    # ---- Positional encoding, lane-dense: x arrives transposed as (2, tm) ----
    xT = xT_ref[...]                                              # (2, tm) f32
    feat_ref[pl.ds(0, IN_DIM), :] = xT
    for r in range(NUM_RES):
        xr = xT * jnp.float32(2.0 ** r)
        feat_ref[pl.ds(IN_DIM + 4 * r, IN_DIM), :] = jnp.sin(xr)
        feat_ref[pl.ds(IN_DIM + 4 * r + IN_DIM, IN_DIM), :] = jnp.cos(xr)
    # zero the K padding rows (w0 is also zero-padded, so this is belt-and-braces)
    feat_ref[pl.ds(PE_DIM, K_PAD - PE_DIM), :] = jnp.zeros(
        (K_PAD - PE_DIM, xT.shape[1]), jnp.float32)

    fT = feat_ref[...].astype(jnp.bfloat16)                       # (32, tm) bf16

    # ---- MLP (transposed): h_T = W^T @ h_T ; bf16 operands, f32 accumulation ----
    h = jnp.dot(w0_ref[...], fT,
                preferred_element_type=jnp.float32) + b0_ref[...]  # (256, tm)
    h = jnp.maximum(h, 0.0)
    h = jnp.dot(w1_ref[...], h.astype(jnp.bfloat16),
                preferred_element_type=jnp.float32) + b1_ref[...]
    h = jnp.maximum(h, 0.0)
    h = jnp.dot(w2_ref[...], h.astype(jnp.bfloat16),
                preferred_element_type=jnp.float32) + b2_ref[...]
    h = jnp.maximum(h, 0.0)
    out = jnp.dot(wo_ref[...], h.astype(jnp.bfloat16),
                  preferred_element_type=jnp.float32) + bo_ref[...]  # (8, tm)
    oT_ref[...] = out.astype(oT_ref.dtype)                        # rows 3..7 are zero


def _round_up(x, m):
    return ((x + m - 1) // m) * m


@functools.partial(jax.jit, static_argnames=("tm",))
def fcnet_forward(x, params, *, tm=2048):
    """FCNet forward. x: (N, 2) float32 (any N). Returns (N, 3) float32.

    tm is the batch tile along the lane dimension; sweep 1024-8192 on v6e,
    cap ~2048-4096 on v7x/v5e (see vmem_limit_bytes below).
    """
    N = x.shape[0]
    w0, b0, w1, b1, w2, b2, wo, bo = params

    # --- static tile sizing (all Python-level; tm is a static argnum) ---
    tm = max(128, (tm // 128) * 128)
    tm_eff = min(tm, _round_up(N, 128))
    n_pad = _round_up(N, tm_eff)
    grid = (n_pad // tm_eff,)

    # --- lane-dense input: (N, 2) -> (2, n_pad), zero-padded batch ---
    xT = jnp.zeros((IN_DIM, n_pad), jnp.float32).at[:, :N].set(x.T)

    # --- weights pre-transposed to (out, in), zero-padded, bf16; biases (out, 1) f32 ---
    w0T = jnp.zeros((WIDTH, K_PAD), jnp.bfloat16).at[:, :PE_DIM].set(
        w0.T.astype(jnp.bfloat16))
    w1T = w1.T.astype(jnp.bfloat16)
    w2T = w2.T.astype(jnp.bfloat16)
    woT = jnp.zeros((OUT_PAD, WIDTH), jnp.bfloat16).at[:OUT_DIM, :].set(
        wo.T.astype(jnp.bfloat16))
    b0T = b0.reshape(WIDTH, 1).astype(jnp.float32)
    b1T = b1.reshape(WIDTH, 1).astype(jnp.float32)
    b2T = b2.reshape(WIDTH, 1).astype(jnp.float32)
    boT = jnp.zeros((OUT_PAD, 1), jnp.float32).at[:OUT_DIM, :].set(
        bo.reshape(OUT_DIM, 1))

    # constant index_map -> DMA'd once, VMEM-resident across the whole grid
    const = lambda shape: pl.BlockSpec(shape, lambda i: (0, 0))

    outT = pl.pallas_call(
        _fcnet_kernel,
        out_shape=jax.ShapeDtypeStruct((OUT_PAD, n_pad), jnp.float32),
        grid_spec=pltpu.PrefetchScalarGridSpec(
            num_scalar_prefetch=0,
            grid=grid,
            in_specs=[
                pl.BlockSpec((IN_DIM, tm_eff), lambda i: (0, i)),   # xT
                const((WIDTH, K_PAD)), const((WIDTH, 1)),           # w0T, b0T
                const((WIDTH, WIDTH)), const((WIDTH, 1)),           # w1T, b1T
                const((WIDTH, WIDTH)), const((WIDTH, 1)),           # w2T, b2T
                const((OUT_PAD, WIDTH)), const((OUT_PAD, 1)),       # woT, boT
            ],
            out_specs=pl.BlockSpec((OUT_PAD, tm_eff), lambda i: (0, i)),
            scratch_shapes=[pltpu.VMEM((K_PAD, tm_eff), jnp.float32)],
        ),
        compiler_params=pltpu.CompilerParams(
            dimension_semantics=("parallel",),          # shards grid over v7x's 2 TCs
            vmem_limit_bytes=48 * 1024 * 1024,          # < 64 MiB physical on v7x
        ),
    )(xT, w0T, b0T, w1T, b1T, w2T, b2T, woT, boT)

    # undo padding / transpose: (8, n_pad) -> (N, 3)
    return outT[:OUT_DIM, :N].T


def init_params(key):
    """Deterministic init mimicking nn.Linear's U(-1/sqrt(fan_in), 1/sqrt(fan_in))."""
    dims = [(PE_DIM, WIDTH), (WIDTH, WIDTH), (WIDTH, WIDTH), (WIDTH, OUT_DIM)]
    params = []
    for (fan_in, fan_out) in dims:
        key, kw, kb = jax.random.split(key, 3)
        bound = 1.0 / jnp.sqrt(jnp.float32(fan_in))
        w = jax.random.uniform(kw, (fan_in, fan_out), jnp.float32, -bound, bound)
        b = jax.random.uniform(kb, (1, fan_out), jnp.float32, -bound, bound)
        params += [w, b]
    return tuple(params)


def fcnet_reference(x, params):
    """Pure-JAX f32 reference of FCNet.forward for correctness checking."""
    w0, b0, w1, b1, w2, b2, wo, bo = params
    feats = [x]
    for r in range(NUM_RES):
        feats.append(jnp.sin(x * (2.0 ** r)))
        feats.append(jnp.cos(x * (2.0 ** r)))
    h = jnp.concatenate(feats, axis=-1)
    h = jnp.maximum(h @ w0 + b0, 0.0)
    h = jnp.maximum(h @ w1 + b1, 0.0)
    h = jnp.maximum(h @ w2 + b2, 0.0)
    return h @ wo + bo


if __name__ == "__main__":
    key = jax.random.PRNGKey(0)
    key, kx = jax.random.split(key)

    N = 1000                                  # ragged batch (exercises padding path)
    x = jax.random.uniform(kx, (N, IN_DIM), jnp.float32, -1.0, 1.0)
    params = init_params(key)

    # tm=256 here so the small demo still runs a multi-step grid (grid=4);
    # for real workloads use the default tm=2048 (or sweep 1024-8192).
    out = fcnet_forward(x, params, tm=256)
    out = jax.block_until_ready(out)

    ref = fcnet_reference(x, params)
    assert out.shape == (N, OUT_DIM)
    # bf16 matmuls (f32 accumulation) -> widened tolerance vs. the f32 reference.
    assert jnp.allclose(out, ref, atol=3e-2, rtol=3e-2), float(
        jnp.max(jnp.abs(out - ref)))

    print("KERNEL_OK")
</pallas_src>

<mosaic_0001>
module attributes {stable_mosaic.version = 11 : i64} {
  func.func @_fcnet_kernel(%arg0: i32, %arg1: memref<2x256xf32, #tpu.memory_space<vmem>>, %arg2: memref<256x32xbf16, #tpu.memory_space<vmem>>, %arg3: memref<256x1xf32, #tpu.memory_space<vmem>>, %arg4: memref<256x256xbf16, #tpu.memory_space<vmem>>, %arg5: memref<256x1xf32, #tpu.memory_space<vmem>>, %arg6: memref<256x256xbf16, #tpu.memory_space<vmem>>, %arg7: memref<256x1xf32, #tpu.memory_space<vmem>>, %arg8: memref<8x256xbf16, #tpu.memory_space<vmem>>, %arg9: memref<8x1xf32, #tpu.memory_space<vmem>>, %arg10: memref<8x256xf32, #tpu.memory_space<vmem>>, %arg11: memref<32x256xf32, #tpu.memory_space<vmem>>) attributes {dimension_semantics = [#tpu.dimension_semantics<parallel>], iteration_bounds = array<i64: 4>, scalar_prefetch = 0 : i64, scratch_operands = 1 : i64, tpu.core_type = #tpu.core_type<tc>, window_params = [{transform_indices = @transform_0, window_bounds = array<i64: 2, 256>}, {pipeline_mode = #tpu.pipeline_mode<synchronous>, transform_indices = @transform_1, window_bounds = array<i64: 256, 32>}, {pipeline_mode = #tpu.pipeline_mode<synchronous>, transform_indices = @transform_2, window_bounds = array<i64: 256, 1>}, {pipeline_mode = #tpu.pipeline_mode<synchronous>, transform_indices = @transform_3, window_bounds = array<i64: 256, 256>}, {pipeline_mode = #tpu.pipeline_mode<synchronous>, transform_indices = @transform_4, window_bounds = array<i64: 256, 1>}, {pipeline_mode = #tpu.pipeline_mode<synchronous>, transform_indices = @transform_5, window_bounds = array<i64: 256, 256>}, {pipeline_mode = #tpu.pipeline_mode<synchronous>, transform_indices = @transform_6, window_bounds = array<i64: 256, 1>}, {pipeline_mode = #tpu.pipeline_mode<synchronous>, transform_indices = @transform_7, window_bounds = array<i64: 8, 256>}, {pipeline_mode = #tpu.pipeline_mode<synchronous>, transform_indices = @transform_8, window_bounds = array<i64: 8, 1>}, {transform_indices = @transform_9, window_bounds = array<i64: 8, 256>}]} {
    %c0 = arith.constant 0 : index
    %c0_0 = arith.constant 0 : index
    %0 = vector.load %arg1[%c0, %c0_0] : memref<2x256xf32, #tpu.memory_space<vmem>>, vector<2x256xf32>
    %c0_1 = arith.constant 0 : index
    %c0_2 = arith.constant 0 : index
    %1 = vector.load %arg11[%c0_1, %c0_2] : memref<32x256xf32, #tpu.memory_space<vmem>>, vector<2x256xf32>
    tpu.vector_store %arg11[%c0_1, %c0_2], %0 {strides = array<i32>} : memref<32x256xf32, #tpu.memory_space<vmem>>, vector<2x256xf32>,
    %cst = arith.constant 1.000000e+00 : f32
    %2 = vector.broadcast %cst : f32 to vector<2x256xf32>
    %3 = arith.mulf %0, %2 : vector<2x256xf32>
    %4 = math.sin %3 : vector<2x256xf32>
    %c2 = arith.constant 2 : index
    %c0_3 = arith.constant 0 : index
    %5 = vector.load %arg11[%c2, %c0_3] : memref<32x256xf32, #tpu.memory_space<vmem>>, vector<2x256xf32>
    tpu.vector_store %arg11[%c2, %c0_3], %4 {strides = array<i32>} : memref<32x256xf32, #tpu.memory_space<vmem>>, vector<2x256xf32>,
    %6 = math.cos %3 : vector<2x256xf32>
    %c4 = arith.constant 4 : index
    %c0_4 = arith.constant 0 : index
    %7 = vector.load %arg11[%c4, %c0_4] : memref<32x256xf32, #tpu.memory_space<vmem>>, vector<2x256xf32>
    tpu.vector_store %arg11[%c4, %c0_4], %6 {strides = array<i32>} : memref<32x256xf32, #tpu.memory_space<vmem>>, vector<2x256xf32>,
    %cst_5 = arith.constant 2.000000e+00 : f32
    %8 = vector.broadcast %cst_5 : f32 to vector<2x256xf32>
    %9 = arith.mulf %0, %8 : vector<2x256xf32>
    %10 = math.sin %9 : vector<2x256xf32>
    %c6 = arith.constant 6 : index
    %c0_6 = arith.constant 0 : index
    %11 = vector.load %arg11[%c6, %c0_6] : memref<32x256xf32, #tpu.memory_space<vmem>>, vector<2x256xf32>
    tpu.vector_store %arg11[%c6, %c0_6], %10 {strides = array<i32>} : memref<32x256xf32, #tpu.memory_space<vmem>>, vector<2x256xf32>,
    %12 = math.cos %9 : vector<2x256xf32>
    %c8 = arith.constant 8 : index
    %c0_7 = arith.constant 0 : index
    %13 = vector.load %arg11[%c8, %c0_7] : memref<32x256xf32, #tpu.memory_space<vmem>>, vector<2x256xf32>
    tpu.vector_store %arg11[%c8, %c0_7], %12 {strides = array<i32>} : memref<32x256xf32, #tpu.memory_space<vmem>>, vector<2x256xf32>,
    %cst_8 = arith.constant 4.000000e+00 : f32
    %14 = vector.broadcast %cst_8 : f32 to vector<2x256xf32>
    %15 = arith.mulf %0, %14 : vector<2x256xf32>
    %16 = math.sin %15 : vector<2x256xf32>
    %c10 = arith.constant 10 : index
    %c0_9 = arith.constant 0 : index
    %17 = vector.load %arg11[%c10, %c0_9] : memref<32x256xf32, #tpu.memory_space<vmem>>, vector<2x256xf32>
    tpu.vector_store %arg11[%c10, %c0_9], %16 {strides = array<i32>} : memref<32x256xf32, #tpu.memory_space<vmem>>, vector<2x256xf32>,
    %18 = math.cos %15 : vector<2x256xf32>
    %c12 = arith.constant 12 : index
    %c0_10 = arith.constant 0 : index
    %19 = vector.load %arg11[%c12, %c0_10] : memref<32x256xf32, #tpu.memory_space<vmem>>, vector<2x256xf32>
    tpu.vector_store %arg11[%c12, %c0_10], %18 {strides = array<i32>} : memref<32x256xf32, #tpu.memory_space<vmem>>, vector<2x256xf32>,
    %cst_11 = arith.constant 8.000000e+00 : f32
    %20 = vector.broadcast %cst_11 : f32 to vector<2x256xf32>
    %21 = arith.mulf %0, %20 : vector<2x256xf32>
    %22 = math.sin %21 : vector<2x256xf32>
    %c14 = arith.constant 14 : index
    %c0_12 = arith.constant 0 : index
    %23 = vector.load %arg11[%c14, %c0_12] : memref<32x256xf32, #tpu.memory_space<vmem>>, vector<2x256xf32>
    tpu.vector_store %arg11[%c14, %c0_12], %22 {strides = array<i32>} : memref<32x256xf32, #tpu.memory_space<vmem>>, vector<2x256xf32>,
    %24 = math.cos %21 : vector<2x256xf32>
    %c16 = arith.constant 16 : index
    %c0_13 = arith.constant 0 : index
    %25 = vector.load %arg11[%c16, %c0_13] : memref<32x256xf32, #tpu.memory_space<vmem>>, vector<2x256xf32>
    tpu.vector_store %arg11[%c16, %c0_13], %24 {strides = array<i32>} : memref<32x256xf32, #tpu.memory_space<vmem>>, vector<2x256xf32>,
    %cst_14 = arith.constant 1.600000e+01 : f32
    %26 = vector.broadcast %cst_14 : f32 to vector<2x256xf32>
    %27 = arith.mulf %0, %26 : vector<2x256xf32>
    %28 = math.sin %27 : vector<2x256xf32>
    %c18 = arith.constant 18 : index
    %c0_15 = arith.constant 0 : index
    %29 = vector.load %arg11[%c18, %c0_15] : memref<32x256xf32, #tpu.memory_space<vmem>>, vector<2x256xf32>
    tpu.vector_store %arg11[%c18, %c0_15], %28 {strides = array<i32>} : memref<32x256xf32, #tpu.memory_space<vmem>>, vector<2x256xf32>,
    %30 = math.cos %27 : vector<2x256xf32>
    %c20 = arith.constant 20 : index
    %c0_16 = arith.constant 0 : index
    %31 = vector.load %arg11[%c20, %c0_16] : memref<32x256xf32, #tpu.memory_space<vmem>>, vector<2x256xf32>
    tpu.vector_store %arg11[%c20, %c0_16], %30 {strides = array<i32>} : memref<32x256xf32, #tpu.memory_space<vmem>>, vector<2x256xf32>,
    %cst_17 = arith.constant 3.200000e+01 : f32
    %32 = vector.broadcast %cst_17 : f32 to vector<2x256xf32>
    %33 = arith.mulf %0, %32 : vector<2x256xf32>
    %34 = math.sin %33 : vector<2x256xf32>
    %c22 = arith.constant 22 : index
    %c0_18 = arith.constant 0 : index
    %35 = vector.load %arg11[%c22, %c0_18] : memref<32x256xf32, #tpu.memory_space<vmem>>, vector<2x256xf32>
    tpu.vector_store %arg11[%c22, %c0_18], %34 {strides = array<i32>} : memref<32x256xf32, #tpu.memory_space<vmem>>, vector<2x256xf32>,
    %36 = math.cos %33 : vector<2x256xf32>
    %c24 = arith.constant 24 : index
    %c0_19 = arith.constant 0 : index
    %37 = vector.load %arg11[%c24, %c0_19] : memref<32x256xf32, #tpu.memory_space<vmem>>, vector<2x256xf32>
    tpu.vector_store %arg11[%c24, %c0_19], %36 {strides = array<i32>} : memref<32x256xf32, #tpu.memory_space<vmem>>, vector<2x256xf32>,
    %cst_20 = arith.constant 0.000000e+00 : f32
    %38 = vector.broadcast %cst_20 : f32 to vector<6x256xf32>
    %c26 = arith.constant 26 : index
    %c0_21 = arith.constant 0 : index
    %39 = vector.load %arg11[%c26, %c0_21] : memref<32x256xf32, #tpu.memory_space<vmem>>, vector<6x256xf32>
    tpu.vector_store %arg11[%c26, %c0_21], %38 {strides = array<i32>} : memref<32x256xf32, #tpu.memory_space<vmem>>, vector<6x256xf32>,
    %c0_22 = arith.constant 0 : index
    %c0_23 = arith.constant 0 : index
    %40 = vector.load %arg11[%c0_22, %c0_23] : memref<32x256xf32, #tpu.memory_space<vmem>>, vector<32x256xf32>
    %41 = arith.truncf %40 : vector<32x256xf32> to vector<32x256xbf16>
    %c0_24 = arith.constant 0 : index
    %c0_25 = arith.constant 0 : index
    %42 = vector.load %arg2[%c0_24, %c0_25] : memref<256x32xbf16, #tpu.memory_space<vmem>>, vector<256x32xbf16>
    %cst_26 = arith.constant dense<0.000000e+00> : vector<256x256xf32>
    %43 = tpu.matmul %42, %41, %cst_26 {dimension_numbers = #tpu.dot_dimension_numbers<[1], [0], [0], [1], [0, 0, 1, 1], [], []>} : vector<256x32xbf16>, vector<32x256xbf16>, vector<256x256xf32> -> vector<256x256xf32>
    %c0_27 = arith.constant 0 : index
    %c0_28 = arith.constant 0 : index
    %44 = vector.load %arg3[%c0_27, %c0_28] : memref<256x1xf32, #tpu.memory_space<vmem>>, vector<256x1xf32>
    %45 = vector.broadcast %44 : vector<256x1xf32> to vector<256x256xf32>
    %46 = arith.addf %43, %45 : vector<256x256xf32>
    %cst_29 = arith.constant 0.000000e+00 : f32
    %47 = vector.broadcast %cst_29 : f32 to vector<256x256xf32>
    %48 = arith.maximumf %46, %47 : vector<256x256xf32>
    %c0_30 = arith.constant 0 : index
    %c0_31 = arith.constant 0 : index
    %49 = vector.load %arg4[%c0_30, %c0_31] : memref<256x256xbf16, #tpu.memory_space<vmem>>, vector<256x256xbf16>
    %50 = arith.truncf %48 : vector<256x256xf32> to vector<256x256xbf16>
    %cst_32 = arith.constant dense<0.000000e+00> : vector<256x256xf32>
    %51 = tpu.matmul %49, %50, %cst_32 {dimension_numbers = #tpu.dot_dimension_numbers<[1], [0], [0], [1], [0, 0, 1, 1], [], []>} : vector<256x256xbf16>, vector<256x256xbf16>, vector<256x256xf32> -> vector<256x256xf32>
    %c0_33 = arith.constant 0 : index
    %c0_34 = arith.constant 0 : index
    %52 = vector.load %arg5[%c0_33, %c0_34] : memref<256x1xf32, #tpu.memory_space<vmem>>, vector<256x1xf32>
    %53 = vector.broadcast %52 : vector<256x1xf32> to vector<256x256xf32>
    %54 = arith.addf %51, %53 : vector<256x256xf32>
    %cst_35 = arith.constant 0.000000e+00 : f32
    %55 = vector.broadcast %cst_35 : f32 to vector<256x256xf32>
    %56 = arith.maximumf %54, %55 : vector<256x256xf32>
    %c0_36 = arith.constant 0 : index
    %c0_37 = arith.constant 0 : index
    %57 = vector.load %arg6[%c0_36, %c0_37] : memref<256x256xbf16, #tpu.memory_space<vmem>>, vector<256x256xbf16>
    %58 = arith.truncf %56 : vector<256x256xf32> to vector<256x256xbf16>
    %cst_38 = arith.constant dense<0.000000e+00> : vector<256x256xf32>
    %59 = tpu.matmul %57, %58, %cst_38 {dimension_numbers = #tpu.dot_dimension_numbers<[1], [0], [0], [1], [0, 0, 1, 1], [], []>} : vector<256x256xbf16>, vector<256x256xbf16>, vector<256x256xf32> -> vector<256x256xf32>
    %c0_39 = arith.constant 0 : index
    %c0_40 = arith.constant 0 : index
    %60 = vector.load %arg7[%c0_39, %c0_40] : memref<256x1xf32, #tpu.memory_space<vmem>>, vector<256x1xf32>
    %61 = vector.broadcast %60 : vector<256x1xf32> to vector<256x256xf32>
    %62 = arith.addf %59, %61 : vector<256x256xf32>
    %cst_41 = arith.constant 0.000000e+00 : f32
    %63 = vector.broadcast %cst_41 : f32 to vector<256x256xf32>
    %64 = arith.maximumf %62, %63 : vector<256x256xf32>
    %c0_42 = arith.constant 0 : index
    %c0_43 = arith.constant 0 : index
    %65 = vector.load %arg8[%c0_42, %c0_43] : memref<8x256xbf16, #tpu.memory_space<vmem>>, vector<8x256xbf16>
    %66 = arith.truncf %64 : vector<256x256xf32> to vector<256x256xbf16>
    %cst_44 = arith.constant dense<0.000000e+00> : vector<8x256xf32>
    %67 = tpu.matmul %65, %66, %cst_44 {dimension_numbers = #tpu.dot_dimension_numbers<[1], [0], [0], [1], [0, 0, 1, 1], [], []>} : vector<8x256xbf16>, vector<256x256xbf16>, vector<8x256xf32> -> vector<8x256xf32>
    %c0_45 = arith.constant 0 : index
    %c0_46 = arith.constant 0 : index
    %68 = vector.load %arg9[%c0_45, %c0_46] : memref<8x1xf32, #tpu.memory_space<vmem>>, vector<8x1xf32>
    %69 = vector.broadcast %68 : vector<8x1xf32> to vector<8x256xf32>
    %70 = arith.addf %67, %69 : vector<8x256xf32>
    %c0_47 = arith.constant 0 : index
    %c0_48 = arith.constant 0 : index
    %71 = vector.load %arg10[%c0_47, %c0_48] : memref<8x256xf32, #tpu.memory_space<vmem>>, vector<8x256xf32>
    tpu.vector_store %arg10[%c0_47, %c0_48], %70 {strides = array<i32>} : memref<8x256xf32, #tpu.memory_space<vmem>>, vector<8x256xf32>,
    return
  }
  func.func @transform_0(%arg0: i32) -> (i32, i32) {
    %c0_i32 = arith.constant 0 : i32
    %c0_i32_0 = arith.constant 0 : i32
    return %c0_i32, %arg0 : i32, i32
  }
  func.func @transform_1(%arg0: i32) -> (i32, i32) {
    %c0_i32 = arith.constant 0 : i32
    %c0_i32_0 = arith.constant 0 : i32
    %c0_i32_1 = arith.constant 0 : i32
    return %c0_i32, %c0_i32_0 : i32, i32
  }
  func.func @transform_2(%arg0: i32) -> (i32, i32) {
    %c0_i32 = arith.constant 0 : i32
    %c0_i32_0 = arith.constant 0 : i32
    %c0_i32_1 = arith.constant 0 : i32
    return %c0_i32, %c0_i32_0 : i32, i32
  }
  func.func @transform_3(%arg0: i32) -> (i32, i32) {
    %c0_i32 = arith.constant 0 : i32
    %c0_i32_0 = arith.constant 0 : i32
    %c0_i32_1 = arith.constant 0 : i32
    return %c0_i32, %c0_i32_0 : i32, i32
  }
  func.func @transform_4(%arg0: i32) -> (i32, i32) {
    %c0_i32 = arith.constant 0 : i32
    %c0_i32_0 = arith.constant 0 : i32
    %c0_i32_1 = arith.constant 0 : i32
    return %c0_i32, %c0_i32_0 : i32, i32
  }
  func.func @transform_5(%arg0: i32) -> (i32, i32) {
    %c0_i32 = arith.constant 0 : i32
    %c0_i32_0 = arith.constant 0 : i32
    %c0_i32_1 = arith.constant 0 : i32
    return %c0_i32, %c0_i32_0 : i32, i32
  }
  func.func @transform_6(%arg0: i32) -> (i32, i32) {
    %c0_i32 = arith.constant 0 : i32
    %c0_i32_0 = arith.constant 0 : i32
    %c0_i32_1 = arith.constant 0 : i32
    return %c0_i32, %c0_i32_0 : i32, i32
  }
  func.func @transform_7(%arg0: i32) -> (i32, i32) {
    %c0_i32 = arith.constant 0 : i32
    %c0_i32_0 = arith.constant 0 : i32
    %c0_i32_1 = arith.constant 0 : i32
    return %c0_i32, %c0_i32_0 : i32, i32
  }
  func.func @transform_8(%arg0: i32) -> (i32, i32) {
    %c0_i32 = arith.constant 0 : i32
    %c0_i32_0 = arith.constant 0 : i32
    %c0_i32_1 = arith.constant 0 : i32
    return %c0_i32, %c0_i32_0 : i32, i32
  }
  func.func @transform_9(%arg0: i32) -> (i32, i32) {
    %c0_i32 = arith.constant 0 : i32
    %c0_i32_0 = arith.constant 0 : i32
    return %c0_i32, %arg0 : i32, i32
  }
}

</mosaic_0001>

<bundles_post_ra>
// kernel: fcnet_forward.1
= control target key start
LH: loop header
LB: loop body
LE: loop exit
PB: predicated region body
PF: predicated region fallthrough
CT: control target
= control target key end

     0   :  { %s4297_s30 = smov 0   ;;  %s6096_s0 = inlined_call_operand.vmem [shape: f32[2,1024], index: 0, kind: input, shape index: {}]   ;;  %s6097_s1 = inlined_call_operand.vmem [shape: bf16[256,32], index: 1, kind: input, shape index: {}]   ;;  %s6098_s2 = inlined_call_operand.vmem [shape: f32[256,1], index: 2, kind: input, shape index: {}]   ;;  %s6099_s3 = inlined_call_operand.vmem [shape: bf16[256,256], index: 3, kind: input, shape index: {}]   ;;  %s6100_s4 = inlined_call_operand.vmem [shape: f32[256,1], index: 4, kind: input, shape index: {}]   ;;  %s6101_s5 = inlined_call_operand.vmem [shape: bf16[256,256], index: 5, kind: input, shape index: {}]   ;;  %s6102_s6 = inlined_call_operand.vmem [shape: f32[256,1], index: 6, kind: input, shape index: {}]   ;;  %s6103_s7 = inlined_call_operand.vmem [shape: bf16[8,256], index: 7, kind: input, shape index: {}]   ;;  %s6104_s8 = inlined_call_operand.vmem [shape: f32[8,1], index: 8, kind: input, shape index: {}]   ;;  %s6105_s9 = inlined_call_operand.vmem [shape: f32[8,1024], index: 9, kind: output, shape index: {}]  }
   0x1 LB: > { %s3875_s10 = sadd.s32 4294967295, %s4236_s30   ;;  %p3879_p0 = scmp.ge.s32.totalorder %s4236_s30, 1  ;;  %s4236_s30 = sphi %s4297_s30, %s19_s30  }
   0x2   : > { %p288_p1 = scmp.lt.s32.totalorder %s4236_s30, 5 }
   0x4   : > { %p289_p2 = pnand %p3879_p0, %p288_p1 }
   0x6   : > { %292 = sbr.rel (%p289_p2) target bundleno = 1484 (0x5cc), region = 56 }
   0xb   : > { %v1820_v0 = vld [vmem:[%s6098_s2 + $0x70] sm:$0xff]  ;;  %v1818_v1 = vld [vmem:[%s6098_s2 + $0x60] sm:$0xff]  ;;  %s3880_s15 = sshll.u32 %s3875_s10, 1  ;;  %v4238_v2 = vmov 0   ;;  %v1821_v3 = vld [vmem:[%s6098_s2 + $0x78] sm:$0xff]  ;;  %v342_v7 = vlaneseq  ;;  %v4240_v15 = vmov 0.0  }
   0xc   : > { %4090 = vset.pattern.permute.xlu0 %v4238_v2  ;;  %4091 = vset.pattern.permute.xlu1 %v4238_v2  ;;  %p325_p3 = scmp.lt.s32.totalorder %s3880_s15, 7  ;;  %v1819_v4 = vld [vmem:[%s6098_s2 + $0x68] sm:$0xff]  ;;  %v4239_v5 = vmov 1983009808   ;;  %v1816_v8 = vld [vmem:[%s6098_s2 + $0x50] sm:$0xff]  ;;  %v1817_v9 = vld [vmem:[%s6098_s2 + $0x58] sm:$0xff] }
   0xd   : > { %1910 = vperm.xlu0 %4090, %v1820_v0   ;;  %1900 = vperm.xlu1 %4091, %v1818_v1   ;;  %v340_v6 = vunpack.c.l.s4 %v4239_v5  ;;  %v343_v11 = vshrl.u32 %v342_v7, 7  ;;  %1761 = vst [vmem:[#allocation2 + $0x38] sm:$0xfc] %v4240_v15  ;;  %1760 = vst [vmem:[#allocation2 + $0x30] sm:$0xfc] %v4240_v15  ;;  %v1814_v16 = vld [vmem:[%s6098_s2 + $0x40] sm:$0xff] }
   0xe   : > { %s6203_s15 = smov (!%p325_p3, %s3880_s15), 7  ;;  %2159 = vmatprep.mubr.bf16.mxu0 %v4238_v2  ;;  %2239 = vmatprep.mubr.bf16.mxu1 %v4238_v2  ;;  %v1815_v17 = vld [vmem:[%s6098_s2 + $0x48] sm:$0xff]  ;;  %v1812_v27 = vld [vmem:[%s6098_s2 + $0x30] sm:$0xff]  ;;  %v1813_v28 = vld [vmem:[%s6098_s2 + $0x38] sm:$0xff]  ;;  %v4241_v56 = vmov 683565275  }
   0xf   : > { %s3881_s20 = sshll.u32 %s6203_s15, 1  ;;  %v341_v10 = vunpack.c.0.s8 %v340_v6  ;;  %v1810_v36 = vld [vmem:[%s6098_s2 + $0x20] sm:$0xff]  ;;  %v1811_v37 = vld [vmem:[%s6098_s2 + $0x28] sm:$0xff]  ;;  %v1808_v43 = vld [vmem:[%s6098_s2 + $0x10] sm:$0xff]  ;;  %v4242_v58 = vmov 2475754826  }
  0x10   : > { %s328_s23 = scalar_lea.vmem %s6096_s0, %s3881_s20  ;;  %v1809_v44 = vld [vmem:[%s6098_s2 + $0x18] sm:$0xff]  ;;  %v1806_v60 = vld [vmem:[%s6098_s2] sm:$0xff]  ;;  %v1807_v61 = vld [vmem:[%s6098_s2 + $0x8] sm:$0xff]  ;;  %v4243_v62 = vmov 2131351028   ;;  %s3883_s10 = sshll.u32 %s6203_s15, 3 }
  0x11   : > { %1915 = vperm.xlu0 %4090, %v1821_v3   ;;  %1905 = vperm.xlu1 %4091, %v1819_v4   ;;  %v4333_v12 = vld [vmem:[%s328_s23] sm:$0xf]  ;;  %v4348_v18 = vsub.s32 %v341_v10, %v343_v11  ;;  %v4244_v0 = vmov 2102212464   ;;  %v4245_v3 = vmov 920167782   ;;  %s334_s13 = scalar_lea.vmem %s6105_s9, %s3883_s10 }
  0x12   : > { %v4336_v13 = vmul.f32 8.0, %v4333_v12  ;;  %v4339_v14 = vmul.f32 16.0, %v4333_v12  ;;  %3884 = vst.sshfl [vmem:[#allocation2] sm:$0x3 pattern:$0x76325410] %v4333_v12 }
  0x13   : > { %v4351_v19 = vmul.f32 32.0, %v4333_v12  ;;  %v345_v24 = vrot.slane %v4333_v12, %v4348_v18  ;;  %v354_v46 = vand.u32 2139095040, %v4333_v12  ;;  %v4246_v10 = vmov 1326507024  }
  0x14   : > { %v1056_v20 = vand.u32 2147483647, %v4336_v13  ;;  %v1059_v21 = vand.u32 2139095040, %v4336_v13  ;;  %v1291_v22 = vand.u32 2147483647, %v4339_v14  ;;  %v1294_v23 = vand.u32 2139095040, %v4339_v14 }
  0x15   : > { %1890 = vperm.xlu0 %4090, %v1816_v8   ;;  %1895 = vperm.xlu1 %4091, %v1817_v9   ;;  %v1529_v31 = vand.u32 2139095040, %v4351_v19  ;;  %v346_v35 = vcombine.high %v345_v24, %v345_v24  ;;  %vm1058_vm13 = vcmp.lt.s32.totalorder %v4336_v13, 0 }
  0x16   : > { %v1060_v25 = vshrl.u32 %v1059_v21, 23  ;;  %v1063_v26 = vand.u32 8388607, %v1056_v20  ;;  %v1295_v29 = vshrl.u32 %v1294_v23, 23  ;;  %v1298_v30 = vand.u32 8388607, %v1291_v22 }
  0x17   : > { %v1530_v34 = vshrl.u32 %v1529_v31, 23  ;;  %350 = vst [vmem:[#allocation2 + $0x8] sm:$0x3] %v346_v35  ;;  %v1836_v21 = vld [vmem:[%s6098_s2 + $0xf0] sm:$0xff]  ;;  %v1837_v23 = vld [vmem:[%s6098_s2 + $0xf8] sm:$0xff] }
  0x18   : > { %v3915_v32 = vadd.s32 4294967169, %v1060_v25  ;;  %v3925_v33 = vadd.s32 4294967169, %v1295_v29  ;;  %v1064_v38 = vor.u32 8388608, %v1063_v26  ;;  %v1299_v40 = vor.u32 8388608, %v1298_v30 }
  0x19   : > { %1880 = vperm.xlu0 %4090, %v1814_v16   ;;  %1885 = vperm.xlu1 %4091, %v1815_v17   ;;  %v3935_v42 = vadd.s32 4294967169, %v1530_v34  ;;  %vm4560_vm14 = vcmp.le.f32.partialorder %v1056_v20, 0.7853982  ;;  %v1824_v20 = vld [vmem:[%s6098_s2 + $0x90] sm:$0xff] }
  0x1a   : > { %v1066_v39 = vadd.s32 1, %v3915_v32  ;;  %v1301_v41 = vadd.s32 1, %v3925_v33  ;;  %v4385_v49 = vshll.u32 %v1064_v38, 8  ;;  %v4391_v53 = vshll.u32 %v1299_v40, 8  ;;  %v1835_v40 = vld [vmem:[%s6098_s2 + $0xe8] sm:$0xff] }
  0x1b   : > { %v4393_v54 = vadd.s32 1, %v3935_v42 }
  0x1c   : > { %vm1067_vm0 = vcmp.gt.s32.totalorder %v1066_v39, 0  ;;  %vm1302_vm1 = vcmp.gt.s32.totalorder %v1301_v41, 0 }
  0x1d   : > { %1870 = vperm.xlu0 %4090, %v1812_v27   ;;  %1875 = vperm.xlu1 %4091, %v1813_v28   ;;  %v1068_v45 = vsel %vm1067_vm0, %v1066_v39, 0  ;;  %v1303_v50 = vsel %vm1302_vm1, %v1301_v41, 0  ;;  %vm1537_vm6 = vcmp.gt.s32.totalorder %v4393_v54, 0  ;;  %v1834_v39 = vld [vmem:[%s6098_s2 + $0xe0] sm:$0xff] }
  0x1e   : > { %v4383_v47 = vshrl.u32 %v1068_v45, 5  ;;  %v1070_v48 = vand.u32 31, %v1068_v45  ;;  %v4387_v51 = vshrl.u32 %v1303_v50, 5  ;;  %v4389_v52 = vand.u32 31, %v1303_v50 }
  0x20   : > { %v1071_v55 = vsub.s32 32, %v1070_v48  ;;  %v1073_v57 = vshll.u32 %v4241_v56, %v1070_v48  ;;  %v1076_v59 = vshll.u32 %v4242_v58, %v1070_v48  ;;  %v1079_v63 = vshll.u32 %v4243_v62, %v1070_v48 }
  0x21   : > { %1860 = vperm.xlu0 %4090, %v1810_v36   ;;  %1865 = vperm.xlu1 %4091, %v1811_v37   ;;  %v1082_v1 = vshll.u32 %v4244_v0, %v1070_v48  ;;  %v1085_v4 = vshll.u32 %v4245_v3, %v1070_v48  ;;  %vm1088_vm2 = vcmp.lt.s32.totalorder %v4383_v47, 1  ;;  %vm1090_vm3 = vcmp.lt.s32.totalorder %v4383_v47, 3 }
  0x22   : > { %v1072_v5 = vshrl.u32 %v4241_v56, %v1071_v55  ;;  %v1074_v6 = vshrl.u32 %v4242_v58, %v1071_v55  ;;  %v1077_v7 = vshrl.u32 %v4243_v62, %v1071_v55  ;;  %v1080_v8 = vshrl.u32 %v4244_v0, %v1071_v55 }
  0x23   : > { %v1083_v9 = vshrl.u32 %v4245_v3, %v1071_v55  ;;  %v1086_v11 = vshrl.u32 %v4246_v10, %v1071_v55  ;;  %vm1091_vm4 = vcmp.lt.s32.totalorder %v4383_v47, 4  ;;  %v1306_v17 = vsub.s32 32, %v4389_v52 }
  0x24   : > { %v1075_v15 = vor.u32 %v1074_v6, %v1073_v57  ;;  %v1078_v16 = vor.u32 %v1077_v7, %v1076_v59  ;;  %v1081_v24 = vor.u32 %v1080_v8, %v1079_v63  ;;  %v1308_v27 = vshll.u32 %v4241_v56, %v4389_v52  ;;  %v1833_v6 = vld [vmem:[%s6098_s2 + $0xd8] sm:$0xff] }
  0x25   : > { %1850 = vperm.xlu0 %4090, %v1808_v43   ;;  %1855 = vperm.xlu1 %4091, %v1809_v44   ;;  %v1084_v25 = vor.u32 %v1083_v9, %v1082_v1  ;;  %v1087_v26 = vor.u32 %v1086_v11, %v1085_v4  ;;  %vm1089_vm5 = vcmp.lt.s32.totalorder %v4383_v47, 2  ;;  %v1311_v30 = vshll.u32 %v4242_v58, %v4389_v52 }
  0x26   : > { %v1092_v28 = vsel %vm1088_vm2, %v1072_v5, %v1075_v15  ;;  %v1096_v29 = vsel %vm1088_vm2, %v1075_v15, %v1078_v16  ;;  %v1093_v31 = vsel %vm1091_vm4, %v1081_v24, 2102212464  ;;  %v1100_v33 = vsel %vm1088_vm2, %v1078_v16, %v1081_v24  ;;  %v1832_v5 = vld [vmem:[%s6098_s2 + $0xd0] sm:$0xff] }
  0x27   : > { %v1097_v32 = vsel %vm1091_vm4, %v1084_v25, 920167782  ;;  %v1101_v34 = vsel %vm1091_vm4, %v1087_v26, 1326507024  ;;  %v1094_v35 = vsel %vm1090_vm3, %v1078_v16, %v1093_v31  ;;  %v1309_v38 = vshrl.u32 %v4242_v58, %v1306_v17 }
  0x28   : > { %v1098_v36 = vsel %vm1090_vm3, %v1081_v24, %v1097_v32  ;;  %v1102_v37 = vsel %vm1090_vm3, %v1084_v25, %v1101_v34  ;;  %v1095_v41 = vsel %vm1089_vm5, %v1092_v28, %v1094_v35  ;;  %v1312_v44 = vshrl.u32 %v4243_v62, %v1306_v17  ;;  %v1830_v24 = vld [vmem:[%s6098_s2 + $0xc0] sm:$0xff]  ;;  %v1831_v25 = vld [vmem:[%s6098_s2 + $0xc8] sm:$0xff] }
  0x29   : > { %1840 = vperm.xlu0 %4090, %v1806_v60   ;;  %1845 = vperm.xlu1 %4091, %v1807_v61   ;;  %v1099_v42 = vsel %vm1089_vm5, %v1096_v29, %v1098_v36  ;;  %v1103_v43 = vsel %vm1089_vm5, %v1100_v33, %v1102_v37  ;;  %v1307_v57 = vshrl.u32 %v4241_v56, %v1306_v17  ;;  %vm1323_vm7 = vcmp.lt.s32.totalorder %v4387_v51, 1 }
  0x2a   : > { %v4461_v45 = vmul.u32.u64.low %v4385_v49, %v1103_v43  ;;  %v4462_v48 = vmul.u32.u64.high %v4385_v49, %v1103_v43, %v4461_v45  ;;  %v4465_v50 = vmul.u32.u64.low %v4385_v49, %v1099_v42  ;;  %v4466_v55 = vmul.u32.u64.high %v4385_v49, %v1099_v42, %v4465_v50 }
  0x2b   : > { %v1310_v59 = vor.u32 %v1309_v38, %v1308_v27  ;;  %v1313_v60 = vor.u32 %v1312_v44, %v1311_v30  ;;  %v1314_v47 = vshll.u32 %v4243_v62, %v4389_v52  ;;  %v1315_v61 = vshrl.u32 %v4244_v0, %v1306_v17 }
  0x2c   : > { %v1317_v63 = vshll.u32 %v4244_v0, %v4389_v52  ;;  %v1318_v1 = vshrl.u32 %v4245_v3, %v1306_v17  ;;  %v1320_v4 = vshll.u32 %v4245_v3, %v4389_v52  ;;  %v1111_v7 = vmul.u32 %v4385_v49, %v1095_v41 }
  0x2d   : > { %1990 = vperm.xlu0 %4090, %v1836_v21   ;;  %1995 = vperm.xlu1 %4091, %v1837_v23   ;;  %v1321_v8 = vshrl.u32 %v4246_v10, %v1306_v17  ;;  %vm1324_vm8 = vcmp.lt.s32.totalorder %v4387_v51, 2  ;;  %vm1113_vm9 = vc.u32 %v4462_v48, %v4465_v50  ;;  %v1114_v52 = vadd.s32 1, %v4466_v55 }
  0x2e   : > { %v1316_v9 = vor.u32 %v1315_v61, %v1314_v47  ;;  %vm1326_vm10 = vcmp.lt.s32.totalorder %v4387_v51, 4  ;;  %v1319_v11 = vor.u32 %v1318_v1, %v1317_v63  ;;  %vm1325_vm11 = vcmp.lt.s32.totalorder %v4387_v51, 3  ;;  %v1829_v51 = vld [vmem:[%s6098_s2 + $0xb8] sm:$0xff]  ;;  %v1826_v47 = vld [vmem:[%s6098_s2 + $0xa0] sm:$0xff] }
  0x2f   : > { %v1322_v15 = vor.u32 %v1321_v8, %v1320_v4  ;;  %v1327_v49 = vsel %vm1323_vm7, %v1307_v57, %v1310_v59  ;;  %v1115_v16 = vsel %vm1113_vm9, %v1114_v52, %v4466_v55  ;;  %v1331_v21 = vsel %vm1323_vm7, %v1310_v59, %v1313_v60 }
  0x30   : > { %v1328_v17 = vsel %vm1326_vm10, %v1316_v9, 2102212464  ;;  %v1335_v23 = vsel %vm1323_vm7, %v1313_v60, %v1316_v9  ;;  %v1116_v26 = vadd.s32 %v1115_v16, %v1111_v7  ;;  %v1332_v28 = vsel %vm1326_vm10, %v1319_v11, 920167782 }
  0x31   : > { %1980 = vperm.xlu0 %4090, %v1834_v39   ;;  %1985 = vperm.xlu1 %4091, %v1835_v40   ;;  %v1329_v27 = vsel %vm1325_vm11, %v1313_v60, %v1328_v17  ;;  %v1336_v29 = vsel %vm1326_vm10, %v1322_v15, 1326507024  ;;  %v1333_v30 = vsel %vm1325_vm11, %v1316_v9, %v1332_v28  ;;  %v1526_v32 = vand.u32 2147483647, %v4351_v19 }
  0x32   : > { %v1337_v31 = vsel %vm1325_vm11, %v1319_v11, %v1336_v29  ;;  %v1538_v33 = vsel %vm1537_vm6, %v4393_v54, 0  ;;  %v1117_v34 = vadd.s32 536870912, %v1116_v26  ;;  %v1330_v35 = vsel %vm1324_vm8, %v1327_v49, %v1329_v27  ;;  %v1828_v54 = vld [vmem:[%s6098_s2 + $0xb0] sm:$0xff] }
  0x33   : > { %v1334_v36 = vsel %vm1324_vm8, %v1331_v21, %v1333_v30  ;;  %v1338_v37 = vsel %vm1324_vm8, %v1335_v23, %v1337_v31  ;;  %v1540_v43 = vand.u32 31, %v1538_v33  ;;  %v351_v44 = vand.u32 2147483647, %v4333_v12 }
  0x34   : > { %v4511_v38 = vmul.u32.u64.low %v4391_v53, %v1338_v37  ;;  %v4512_v39 = vmul.u32.u64.high %v4391_v53, %v1338_v37, %v4511_v38  ;;  %v4515_v40 = vmul.u32.u64.low %v4391_v53, %v1334_v36  ;;  %v4516_v41 = vmul.u32.u64.high %v4391_v53, %v1334_v36, %v4515_v40 }
  0x35   : > { %1970 = vperm.xlu0 %4090, %v1832_v5   ;;  %1975 = vperm.xlu1 %4091, %v1833_v6   ;;  %v1118_v42 = vshrl.u32 %v1117_v34, 30  ;;  %v1346_v55 = vmul.u32 %v4391_v53, %v1330_v35  ;;  %v4529_v57 = vand.u32 8388607, %v1526_v32  ;;  %v355_v60 = vshrl.u32 %v354_v46, 23  ;;  %v1827_v53 = vld [vmem:[%s6098_s2 + $0xa8] sm:$0xff] }
  0x36   : > { %vm1348_vm12 = vc.u32 %v4512_v39, %v4515_v40  ;;  %v1349_v59 = vadd.s32 1, %v4516_v41  ;;  %v1541_v1 = vsub.s32 32, %v1540_v43  ;;  %v4546_v4 = vmul.f32 2.0, %v4333_v12 }
  0x37   : > { %v1119_v45 = vshll.u32 %v1118_v42, 30  ;;  %v1534_v6 = vor.u32 8388608, %v4529_v57  ;;  %v1112_v7 = vadd.s32 %v4465_v50, %v4462_v48  ;;  %v1552_v8 = vshll.u32 %v4244_v0, %v1540_v43 }
  0x38   : > { %v1350_v63 = vsel %vm1348_vm12, %v1349_v59, %v4516_v41  ;;  %v3885_v52 = vadd.s32 4294967169, %v355_v60  ;;  %v4556_v9 = vand.u32 8388607, %v351_v44  ;;  %v4565_v49 = vshrl.u32 %v1538_v33, 5 }
  0x39   : > { %1960 = vperm.xlu0 %4090, %v1830_v24   ;;  %1965 = vperm.xlu1 %4091, %v1831_v25   ;;  %v4539_v61 = vsub.s32 %v1116_v26, %v1119_v45  ;;  %v1351_v5 = vadd.s32 %v1350_v63, %v1346_v55  ;;  %v1543_v16 = vshll.u32 %v4241_v56, %v1540_v43  ;;  %v1142_v25 = vsub.s32 4, %v1118_v42 }
  0x3a   : > { %v1546_v48 = vshll.u32 %v4242_v58, %v1540_v43  ;;  %v1544_v17 = vshrl.u32 %v4242_v58, %v1541_v1  ;;  %v1547_v21 = vshrl.u32 %v4243_v62, %v1541_v1  ;;  %v1553_v23 = vshrl.u32 %v4245_v3, %v1541_v1 }
  0x3b   : > { %v1122_v46 = vsub.s32 0, %v4539_v61  ;;  %v1352_v50 = vadd.s32 536870912, %v1351_v5  ;;  %v1549_v26 = vshll.u32 %v4243_v62, %v1540_v43  ;;  %v1550_v27 = vshrl.u32 %v4244_v0, %v1541_v1 }
  0x3c   : > { %v1554_v29 = vor.u32 %v1553_v23, %v1552_v8  ;;  %v1555_v30 = vshll.u32 %v4245_v3, %v1540_v43  ;;  %v1556_v31 = vshrl.u32 %v4246_v10, %v1541_v1  ;;  %vm1558_vm15 = vcmp.lt.s32.totalorder %v4565_v49, 1 }
  0x3d   : > { %1950 = vperm.xlu0 %4090, %v1828_v54   ;;  %1955 = vperm.xlu1 %4091, %v1829_v51   ;;  %v3916_v15 = vmin.u32 %v1122_v46, %v4539_v61  ;;  %v4577_v28 = vshrl.u32 %v1352_v50, 30  ;;  %vm1559_vm0 = vcmp.lt.s32.totalorder %v4565_v49, 2  ;;  %vm1561_vm1 = vcmp.lt.s32.totalorder %v4565_v49, 4  ;;  %v1822_v54 = vld [vmem:[%s6098_s2 + $0x80] sm:$0xff] }
  0x3e   : > { %v1545_v35 = vor.u32 %v1544_v17, %v1543_v16  ;;  %v1548_v36 = vor.u32 %v1547_v21, %v1546_v48  ;;  %vm1560_vm2 = vcmp.lt.s32.totalorder %v4565_v49, 3  ;;  %v1143_v37 = vsel %vm1058_vm13, %v1142_v25, %v1118_v42 }
  0x3f   : > { %v1124_v24 = vclz %v3916_v15  ;;  %v1354_v34 = vshll.u32 %v4577_v28, 30  ;;  %v1551_v38 = vor.u32 %v1550_v27, %v1549_v26  ;;  %v1557_v41 = vor.u32 %v1556_v31, %v1555_v30 }
  0x40   : > { %v1567_v45 = vsel %vm1561_vm1, %v1554_v29, 920167782  ;;  %v361_v55 = vadd.s32 1, %v3885_v52  ;;  %v1145_v42 = vsel %vm4560_vm14, 0, %v1143_v37  ;;  %v1566_v46 = vsel %vm1558_vm15, %v1545_v35, %v1548_v36 }
  0x41   : > { %1940 = vperm.xlu0 %4090, %v1826_v47   ;;  %1945 = vperm.xlu1 %4091, %v1827_v53   ;;  %v3917_v33 = vadd.s32 4294967294, %v1124_v24  ;;  %v4591_v43 = vsub.s32 %v1351_v5, %v1354_v34  ;;  %v1542_v47 = vshrl.u32 %v4241_v56, %v1541_v1  ;;  %v1563_v63 = vsel %vm1561_vm1, %v1551_v38, 2102212464 }
  0x42   : > { %v1571_v1 = vsel %vm1561_vm1, %v1557_v41, 1326507024  ;;  %v1570_v15 = vsel %vm1558_vm15, %v1548_v36, %v1551_v38  ;;  %v1574_v16 = vshll.u32 %v1534_v6, 8  ;;  %v359_v48 = vor.u32 8388608, %v4556_v9 }
  0x43   : > { %vm3918_vm3 = vcmp.lt.s32.totalorder %v3917_v33, 0  ;;  %v1357_v53 = vsub.s32 0, %v4591_v43  ;;  %v1149_v21 = vadd.s32 3, %v1145_v42  ;;  %vm1293_vm4 = vcmp.lt.s32.totalorder %v4339_v14, 0 }
  0x44   : > { %v1127_v51 = vsel %vm3918_vm3, 0, %v3917_v33  ;;  %v1564_v24 = vsel %vm1560_vm2, %v1548_v36, %v1563_v63  ;;  %vm362_vm5 = vcmp.gt.s32.totalorder %v361_v55, 0  ;;  %v1377_v41 = vsub.s32 4, %v4577_v28 }
  0x45   : > { %1930 = vperm.xlu0 %4090, %v1824_v20   ;;  %v1128_v57 = vsub.s32 32, %v1127_v51  ;;  %v1129_v59 = vshll.u32 %v4539_v61, %v1127_v51  ;;  %v1132_v60 = vsub.s32 4294967266, %v1127_v51  ;;  %v1568_v61 = vsel %vm1560_vm2, %v1551_v38, %v1567_v45 }
  0x46   : > { %v3926_v52 = vmin.u32 %v1357_v53, %v4591_v43  ;;  %v1562_v20 = vsel %vm1558_vm15, %v1542_v47, %v1545_v35  ;;  %v1569_v6 = vsel %vm1559_vm0, %v1566_v46, %v1568_v61  ;;  %v1347_v38 = vadd.s32 %v4515_v40, %v4512_v39 }
  0x47   : > { %v1130_v5 = vshrl.u32 %v1112_v7, %v1128_v57  ;;  %v1133_v8 = vadd.s32 127, %v1132_v60  ;;  %v1572_v7 = vsel %vm1560_vm2, %v1554_v29, %v1571_v1  ;;  %v363_v29 = vsel %vm362_vm5, %v361_v55, 0 }
  0x48   : > { %v1359_v23 = vclz %v3926_v52  ;;  %v1573_v27 = vsel %vm1559_vm0, %v1570_v15, %v1572_v7  ;;  %v1565_v35 = vsel %vm1559_vm0, %v1562_v20, %v1564_v24  ;;  %v4635_v45 = vand.u32 3, %v1149_v21 }
  0x49   : > { %1920 = vperm.xlu0 %4090, %v1822_v54   ;;  %v1131_v50 = vor.u32 %v1130_v5, %v1129_v59  ;;  %v1134_v17 = vshll.u32 %v1133_v8, 23  ;;  %v4623_v31 = vmul.u32.u64.low %v1574_v16, %v1573_v27  ;;  %v4624_v33 = vmul.u32.u64.high %v1574_v16, %v1573_v27, %v4623_v31 }
  0x4a   : > { %v3927_v30 = vadd.s32 4294967294, %v1359_v23  ;;  %v4628_v37 = vmul.u32.u64.low %v1574_v16, %v1569_v6  ;;  %v4629_v36 = vmul.u32.u64.high %v1574_v16, %v1569_v6, %v4628_v37  ;;  %v365_v54 = vand.u32 31, %v363_v29 }
  0x4b   : > { %v1135_v25 = vor.u32 4788187, %v1134_v17  ;;  %v1138_v26 = vcvt.s32.f32 %v1131_v50  ;;  %v4637_v57 = vand.u32 3, %v1145_v42  ;;  %v1581_v47 = vmul.u32 %v1574_v16, %v1565_v35 }
  0x4c   : > { %vm3928_vm6 = vcmp.lt.s32.totalorder %v3927_v30, 0  ;;  %vm1583_vm7 = vc.u32 %v4624_v33, %v4628_v37  ;;  %v1584_v39 = vadd.s32 1, %v4629_v36  ;;  %v366_v40 = vsub.s32 32, %v365_v54 }
  0x4d   : > { %v1136_v34 = vand.u32 2147483647, %v1135_v25  ;;  %v1362_v55 = vsel %vm3928_vm6, 0, %v3927_v30  ;;  %vm4645_vm8 = vcmp.le.f32.partialorder %v1291_v22, 0.7853982  ;;  %v4652_v5 = vshrl.u32 %v363_v29, 5 }
  0x4e   : > { %v1363_v59 = vsub.s32 32, %v1362_v55  ;;  %v1364_v49 = vshll.u32 %v4591_v43, %v1362_v55  ;;  %v1367_v60 = vsub.s32 4294967266, %v1362_v55  ;;  %v1378_v43 = vsel %vm1293_vm4, %v1377_v41, %v4577_v28 }
  0x4f   : > { %v1139_v51 = vmul.f32 %v1138_v26, %v1136_v34  ;;  %v1585_v61 = vsel %vm1583_vm7, %v1584_v39, %v4629_v36  ;;  %v368_v1 = vshll.u32 %v4241_v56, %v365_v54  ;;  %v369_v22 = vshrl.u32 %v4242_v58, %v366_v40 }
  0x50   : > { %v1365_v42 = vshrl.u32 %v1347_v38, %v1363_v59  ;;  %v1368_v46 = vadd.s32 127, %v1367_v60  ;;  %v1586_v50 = vadd.s32 %v1585_v61, %v1581_v47  ;;  %v371_v28 = vshll.u32 %v4242_v58, %v365_v54 }
  0x51   : > { %v1140_v53 = vxor.u32 2147483648, %v1139_v51  ;;  %v372_v17 = vshrl.u32 %v4243_v62, %v366_v40  ;;  %v374_v21 = vshll.u32 %v4243_v62, %v365_v54  ;;  %v370_v24 = vor.u32 %v369_v22, %v368_v1 }
  0x52   : > { %v1366_v15 = vor.u32 %v1365_v42, %v1364_v49  ;;  %v1369_v16 = vshll.u32 %v1368_v46, 23  ;;  %v1587_v20 = vadd.s32 536870912, %v1586_v50  ;;  %v375_v6 = vshrl.u32 %v4244_v0, %v366_v40 }
  0x53   : > { %v1141_v8 = vsel %vm1058_vm13, %v1140_v53, %v1139_v51  ;;  %v377_v11 = vshll.u32 %v4244_v0, %v365_v54  ;;  %v378_v25 = vshrl.u32 %v4245_v3, %v366_v40  ;;  %v380_v30 = vshll.u32 %v4245_v3, %v365_v54 }
  0x54   : > { %v1144_v52 = vsel %vm4560_vm14, %v4336_v13, %v1141_v8  ;;  %v1370_v7 = vor.u32 4788187, %v1369_v16  ;;  %v1373_v23 = vcvt.s32.f32 %v1366_v15  ;;  %v4668_v27 = vshrl.u32 %v1587_v20, 30 }
  0x55   : > { %4206 = vcosq.f32 %v1144_v52  ;;  %v381_v31 = vshrl.u32 %v4246_v10, %v366_v40  ;;  %v373_v29 = vor.u32 %v372_v17, %v371_v28  ;;  %v376_v34 = vor.u32 %v375_v6, %v374_v21 }
  0x56   : > { %4208 = vsinq.f32 %v1144_v52  ;;  %v1371_v26 = vand.u32 2147483647, %v1370_v7  ;;  %v379_v35 = vor.u32 %v378_v25, %v377_v11  ;;  %vm386_vm9 = vcmp.lt.s32.totalorder %v4652_v5, 4 }
  0x57   : > { %v1589_v38 = vshll.u32 %v4668_v27, 30  ;;  %vm383_vm10 = vcmp.lt.s32.totalorder %v4652_v5, 1  ;;  %vm385_vm11 = vcmp.lt.s32.totalorder %v4652_v5, 3  ;;  %vm1269_vm12 = vcmp.eq.s32.totalorder %v4637_v57, 0 }
  0x58   : > { %v1374_v36 = vmul.f32 %v1373_v23, %v1371_v26  ;;  %v1380_v41 = vsel %vm4645_vm8, 0, %v1378_v43  ;;  %v367_v54 = vshrl.u32 %v4241_v56, %v366_v40  ;;  %v382_v51 = vor.u32 %v381_v31, %v380_v30 }
  0x59   : > { %v392_v55 = vsel %vm386_vm9, %v379_v35, 920167782  ;;  %vm1268_vm13 = vcmp.lt.s32.totalorder %v4637_v57, 2  ;;  %vm1272_vm14 = vcmp.eq.s32.totalorder %v4637_v57, 2  ;;  %v4684_v49 = vsub.s32 %v1586_v50, %v1589_v38 }
  0x5a   : > { %v1375_v59 = vxor.u32 2147483648, %v1374_v36  ;;  %v388_v60 = vsel %vm386_vm9, %v376_v34, 2102212464  ;;  %vm1148_vm15 = vweird.f32 %v4336_v13  ;;  %vm1151_vm0 = vcmp.lt.s32.totalorder %v4635_v45, 2 }
  0x5b   : > { %vm384_vm1 = vcmp.lt.s32.totalorder %v4652_v5, 2  ;;  %v391_v47 = vsel %vm383_vm10, %v370_v24, %v373_v29  ;;  %v393_v53 = vsel %vm385_vm11, %v376_v34, %v392_v55  ;;  %v1384_v40 = vadd.s32 3, %v1380_v41 }
  0x5c   : > { %v1376_v39 = vsel %vm1293_vm4, %v1375_v59, %v1374_v36  ;;  %v1592_v42 = vsub.s32 0, %v4684_v49  ;;  %v4700_v46 = vshll.u32 %v359_v48, 8  ;;  %v387_v8 = vsel %vm383_vm10, %v367_v54, %v370_v24 }
  0x5d   : > { %v1379_v43 = vsel %vm4645_vm8, %v4339_v14, %v1376_v39  ;;  %v389_v61 = vsel %vm385_vm11, %v373_v29, %v388_v60  ;;  %v396_v1 = vsel %vm386_vm9, %v382_v51, 1326507024  ;;  %v394_v9 = vsel %vm384_vm1, %v391_v47, %v393_v53 }
  0x5e   : > { %4210 = vcosq.f32 %v1379_v43  ;;  %v3936_v22 = vmin.u32 %v1592_v42, %v4684_v49  ;;  %v395_v48 = vsel %vm383_vm10, %v373_v29, %v376_v34  ;;  %vm1152_vm2 = vcmp.eq.s32.totalorder %v4635_v45, 0 }
  0x5f   : > { %vm1155_vm3 = vcmp.eq.s32.totalorder %v4635_v45, 2  ;;  %4212 = vsinq.f32 %v1379_v43  ;;  %v397_v63 = vsel %vm385_vm11, %v379_v35, %v396_v1  ;;  %v4720_v15 = vand.u32 3, %v1384_v40 }
  0x60   : > { %v4722_v16 = vand.u32 3, %v1380_v41  ;;  %v1594_v50 = vclz %v3936_v22  ;;  %v390_v28 = vsel %vm384_vm1, %v387_v8, %v389_v61  ;;  %v398_v7 = vsel %vm384_vm1, %v395_v48, %v397_v63 }
  0x61   : > { %v4729_v23 = vmul.u32.u64.low %v4700_v46, %v394_v9  ;;  %v4730_v20 = vmul.u32.u64.high %v4700_v46, %v394_v9, %v4729_v23  ;;  %v4734_v11 = vmul.u32.u64.low %v4700_v46, %v398_v7  ;;  %v4735_v25 = vmul.u32.u64.high %v4700_v46, %v398_v7, %v4734_v11 }
  0x62   : > { %v4207_v52 = vpop.eup %4206  ;;  %v3937_v6 = vadd.s32 4294967294, %v1594_v50  ;;  %vm1528_vm4 = vcmp.lt.s32.totalorder %v4351_v19, 0  ;;  %v1582_v5 = vadd.s32 %v4628_v37, %v4624_v33  ;;  %v406_v31 = vmul.u32 %v4700_v46, %v390_v28 }
  0x63   : > { %v4209_v17 = vpop.eup %4208  ;;  %v1156_v21 = vxor.u32 2147483648, %v4207_v52  ;;  %v589_v35 = vand.u32 2139095040, %v4546_v4  ;;  %v409_v33 = vadd.s32 1, %v4730_v20  ;;  %vm1383_vm6 = vweird.f32 %v4339_v14 }
  0x64   : > { %v1153_v24 = vxor.u32 2147483648, %v4209_v17  ;;  %vm3938_vm5 = vcmp.lt.s32.totalorder %v3937_v6, 0  ;;  %vm4760_vm7 = vcmp.le.f32.partialorder %v1526_v32, 0.7853982  ;;  %vm1503_vm8 = vcmp.lt.s32.totalorder %v4722_v16, 2 }
  0x65   : > { %v1157_v26 = vsel %vm1155_vm3, %v1156_v21, %v4209_v17  ;;  %v1274_v30 = vsel %vm1272_vm14, %v1156_v21, %v4209_v17  ;;  %v1597_v41 = vsel %vm3938_vm5, 0, %v3937_v6  ;;  %v1612_v47 = vsub.s32 4, %v4668_v27 }
  0x66   : > { %v1154_v29 = vsel %vm1152_vm2, %v4207_v52, %v1153_v24  ;;  %v1271_v34 = vsel %vm1269_vm12, %v4207_v52, %v1153_v24  ;;  %v1598_v45 = vsub.s32 32, %v1597_v41  ;;  %v1599_v57 = vshll.u32 %v4684_v49, %v1597_v41 }
  0x67   : > { %v1158_v36 = vsel %vm1151_vm0, %v1154_v29, %v1157_v26  ;;  %v1275_v38 = vsel %vm1268_vm13, %v1271_v34, %v1274_v30  ;;  %v1602_v60 = vsub.s32 4294967266, %v1597_v41  ;;  %vm408_vm9 = vc.u32 %v4735_v25, %v4729_v23 }
  0x68   : > { %v1159_v37 = vsel %vm1148_vm15, nan, %v1158_v36  ;;  %v1276_v54 = vsel %vm1148_vm15, nan, %v1275_v38  ;;  %v1600_v13 = vshrl.u32 %v1582_v5, %v1598_v45  ;;  %v590_v32 = vshrl.u32 %v589_v35, 23 }
  0x69   : > { %v4765_v55 = vcombine.low %v1159_v37, %v1159_v37  ;;  %v1284_v59 = vrot.slane %v1276_v54, %v4348_v18  ;;  %3924 = vst.sshfl [vmem:[#allocation2 + $0x20] sm:$0x3 pattern:$0x76325410] %v1276_v54  ;;  %vm1504_vm10 = vcmp.eq.s32.totalorder %v4722_v16, 0  ;;  %v1603_v39 = vadd.s32 127, %v1602_v60 }
  0x6a   : > { %v410_v49 = vsel %vm408_vm9, %v409_v33, %v4730_v20  ;;  %vm1507_vm11 = vcmp.eq.s32.totalorder %v4722_v16, 2  ;;  %v1601_v40 = vor.u32 %v1600_v13, %v1599_v57  ;;  %v3895_v46 = vadd.s32 4294967169, %v590_v32 }
  0x6b   : > { %v1285_v53 = vcombine.high %v1284_v59, %v1284_v59  ;;  %3919 = vst.sshfl [vmem:[#allocation2 + $0x18] sm:$0xc0 pattern:$0x76325410] %v4765_v55  ;;  %v411_v42 = vadd.s32 %v410_v49, %v406_v31  ;;  %v4211_v43 = vpop.eup %4210  ;;  %vm1386_vm12 = vcmp.lt.s32.totalorder %v4720_v15, 2  ;;  %vm1387_vm13 = vcmp.eq.s32.totalorder %v4720_v15, 0 }
  0x6c   : > { %vm1390_vm14 = vcmp.eq.s32.totalorder %v4720_v15, 2  ;;  %v1604_v8 = vshll.u32 %v1603_v39, 23  ;;  %v4213_v61 = vpop.eup %4212  ;;  %v1391_v1 = vxor.u32 2147483648, %v4211_v43  ;;  %v1613_v22 = vsel %vm1528_vm4, %v1612_v47, %v4668_v27 }
  0x6d   : > { %1289 = vst [vmem:[#allocation2 + $0x28] sm:$0x3] %v1285_v53  ;;  %v412_v9 = vadd.s32 536870912, %v411_v42  ;;  %v596_v48 = vadd.s32 1, %v3895_v46  ;;  %v1388_v63 = vxor.u32 2147483648, %v4213_v61  ;;  %v1608_v50 = vcvt.s32.f32 %v1601_v40  ;;  %v1825_v46 = vld [vmem:[%s6098_s2 + $0x98] sm:$0xff] }
  0x6e   : > { %v1605_v52 = vor.u32 4788187, %v1604_v8  ;;  %v586_v28 = vand.u32 2147483647, %v4546_v4  ;;  %v1392_v17 = vsel %vm1390_vm14, %v1391_v1, %v4213_v61  ;;  %v1509_v21 = vsel %vm1507_vm11, %v1391_v1, %v4213_v61  ;;  %1935 = vperm.xlu1 %4091, %v1825_v46   ;;  %v2461_v46 = vld [vmem:[%s6100_s4 + $0x68] sm:$0xff] }
  0x6f   : > { %v4785_v7 = vshrl.u32 %v412_v9, 30  ;;  %vm597_vm15 = vcmp.gt.s32.totalorder %v596_v48, 0  ;;  %v1389_v20 = vsel %vm1387_vm13, %v4211_v43, %v1388_v63  ;;  %v1506_v27 = vsel %vm1504_vm10, %v4211_v43, %v1388_v63  ;;  %v2462_v43 = vld [vmem:[%s6100_s4 + $0x70] sm:$0xff] }
  0x70   : > { %v1606_v24 = vand.u32 2147483647, %v1605_v52  ;;  %v1615_v6 = vsel %vm4760_vm7, 0, %v1613_v22  ;;  %v1393_v11 = vsel %vm1386_vm12, %v1389_v20, %v1392_v17  ;;  %v1510_v26 = vsel %vm1503_vm8, %v1506_v27, %v1509_v21  ;;  %2552 = vperm.xlu0 %4090, %v2462_v43   ;;  %v1823_v21 = vld [vmem:[%s6098_s2 + $0x88] sm:$0xff]  ;;  %v2460_v20 = vld [vmem:[%s6100_s4 + $0x60] sm:$0xff] }
  0x71   : > { %v414_v30 = vshll.u32 %v4785_v7, 30  ;;  %v598_v5 = vsel %vm597_vm15, %v596_v48, 0  ;;  %v1394_v31 = vsel %vm1383_vm6, nan, %v1393_v11  ;;  %v1511_v29 = vsel %vm1383_vm6, nan, %v1510_v26  ;;  %v2456_v43 = vld [vmem:[%s6100_s4 + $0x40] sm:$0xff] }
  0x72   : > { %v1609_v34 = vmul.f32 %v1608_v50, %v1606_v24  ;;  %v593_v35 = vand.u32 8388607, %v586_v28  ;;  %v1396_v36 = vcombine.low %v1394_v31, %v1394_v31  ;;  %3934 = vst.sshfl [vmem:[#allocation2 + $0x28] sm:$0xc pattern:$0x76325410] %v1511_v29  ;;  %v1519_v15 = vrot.slane %v1511_v29, %v4348_v18  ;;  %1925 = vperm.xlu1 %4091, %v1823_v21  }
  0x73   : > { %v4805_v38 = vsub.s32 %v411_v42, %v414_v30  ;;  %v1619_v41 = vadd.s32 3, %v1615_v6  ;;  %v600_v33 = vand.u32 31, %v598_v5  ;;  %v4814_v47 = vand.u32 3, %v1615_v6 }
  0x74   : > { %v1610_v16 = vxor.u32 2147483648, %v1609_v34  ;;  %v1403_v37 = vrot.slane %v1396_v36, %v4348_v18  ;;  %3929 = vst.sshfl [vmem:[#allocation2 + $0x20] sm:$0x30 pattern:$0x76325410] %v1396_v36  ;;  %v1520_v54 = vcombine.low %v1519_v15, %v1519_v15  ;;  %v594_v57 = vor.u32 8388608, %v593_v35  ;;  %2542 = vperm.xlu0 %4090, %v2460_v20  }
  0x75   : > { %v417_v14 = vsub.s32 0, %v4805_v38  ;;  %v601_v59 = vsub.s32 32, %v600_v33  ;;  %v4817_v53 = vand.u32 3, %v1619_v41  ;;  %v407_v39 = vadd.s32 %v4729_v23, %v4735_v25  ;;  %v2458_v35 = vld [vmem:[%s6100_s4 + $0x50] sm:$0xff] }
  0x76   : > { %v1611_v45 = vsel %vm1528_vm4, %v1610_v16, %v1609_v34  ;;  %v1404_v60 = vcombine.high %v1403_v37, %v1403_v37  ;;  %1523 = vst [vmem:[#allocation2 + $0x20] sm:$0x30] %v1520_v54  ;;  %v603_v49 = vshll.u32 %v4241_v56, %v600_v33  ;;  %v4822_v42 = vshrl.u32 %v598_v5, 5  ;;  %v2463_v34 = vld [vmem:[%s6100_s4 + $0x78] sm:$0xff] }
  0x77   : > { %v1614_v13 = vsel %vm4760_vm7, %v4351_v19, %v1611_v45  ;;  %v3886_v32 = vmin.u32 %v417_v14, %v4805_v38  ;;  %v4825_v51 = vmul.f32 4.0, %v4333_v12  ;;  %v602_v23 = vshrl.u32 %v4241_v56, %v601_v59  ;;  %2557 = vperm.xlu1 %4091, %v2463_v34  }
  0x78   : > { %4214 = vcosq.f32 %v1614_v13  ;;  %1408 = vst [vmem:[#allocation2 + $0x28] sm:$0xc] %v1404_v60  ;;  %v604_v25 = vshrl.u32 %v4242_v58, %v601_v59  ;;  %v606_v8 = vshll.u32 %v4242_v58, %v600_v33  ;;  %v4836_v61 = vshll.u32 %v594_v57, 8  ;;  %2532 = vperm.xlu0 %4090, %v2458_v35  }
  0x79   : > { %4216 = vsinq.f32 %v1614_v13  ;;  %v419_v40 = vclz %v3886_v32  ;;  %v607_v22 = vshrl.u32 %v4243_v62, %v601_v59  ;;  %v609_v9 = vshll.u32 %v4243_v62, %v600_v33 }
  0x7a   : > { %v610_v48 = vshrl.u32 %v4244_v0, %v601_v59  ;;  %v605_v63 = vor.u32 %v604_v25, %v603_v49  ;;  %v612_v52 = vshll.u32 %v4244_v0, %v600_v33  ;;  %v613_v50 = vshrl.u32 %v4245_v3, %v601_v59 }
  0x7b   : > { %v3887_v1 = vadd.s32 4294967294, %v419_v40  ;;  %v615_v17 = vshll.u32 %v4245_v3, %v600_v33  ;;  %vm1742_vm0 = vcmp.eq.s32.totalorder %v4814_v47, 2  ;;  %v608_v27 = vor.u32 %v607_v22, %v606_v8  ;;  %2547 = vperm.xlu1 %4091, %v2461_v46  }
  0x7c   : > { %v616_v24 = vshrl.u32 %v4246_v10, %v601_v59  ;;  %vm618_vm2 = vcmp.lt.s32.totalorder %v4822_v42, 1  ;;  %vm1622_vm3 = vcmp.eq.s32.totalorder %v4817_v53, 0  ;;  %vm1739_vm4 = vcmp.eq.s32.totalorder %v4814_v47, 0  ;;  %2522 = vperm.xlu0 %4090, %v2456_v43  }
  0x7d   : > { %vm3888_vm1 = vcmp.lt.s32.totalorder %v3887_v1, 0  ;;  %vm353_vm5 = vcmp.lt.s32.totalorder %v4333_v12, 0  ;;  %v611_v11 = vor.u32 %v610_v48, %v609_v9  ;;  %v614_v26 = vor.u32 %v613_v50, %v612_v52 }
  0x7e   : > { %v422_v6 = vsel %vm3888_vm1, 0, %v3887_v1  ;;  %vm620_vm6 = vcmp.lt.s32.totalorder %v4822_v42, 3  ;;  %vm1621_vm7 = vcmp.lt.s32.totalorder %v4817_v53, 2  ;;  %vm1738_vm8 = vcmp.lt.s32.totalorder %v4814_v47, 2 }
  0x7f   : > { %v423_v30 = vsub.s32 32, %v422_v6  ;;  %v424_v5 = vshll.u32 %v4805_v38, %v422_v6  ;;  %v427_v31 = vsub.s32 4294967266, %v422_v6  ;;  %v617_v29 = vor.u32 %v616_v24, %v615_v17  ;;  %v2450_v38 = vld [vmem:[%s6100_s4 + $0x10] sm:$0xff] }
  0x80   : > { %vm1618_vm9 = vweird.f32 %v4351_v19  ;;  %vm619_vm10 = vcmp.lt.s32.totalorder %v4822_v42, 2  ;;  %vm621_vm11 = vcmp.lt.s32.totalorder %v4822_v42, 4  ;;  %v622_v36 = vsel %vm618_vm2, %v602_v23, %v605_v63  ;;  %v2459_v42 = vld [vmem:[%s6100_s4 + $0x58] sm:$0xff] }
  0x81   : > { %v626_v15 = vsel %vm618_vm2, %v605_v63, %v608_v27  ;;  %vm4875_vm12 = vcmp.le.f32.partialorder %v351_v44, 0.7853982  ;;  %v425_v16 = vshrl.u32 %v407_v39, %v423_v30  ;;  %v428_v41 = vadd.s32 127, %v427_v31  ;;  %2537 = vperm.xlu1 %4091, %v2459_v42  }
  0x82   : > { %v623_v33 = vsel %vm621_vm11, %v611_v11, 2102212464  ;;  %v627_v37 = vsel %vm621_vm11, %v614_v26, 920167782  ;;  %v630_v45 = vsel %vm618_vm2, %v608_v27, %v611_v11  ;;  %v631_v57 = vsel %vm621_vm11, %v617_v29, 1326507024 }
  0x83   : > { %v624_v54 = vsel %vm620_vm6, %v608_v27, %v623_v33  ;;  %v628_v14 = vsel %vm620_vm6, %v611_v11, %v627_v37  ;;  %v426_v44 = vor.u32 %v425_v16, %v424_v5  ;;  %v429_v59 = vshll.u32 %v428_v41, 23  ;;  %v2457_v33 = vld [vmem:[%s6100_s4 + $0x48] sm:$0xff]  ;;  %v2452_v37 = vld [vmem:[%s6100_s4 + $0x20] sm:$0xff] }
  0x84   : > { %v437_v60 = vsub.s32 4, %v4785_v7  ;;  %v629_v13 = vsel %vm619_vm10, %v626_v15, %v628_v14  ;;  %v625_v32 = vsel %vm619_vm10, %v622_v36, %v624_v54  ;;  %v632_v39 = vsel %vm620_vm6, %v614_v26, %v631_v57  ;;  %v2454_v26 = vld [vmem:[%s6100_s4 + $0x30] sm:$0xff] }
  0x85   : > { %v4893_v49 = vmul.u32.u64.low %v4836_v61, %v629_v13  ;;  %v4894_v40 = vmul.u32.u64.high %v4836_v61, %v629_v13, %v4893_v49  ;;  %v4215_v23 = vpop.eup %4214  ;;  %vm1625_vm13 = vcmp.eq.s32.totalorder %v4817_v53, 2  ;;  %v430_v25 = vor.u32 4788187, %v429_v59  ;;  %2512 = vperm.xlu0 %4090, %v2454_v26   ;;  %2527 = vperm.xlu1 %4091, %v2457_v33  }
  0x86   : > { %v433_v8 = vcvt.s32.f32 %v426_v44  ;;  %v633_v1 = vsel %vm619_vm10, %v630_v45, %v632_v39  ;;  %v4217_v22 = vpop.eup %4216  ;;  %v1626_v9 = vxor.u32 2147483648, %v4215_v23  ;;  %v824_v52 = vand.u32 2139095040, %v4825_v51 }
  0x87   : > { %v4907_v48 = vmul.u32.u64.low %v4836_v61, %v633_v1  ;;  %v4908_v63 = vmul.u32.u64.high %v4836_v61, %v633_v1, %v4907_v48  ;;  %v1623_v50 = vxor.u32 2147483648, %v4217_v22  ;;  %v431_v17 = vand.u32 2147483647, %v430_v25 }
  0x88   : > { %v438_v21 = vsel %vm353_vm5, %v437_v60, %v4785_v7  ;;  %v641_v20 = vmul.u32 %v4836_v61, %v625_v32  ;;  %v1627_v27 = vsel %vm1625_vm13, %v1626_v9, %v4217_v22  ;;  %v1744_v24 = vsel %vm1742_vm0, %v1626_v9, %v4217_v22  ;;  %v2455_v32 = vld [vmem:[%s6100_s4 + $0x38] sm:$0xff]  ;;  %v2453_v9 = vld [vmem:[%s6100_s4 + $0x28] sm:$0xff]  ;;  %v2448_v48 = vld [vmem:[%s6100_s4] sm:$0xff] }
  0x89   : > { %v644_v6 = vadd.s32 1, %v4894_v40  ;;  %v825_v11 = vshrl.u32 %v824_v52, 23  ;;  %v1624_v7 = vsel %vm1622_vm3, %v4215_v23, %v1623_v50  ;;  %v1741_v61 = vsel %vm1739_vm4, %v4215_v23, %v1623_v50  ;;  %2502 = vperm.xlu0 %4090, %v2452_v37   ;;  %2517 = vperm.xlu1 %4091, %v2455_v32  }
  0x8a   : > { %v434_v30 = vmul.f32 %v433_v8, %v431_v17  ;;  %v1168_v5 = vrot.slane %v4765_v55, %v4348_v18  ;;  %v1628_v31 = vsel %vm1621_vm7, %v1624_v7, %v1627_v27  ;;  %v1745_v29 = vsel %vm1738_vm8, %v1741_v61, %v1744_v24 }
  0x8b   : > { %v440_v34 = vsel %vm4875_vm12, 0, %v438_v21  ;;  %vm643_vm14 = vc.u32 %v4908_v63, %v4893_v49  ;;  %v1629_v35 = vsel %vm1618_vm9, nan, %v1628_v31  ;;  %v1746_v36 = vsel %vm1618_vm9, nan, %v1745_v29  ;;  %v2478_v31 = vld [vmem:[%s6100_s4 + $0xf0] sm:$0xff] }
  0x8c   : > { %v435_v55 = vxor.u32 2147483648, %v434_v30  ;;  %v645_v53 = vsel %vm643_vm14, %v644_v6, %v4894_v40  ;;  %v1631_v15 = vcombine.low %v1629_v35, %v1629_v35  ;;  %v1754_v47 = vrot.slane %v1746_v36, %v4348_v18  ;;  %3944 = vst.sshfl [vmem:[#allocation2 + $0x30] sm:$0x3 pattern:$0x76325410] %v1746_v36 }
  0x8d   : > { %v646_v16 = vadd.s32 %v645_v53, %v641_v20  ;;  %v3905_v41 = vadd.s32 4294967169, %v825_v11  ;;  %v444_v54 = vadd.s32 3, %v440_v34  ;;  %v1169_v14 = vcombine.low %v1168_v5, %v1168_v5  ;;  %2492 = vperm.xlu0 %4090, %v2450_v38   ;;  %2507 = vperm.xlu1 %4091, %v2453_v9   ;;  %v2451_v5 = vld [vmem:[%s6100_s4 + $0x18] sm:$0xff] }
  0x8e   : > { %v436_v19 = vsel %vm353_vm5, %v435_v55, %v434_v30  ;;  %3939 = vst.sshfl [vmem:[#allocation2 + $0x28] sm:$0xc0 pattern:$0x76325410] %v1631_v15  ;;  %v1755_v45 = vcombine.high %v1754_v47, %v1754_v47  ;;  %v1638_v57 = vrot.slane %v1631_v15, %v4348_v18  ;;  %v821_v60 = vand.u32 2147483647, %v4825_v51 }
  0x8f   : > { %v439_v44 = vsel %vm4875_vm12, %v4333_v12, %v436_v19  ;;  %v647_v59 = vadd.s32 536870912, %v646_v16  ;;  %v831_v13 = vadd.s32 1, %v3905_v41  ;;  %1172 = vst [vmem:[#allocation2 + $0x10] sm:$0xc0] %v1169_v14  ;;  %v4967_v46 = vand.u32 3, %v440_v34  ;;  %v2479_v38 = vld [vmem:[%s6100_s4 + $0xf8] sm:$0xff] }
  0x90   : > { %4218 = vcosq.f32 %v439_v44  ;;  %1759 = vst [vmem:[#allocation2 + $0x38] sm:$0x3] %v1755_v45  ;;  %v1639_v39 = vcombine.low %v1638_v57, %v1638_v57  ;;  %v4969_v43 = vand.u32 3, %v444_v54  ;;  %v828_v8 = vand.u32 8388607, %v821_v60 }
  0x91   : > { %4220 = vsinq.f32 %v439_v44  ;;  %v4962_v40 = vshrl.u32 %v647_v59, 30  ;;  %vm832_vm15 = vcmp.gt.s32.totalorder %v831_v13, 0  ;;  %vm564_vm0 = vcmp.eq.s32.totalorder %v4967_v46, 0  ;;  %2482 = vperm.xlu0 %4090, %v2448_v48   ;;  %2497 = vperm.xlu1 %4091, %v2451_v5  }
  0x92   : > { %1642 = vst [vmem:[#allocation2 + $0x20] sm:$0xc0] %v1639_v39  ;;  %v833_v25 = vsel %vm832_vm15, %v831_v13, 0  ;;  %vm446_vm1 = vcmp.lt.s32.totalorder %v4969_v43, 2  ;;  %vm563_vm2 = vcmp.lt.s32.totalorder %v4967_v46, 2  ;;  %vm567_vm3 = vcmp.eq.s32.totalorder %v4967_v46, 2 }
  0x93   : > { %v649_v23 = vshll.u32 %v4962_v40, 30  ;;  %v835_v1 = vand.u32 31, %v833_v25  ;;  %v1768_v42 = vld [vmem:[#allocation2 + $0x30] sm:$0xff]  ;;  %vm443_vm4 = vweird.f32 %v4333_v12  ;;  %v829_v27 = vor.u32 8388608, %v828_v8 }
  0x94   : > { %vm447_vm5 = vcmp.eq.s32.totalorder %v4969_v43, 0  ;;  %vm450_vm6 = vcmp.eq.s32.totalorder %v4969_v43, 2  ;;  %v5005_v34 = vshrl.u32 %v833_v25, 5  ;;  %vm588_vm13 = vcmp.lt.s32.totalorder %v4546_v4, 0 }
  0x95   : > { %v4974_v22 = vsub.s32 %v646_v16, %v649_v23  ;;  %v1767_v52 = vld [vmem:[#allocation2 + $0x28] sm:$0xff]  ;;  %v836_v50 = vsub.s32 32, %v835_v1  ;;  %v838_v21 = vshll.u32 %v4241_v56, %v835_v1  ;;  %v841_v6 = vshll.u32 %v4242_v58, %v835_v1  ;;  %2632 = vperm.xlu0 %4090, %v2478_v31   ;;  %v2474_v23 = vld [vmem:[%s6100_s4 + $0xd0] sm:$0xff] }
  0x96   : > { %v844_v61 = vshll.u32 %v4243_v62, %v835_v1  ;;  %v847_v15 = vshll.u32 %v4244_v0, %v835_v1  ;;  %v5010_v16 = vshll.u32 %v829_v27, 8  ;;  %v850_v33 = vshll.u32 %v4245_v3, %v835_v1 }
  0x97   : > { %v652_v17 = vsub.s32 0, %v4974_v22  ;;  %v1769_v20 = vld [vmem:[#allocation2 + $0x38] sm:$0xff]  ;;  %v839_v24 = vshrl.u32 %v4242_v58, %v836_v50  ;;  %v842_v11 = vshrl.u32 %v4243_v62, %v836_v50  ;;  %v845_v30 = vshrl.u32 %v4244_v0, %v836_v50  ;;  %v2476_v0 = vld [vmem:[%s6100_s4 + $0xe0] sm:$0xff] }
  0x98   : > { %v1773_v26 = vpack.c.bf16 %v1769_v20, %v1767_v52  ;;  %v642_v58 = vadd.s32 %v4893_v49, %v4908_v63  ;;  %v837_v36 = vshrl.u32 %v4241_v56, %v836_v50  ;;  %v848_v47 = vshrl.u32 %v4245_v3, %v836_v50  ;;  %v2449_v56 = vld [vmem:[%s6100_s4 + $0x8] sm:$0xff] }
  0x99   : > { %v3896_v7 = vmin.u32 %v652_v17, %v4974_v22  ;;  %v1766_v29 = vld [vmem:[#allocation2 + $0x20] sm:$0xff]  ;;  %v840_v55 = vor.u32 %v839_v24, %v838_v21  ;;  %v843_v53 = vor.u32 %v842_v11, %v841_v6  ;;  %v846_v63 = vor.u32 %v845_v30, %v844_v61  ;;  %2487 = vperm.xlu1 %4091, %v2449_v56   ;;  %v2477_v24 = vld [vmem:[%s6100_s4 + $0xe8] sm:$0xff] }
  0x9a   : > { %2139 = vmatprep.subr.bf16.mxu0 %v1773_v26  ;;  %4045 = vmatprep.subr.bf16.mxu1 %v1773_v26  ;;  %v1772_v62 = vpack.c.bf16 %v1768_v42, %v1766_v29  ;;  %v851_v37 = vshrl.u32 %v4246_v10, %v836_v50  ;;  %v849_v14 = vor.u32 %v848_v47, %v847_v15  ;;  %vm853_vm7 = vcmp.lt.s32.totalorder %v5005_v34, 1  ;;  %v2472_v6 = vld [vmem:[%s6100_s4 + $0xc0] sm:$0xff]  ;;  %v2475_v47 = vld [vmem:[%s6100_s4 + $0xd8] sm:$0xff] }
  0x9b   : > { %v654_v35 = vclz %v3896_v7  ;;  %vm854_vm8 = vcmp.lt.s32.totalorder %v5005_v34, 2  ;;  %vm855_vm10 = vcmp.lt.s32.totalorder %v5005_v34, 3  ;;  %vm856_vm11 = vcmp.lt.s32.totalorder %v5005_v34, 4  ;;  %2622 = vperm.xlu0 %4090, %v2476_v0   ;;  %v2473_v0 = vld [vmem:[%s6100_s4 + $0xc8] sm:$0xff] }
  0x9c   : > { %2140 = vmatpush1.bf16.msra.mxu0 %v1772_v62  ;;  %4047 = vmatpush1.bf16.msra.mxu1 %v1772_v62  ;;  %v852_v3 = vor.u32 %v851_v37, %v850_v33  ;;  %v858_v9 = vsel %vm856_vm11, %v846_v63, 2102212464  ;;  %v857_v50 = vsel %vm853_vm7, %v837_v36, %v840_v55  ;;  %v861_v21 = vsel %vm853_vm7, %v840_v55, %v843_v53 }
  0x9d   : > { %v4219_v41 = vpop.eup %4218  ;;  %v3897_v49 = vadd.s32 4294967294, %v654_v35  ;;  %v859_v46 = vsel %vm855_vm10, %v843_v53, %v858_v9  ;;  %2637 = vperm.xlu1 %4091, %v2479_v38   ;;  %v862_v12 = vsel %vm856_vm11, %v849_v14, 920167782  ;;  %v865_v42 = vsel %vm853_vm7, %v843_v53, %v846_v63 }
  0x9e   : > { %v4221_v19 = vpop.eup %4220  ;;  %v451_v54 = vxor.u32 2147483648, %v4219_v41  ;;  %v866_v27 = vsel %vm856_vm11, %v852_v3, 1326507024  ;;  %v863_v7 = vsel %vm855_vm10, %v846_v63, %v862_v12  ;;  %v860_v36 = vsel %vm854_vm8, %v857_v50, %v859_v46  ;;  %v3133_v50 = vld [vmem:[%s6102_s6 + $0x60] sm:$0xff] }
  0x9f   : > { %v448_v45 = vxor.u32 2147483648, %v4221_v19  ;;  %vm3898_vm9 = vcmp.lt.s32.totalorder %v3897_v49, 0  ;;  %2612 = vperm.xlu0 %4090, %v2474_v23   ;;  %v867_v61 = vsel %vm855_vm10, %v849_v14, %v866_v27  ;;  %v864_v5 = vsel %vm854_vm8, %v861_v21, %v863_v7  ;;  %v3131_v27 = vld [vmem:[%s6102_s6 + $0x50] sm:$0xff] }
  0xa0   : > { %v452_v10 = vsel %vm450_vm6, %v451_v54, %v4221_v19  ;;  %v569_v57 = vsel %vm567_vm3, %v451_v54, %v4221_v19  ;;  %v657_v44 = vsel %vm3898_vm9, 0, %v3897_v49  ;;  %v868_v31 = vsel %vm854_vm8, %v865_v42, %v867_v61  ;;  %v3136_v42 = vld [vmem:[%s6102_s6 + $0x78] sm:$0xff] }
  0xa1   : > { %v449_v59 = vsel %vm447_vm5, %v4219_v41, %v448_v45  ;;  %v566_v13 = vsel %vm564_vm0, %v4219_v41, %v448_v45  ;;  %v658_v32 = vsub.s32 32, %v657_v44  ;;  %v659_v39 = vshll.u32 %v4974_v22, %v657_v44  ;;  %2627 = vperm.xlu1 %4091, %v2477_v24   ;;  %v2470_v41 = vld [vmem:[%s6100_s4 + $0xb0] sm:$0xff] }
  0xa2   : > { %v453_v25 = vsel %vm446_vm1, %v449_v59, %v452_v10  ;;  %v570_v8 = vsel %vm563_vm2, %v566_v13, %v569_v57  ;;  %v662_v1 = vsub.s32 4294967266, %v657_v44  ;;  %v876_v33 = vmul.u32 %v5010_v16, %v860_v36  ;;  %v2471_v57 = vld [vmem:[%s6100_s4 + $0xb8] sm:$0xff]  ;;  %v2466_v44 = vld [vmem:[%s6100_s4 + $0x90] sm:$0xff] }
  0xa3   : > { %v454_v22 = vsel %vm443_vm4, nan, %v453_v25  ;;  %v571_v48 = vsel %vm443_vm4, nan, %v570_v8  ;;  %v660_v52 = vshrl.u32 %v642_v58, %v658_v32  ;;  %2602 = vperm.xlu0 %4090, %v2472_v6   ;;  %v672_v37 = vsub.s32 4, %v4962_v40  ;;  %v2464_v32 = vld [vmem:[%s6100_s4 + $0x80] sm:$0xff]  ;;  %v2467_v25 = vld [vmem:[%s6100_s4 + $0x98] sm:$0xff]  ;;  %v3135_v8 = vld [vmem:[%s6102_s6 + $0x70] sm:$0xff] }
  0xa4   : > { %v456_v17 = vcombine.low %v454_v22, %v454_v22  ;;  %3894 = vst.sshfl [vmem:[#allocation2 + $0x8] sm:$0xc pattern:$0x76325410] %v571_v48  ;;  %v663_v43 = vadd.s32 127, %v662_v1  ;;  %v5077_v62 = vmul.u32.u64.low %v5010_v16, %v868_v31  ;;  %v5078_v35 = vmul.u32.u64.high %v5010_v16, %v868_v31, %v5077_v62 }
  0xa5   : > { %v661_v20 = vor.u32 %v660_v52, %v659_v39  ;;  %v5083_v55 = vmul.u32.u64.low %v5010_v16, %v864_v5  ;;  %v5084_v53 = vmul.u32.u64.high %v5010_v16, %v864_v5, %v5083_v55  ;;  %v579_v15 = vrot.slane %v571_v48, %v4348_v18  ;;  %2617 = vperm.xlu1 %4091, %v2475_v47   ;;  %v2468_v16 = vld [vmem:[%s6100_s4 + $0xa0] sm:$0xff]  ;;  %v2465_v52 = vld [vmem:[%s6100_s4 + $0x88] sm:$0xff] }
  0xa6   : > { %v463_v11 = vrot.slane %v456_v17, %v4348_v18  ;;  %v664_v26 = vshll.u32 %v663_v43, 23  ;;  %3889 = vst.sshfl [vmem:[#allocation2] sm:$0x30 pattern:$0x76325410] %v456_v17  ;;  %v673_v3 = vsel %vm588_vm13, %v672_v37, %v4962_v40  ;;  %v2469_v40 = vld [vmem:[%s6100_s4 + $0xa8] sm:$0xff]  ;;  %vm678_vm3 = vweird.f32 %v4546_v4 }
  0xa7   : > { %v668_v30 = vcvt.s32.f32 %v661_v20  ;;  %v580_v63 = vcombine.low %v579_v15, %v579_v15  ;;  %vm878_vm12 = vc.u32 %v5078_v35, %v5083_v55  ;;  %2592 = vperm.xlu0 %4090, %v2470_v41   ;;  %v879_v56 = vadd.s32 1, %v5084_v53  ;;  %v3127_v37 = vld [vmem:[%s6102_s6 + $0x30] sm:$0xff] }
  0xa8   : > { %v464_v29 = vcombine.high %v463_v11, %v463_v11  ;;  %v665_v58 = vor.u32 4788187, %v664_v26  ;;  %vm587_vm14 = vcmp.le.f32.partialorder %v586_v28, 0.7853982  ;;  %v877_v11 = vadd.s32 %v5083_v55, %v5078_v35  ;;  %v3134_v35 = vld [vmem:[%s6102_s6 + $0x68] sm:$0xff]  ;;  %v3129_v55 = vld [vmem:[%s6102_s6 + $0x40] sm:$0xff] }
  0xa9   : > { %583 = vst [vmem:[#allocation2] sm:$0x30] %v580_v63  ;;  %v880_v54 = vsel %vm878_vm12, %v879_v56, %v5084_v53  ;;  %2607 = vperm.xlu1 %4091, %v2473_v0   ;;  %v675_v59 = vsel %vm587_vm14, 0, %v673_v3  ;;  %vm823_vm7 = vcmp.lt.s32.totalorder %v4825_v51, 0  ;;  %vm822_vm8 = vcmp.le.f32.partialorder %v821_v60, 0.7853982 }
  0xaa   : > { %468 = vst [vmem:[#allocation2 + $0x8] sm:$0xc] %v464_v29  ;;  %v666_v49 = vand.u32 2147483647, %v665_v58  ;;  %v881_v45 = vadd.s32 %v880_v54, %v876_v33  ;;  %v679_v38 = vadd.s32 3, %v675_v59  ;;  %v797_v22 = vand.u32 3, %v675_v59 }
  0xab   : > { %2582 = vperm.xlu0 %4090, %v2468_v16   ;;  %v3132_v33 = vld [vmem:[%s6102_s6 + $0x58] sm:$0xff]  ;;  %v3130_v54 = vld [vmem:[%s6102_s6 + $0x48] sm:$0xff] }
  0xac   : > { %v669_v34 = vmul.f32 %v668_v30, %v666_v49  ;;  %v882_v28 = vadd.s32 536870912, %v881_v45  ;;  %v680_v9 = vand.u32 3, %v679_v38  ;;  %vm802_vm0 = vcmp.eq.s32.totalorder %v797_v22, 2  ;;  %v3126_v60 = vld [vmem:[%s6102_s6 + $0x28] sm:$0xff]  ;;  %v3151_v38 = vld [vmem:[%s6102_s6 + $0xf0] sm:$0xff] }
  0xad   : > { %2597 = vperm.xlu1 %4091, %v2471_v57   ;;  %vm799_vm2 = vcmp.eq.s32.totalorder %v797_v22, 0  ;;  %vm798_vm5 = vcmp.lt.s32.totalorder %v797_v22, 2  ;;  %v3128_v57 = vld [vmem:[%s6102_s6 + $0x38] sm:$0xff] }
  0xae   : > { %v670_v19 = vxor.u32 2147483648, %v669_v34  ;;  %v5117_v13 = vshrl.u32 %v882_v28, 30  ;;  %vm685_vm15 = vcmp.eq.s32.totalorder %v680_v9, 2  ;;  %vm682_vm1 = vcmp.eq.s32.totalorder %v680_v9, 0  ;;  %v3152_v22 = vld [vmem:[%s6102_s6 + $0xf8] sm:$0xff] }
  0xaf   : > { %2572 = vperm.xlu0 %4090, %v2466_v44   ;;  %vm681_vm4 = vcmp.lt.s32.totalorder %v680_v9, 2  ;;  %v3123_v44 = vld [vmem:[%s6102_s6 + $0x10] sm:$0xff] }
  0xb0   : > { %v671_v14 = vsel %vm588_vm13, %v670_v19, %v669_v34  ;;  %v884_v39 = vshll.u32 %v5117_v13, 30  ;;  %v907_v3 = vsub.s32 4, %v5117_v13 }
  0xb1   : > { %v674_v10 = vsel %vm587_vm14, %v4546_v4, %v671_v14  ;;  %2587 = vperm.xlu1 %4091, %v2469_v40   ;;  %v3125_v14 = vld [vmem:[%s6102_s6 + $0x20] sm:$0xff] }
  0xb2   : > { %4222 = vcosq.f32 %v674_v10  ;;  %v885_v23 = vsub.s32 %v881_v45, %v884_v39  ;;  %v908_v59 = vsel %vm823_vm7, %v907_v3, %v5117_v13  ;;  %v3124_v13 = vld [vmem:[%s6102_s6 + $0x18] sm:$0xff]  ;;  %v4100_v3 = vld [vmem:[%s6097_s1 + $0x20] sm:$0xff]  }
  0xb3   : > { %4224 = vsinq.f32 %v674_v10  ;;  %2562 = vperm.xlu0 %4090, %v2464_v32   ;;  %v3121_v32 = vld [vmem:[%s6102_s6] sm:$0xff]  ;;  %v910_v39 = vsel %vm822_vm8, 0, %v908_v59  ;;  %v4105_v59 = vld [vmem:[%s6097_s1 + $0x70] sm:$0xff]  }
  0xb4   : > { %v887_v1 = vsub.s32 0, %v885_v23  ;;  %v1032_v9 = vand.u32 3, %v910_v39 }
  0xb5   : > { %2577 = vperm.xlu1 %4091, %v2467_v25   ;;  %v3122_v25 = vld [vmem:[%s6102_s6 + $0x8] sm:$0xff] }
  0xb6   : > { %v3906_v48 = vmin.u32 %v887_v1, %v885_v23  ;;  %vm1037_vm10 = vcmp.eq.s32.totalorder %v1032_v9, 2  ;;  %vm1034_vm12 = vcmp.eq.s32.totalorder %v1032_v9, 0  ;;  %vm1033_vm14 = vcmp.lt.s32.totalorder %v1032_v9, 2 }
  0xb7   : > { %3225 = vperm.xlu0 %4090, %v3135_v8   ;;  %v3149_v8 = vld [vmem:[%s6102_s6 + $0xe0] sm:$0xff] }
  0xb8   : > { %v889_v17 = vclz %v3906_v48  ;;  %v3147_v48 = vld [vmem:[%s6102_s6 + $0xd0] sm:$0xff] }
  0xb9   : > { %2567 = vperm.xlu1 %4091, %v2465_v52  }
  0xba   : > { %v3907_v20 = vadd.s32 4294967294, %v889_v17 }
  0xbb   : > { %3215 = vperm.xlu0 %4090, %v3133_v50  }
  0xbc   : > { %vm3908_vm6 = vcmp.lt.s32.totalorder %v3907_v20, 0 }
  0xbd   : > { %v892_v61 = vsel %vm3908_vm6, 0, %v3907_v20  ;;  %3230 = vperm.xlu1 %4091, %v3136_v42   ;;  %v3150_v20 = vld [vmem:[%s6102_s6 + $0xe8] sm:$0xff] }
  0xbe   : > { %v893_v31 = vsub.s32 32, %v892_v61  ;;  %v894_v29 = vshll.u32 %v885_v23, %v892_v61  ;;  %v897_v36 = vsub.s32 4294967266, %v892_v61  ;;  %v914_v23 = vadd.s32 3, %v910_v39  ;;  %v3148_v61 = vld [vmem:[%s6102_s6 + $0xd8] sm:$0xff]  ;;  %v5330_v39 = vpop.permute.xlu1 %1900 }
  0xbf   : > { %v4223_v43 = vpop.eup %4222  ;;  %3205 = vperm.xlu0 %4090, %v3131_v27  }
  0xc0   : > { %v4225_v46 = vpop.eup %4224  ;;  %v686_v21 = vxor.u32 2147483648, %v4223_v43  ;;  %v895_v47 = vshrl.u32 %v877_v11, %v893_v31  ;;  %v898_v41 = vadd.s32 127, %v897_v36  ;;  %v915_v1 = vand.u32 3, %v914_v23  ;;  %v3139_v36 = vld [vmem:[%s6102_s6 + $0x90] sm:$0xff] }
  0xc1   : > { %v683_v12 = vxor.u32 2147483648, %v4225_v46  ;;  %3220 = vperm.xlu1 %4091, %v3134_v35  }
  0xc2   : > { %v687_v24 = vsel %vm685_vm15, %v686_v21, %v4225_v46  ;;  %v804_v6 = vsel %vm802_vm0, %v686_v21, %v4225_v46  ;;  %v896_v63 = vor.u32 %v895_v47, %v894_v29  ;;  %v899_v34 = vshll.u32 %v898_v41, 23  ;;  %v3137_v47 = vld [vmem:[%s6102_s6 + $0x80] sm:$0xff] }
  0xc3   : > { %v684_v26 = vsel %vm682_vm1, %v4223_v43, %v683_v12  ;;  %v801_v7 = vsel %vm799_vm2, %v4223_v43, %v683_v12  ;;  %3195 = vperm.xlu0 %4090, %v3129_v55   ;;  %vm920_vm9 = vcmp.eq.s32.totalorder %v915_v1, 2  ;;  %vm917_vm11 = vcmp.eq.s32.totalorder %v915_v1, 0  ;;  %v3145_v12 = vld [vmem:[%s6102_s6 + $0xc0] sm:$0xff] }
  0xc4   : > { %v688_v30 = vsel %vm681_vm4, %v684_v26, %v687_v24  ;;  %v805_v5 = vsel %vm798_vm5, %v801_v7, %v804_v6  ;;  %v900_v0 = vor.u32 4788187, %v899_v34  ;;  %v903_v16 = vcvt.s32.f32 %v896_v63  ;;  %v4093_v34 = vld [vmem:[%s6097_s1 + $0x40] sm:$0xff]  }
  0xc5   : > { %v689_v58 = vsel %vm678_vm3, nan, %v688_v30  ;;  %v806_v62 = vsel %vm678_vm3, nan, %v805_v5  ;;  %3210 = vperm.xlu1 %4091, %v3132_v33   ;;  %vm916_vm13 = vcmp.lt.s32.totalorder %v915_v1, 2  ;;  %vm913_vm15 = vweird.f32 %v4825_v51  ;;  %v3143_v30 = vld [vmem:[%s6102_s6 + $0xb0] sm:$0xff]  ;;  %v3140_v33 = vld [vmem:[%s6102_s6 + $0x98] sm:$0xff] }
  0xc6   : > { %v691_v53 = vcombine.low %v689_v58, %v689_v58  ;;  %v814_v15 = vrot.slane %v806_v62, %v4348_v18  ;;  %3904 = vst.sshfl [vmem:[#allocation2 + $0x10] sm:$0x3 pattern:$0x76325410] %v806_v62  ;;  %v901_v19 = vand.u32 2147483647, %v900_v0 }
  0xc7   : > { %3185 = vperm.xlu0 %4090, %v3127_v37   ;;  %v3146_v58 = vld [vmem:[%s6102_s6 + $0xc8] sm:$0xff]  ;;  %v3141_v62 = vld [vmem:[%s6102_s6 + $0xa0] sm:$0xff]  ;;  %vm2078_vm0 = vcmask 261120  }
  0xc8   : > { %3899 = vst.sshfl [vmem:[#allocation2 + $0x8] sm:$0xc0 pattern:$0x76325410] %v691_v53  ;;  %v815_v49 = vcombine.high %v814_v15, %v814_v15  ;;  %v698_v4 = vrot.slane %v691_v53, %v4348_v18  ;;  %v904_v45 = vmul.f32 %v903_v16, %v901_v19  ;;  %v3142_v15 = vld [vmem:[%s6102_s6 + $0xa8] sm:$0xff]  ;;  %v3763_v37 = vld [vmem:[%s6104_s8] sm:$0xff] }
  0xc9   : > { %3200 = vperm.xlu1 %4091, %v3130_v54   ;;  %v4094_v0 = vld [vmem:[%s6097_s1 + $0x8] sm:$0xff]   ;;  %v4096_v19 = vld [vmem:[%s6097_s1 + $0x10] sm:$0xff]  }
  0xca   : > { %819 = vst [vmem:[#allocation2 + $0x18] sm:$0x3] %v815_v49  ;;  %v699_v56 = vcombine.low %v698_v4, %v698_v4  ;;  %v905_v10 = vxor.u32 2147483648, %v904_v45  ;;  %v4092_v4 = vld [vmem:[%s6097_s1] sm:$0xff]   ;;  %v4095_v16 = vld [vmem:[%s6097_s1 + $0x48] sm:$0xff]   ;;  %v4097_v54 = vld [vmem:[%s6097_s1 + $0x50] sm:$0xff]  }
  0xcb   : > { %3175 = vperm.xlu0 %4090, %v3125_v14   ;;  %v4098_v14 = vld [vmem:[%s6097_s1 + $0x18] sm:$0xff]  }
  0xcc   : > { %702 = vst [vmem:[#allocation2] sm:$0xc0] %v699_v56  ;;  %v906_v28 = vsel %vm823_vm7, %v905_v10, %v904_v45  ;;  %v3138_v56 = vld [vmem:[%s6102_s6 + $0x88] sm:$0xff]  ;;  %v4099_v45 = vld [vmem:[%s6097_s1 + $0x58] sm:$0xff]   ;;  %v4101_v10 = vld [vmem:[%s6097_s1 + $0x60] sm:$0xff]  }
  0xcd   : > { %v909_v40 = vsel %vm822_vm8, %v4825_v51, %v906_v28  ;;  %3190 = vperm.xlu1 %4091, %v3128_v57   ;;  %v4102_v57 = vld [vmem:[%s6097_s1 + $0x28] sm:$0xff]   ;;  %v4104_v28 = vld [vmem:[%s6097_s1 + $0x30] sm:$0xff]  }
  0xce   : > { %4226 = vcosq.f32 %v909_v40 }
  0xcf   : > { %3165 = vperm.xlu0 %4090, %v3123_v44   ;;  %4228 = vsinq.f32 %v909_v40  ;;  %v1763_v55 = vld [vmem:[#allocation2 + $0x8] sm:$0xff]  ;;  %v4106_v40 = vld [vmem:[%s6097_s1 + $0x38] sm:$0xff]  }
  0xd0   : > { %v4103_v44 = vld [vmem:[%s6097_s1 + $0x68] sm:$0xff]  }
  0xd1   : > { %3180 = vperm.xlu1 %4091, %v3126_v60   ;;  %v4107_v60 = vld [vmem:[%s6097_s1 + $0x78] sm:$0xff]  }
  0xd3   : > { %3155 = vperm.xlu0 %4090, %v3121_v32   ;;  %v1762_v35 = vld [vmem:[#allocation2] sm:$0xff]  ;;  %v5328_v32 = vpop.permute.xlu0 %1910 }
  0xd5   : > { %3170 = vperm.xlu1 %4091, %v3124_v13  }
  0xd7   : > { %3305 = vperm.xlu0 %4090, %v3151_v38   ;;  %v5332_v13 = vpop.permute.xlu0 %1915  ;;  %v5334_v38 = vpop.permute.xlu1 %1905 }
  0xd9   : > { %3160 = vperm.xlu1 %4091, %v3122_v25  }
  0xdb   : > { %3295 = vperm.xlu0 %4090, %v3149_v8   ;;  %v4227_v52 = vpop.eup %4226  ;;  %v5338_v23 = vpop.permute.xlu1 %1895 }
  0xdc   : > { %v4229_v50 = vpop.eup %4228  ;;  %v921_v17 = vxor.u32 2147483648, %v4227_v52 }
  0xdd   : > { %v918_v43 = vxor.u32 2147483648, %v4229_v50  ;;  %3310 = vperm.xlu1 %4091, %v3152_v22  }
  0xde   : > { %v922_v46 = vsel %vm920_vm9, %v921_v17, %v4229_v50  ;;  %v1039_v21 = vsel %vm1037_vm10, %v921_v17, %v4229_v50 }
  0xdf   : > { %3285 = vperm.xlu0 %4090, %v3147_v48   ;;  %v919_v42 = vsel %vm917_vm11, %v4227_v52, %v918_v43  ;;  %v1036_v27 = vsel %vm1034_vm12, %v4227_v52, %v918_v43  ;;  %v5342_v8 = vpop.permute.xlu1 %1885 }
  0xe0   : > { %v923_v24 = vsel %vm916_vm13, %v919_v42, %v922_v46  ;;  %v1040_v6 = vsel %vm1033_vm14, %v1036_v27, %v1039_v21 }
  0xe1   : > { %v924_v11 = vsel %vm913_vm15, nan, %v923_v24  ;;  %v1041_v26 = vsel %vm913_vm15, nan, %v1040_v6  ;;  %3300 = vperm.xlu1 %4091, %v3150_v20  }
  0xe2   : > { %v926_v7 = vcombine.low %v924_v11, %v924_v11  ;;  %3914 = vst.sshfl [vmem:[#allocation2 + $0x18] sm:$0xc pattern:$0x76325410] %v1041_v26  ;;  %v1049_v51 = vrot.slane %v1041_v26, %v4348_v18 }
  0xe3   : > { %3275 = vperm.xlu0 %4090, %v3145_v12   ;;  %v5346_v9 = vpop.permute.xlu1 %1875 }
  0xe4   : > { %v933_v5 = vrot.slane %v926_v7, %v4348_v18  ;;  %3909 = vst.sshfl [vmem:[#allocation2 + $0x10] sm:$0x30 pattern:$0x76325410] %v926_v7  ;;  %v1050_v31 = vcombine.low %v1049_v51, %v1049_v51  ;;  %v3144_v18 = vld [vmem:[%s6102_s6 + $0xb8] sm:$0xff] }
  0xe5   : > { %3290 = vperm.xlu1 %4091, %v3148_v61  }
  0xe6   : > { %v934_v29 = vcombine.high %v933_v5, %v933_v5  ;;  %1053 = vst [vmem:[#allocation2 + $0x10] sm:$0x30] %v1050_v31 }
  0xe7   : > { %3265 = vperm.xlu0 %4090, %v3143_v30   ;;  %v5350_v48 = vpop.permute.xlu1 %1865 }
  0xe8   : > { %938 = vst [vmem:[#allocation2 + $0x18] sm:$0xc] %v934_v29 }
  0xe9   : > { %3280 = vperm.xlu1 %4091, %v3146_v58  }
  0xeb   : > { %3255 = vperm.xlu0 %4090, %v3141_v62   ;;  %v5352_v50 = vpop.permute.xlu1 %1855 }
  0xed   : > { %v1764_v53 = vld [vmem:[#allocation2 + $0x10] sm:$0xff]  ;;  %3270 = vperm.xlu1 %4091, %v3144_v18  }
  0xee   : > { %v1770_v49 = vpack.c.bf16 %v1764_v53, %v1762_v35  ;;  %v4110_v35 = vld [vmem:[%s6099_s3 + $0x4] ss:$8 sps:$4 sm:$0xff]  }
  0xef   : > { %3245 = vperm.xlu0 %4090, %v3139_v36   ;;  %v1765_v41 = vld [vmem:[#allocation2 + $0x18] sm:$0xff]  ;;  %v1846_v43 = vpop.permute.xlu1 %1845 }
  0xf0   : > { %v1771_v63 = vpack.c.bf16 %v1765_v41, %v1763_v55 }
  0xf1   : > { %3260 = vperm.xlu1 %4091, %v3142_v15  }
  0xf2   : > { %2141 = vmatprep.subr.bf16.mxu0 %v1771_v63  ;;  %4046 = vmatprep.subr.bf16.mxu1 %v1771_v63 }
  0xf3   : > { %3235 = vperm.xlu0 %4090, %v3137_v47   ;;  %2142 = vmatpush1.bf16.msra.mxu0 %v1770_v49  ;;  %v5356_v21 = vpop.permute.xlu1 %1995 }
  0xf4   : > { %4048 = vmatpush1.bf16.msra.mxu1 %v1770_v49 }
  0xf5   : > { %3250 = vperm.xlu1 %4091, %v3140_v33  }
  0xf6   : > { %3961 = vmatmul.mubr.msk.bf16.vlgmr.msra.gmra.mxu0 %vm2078_vm0, %v4092_v4 }
  0xf7   : > { %3766 = vperm.xlu0 %4090, %v3763_v37   ;;  %3969 = vmatmul.mubr.msk.bf16.vlgmr.msra.gmra.mxu1 %vm2078_vm0, %v4093_v34  ;;  %v5360_v12 = vpop.permute.xlu1 %1985 }
  0xf8   : > { %2169 = vmatprep.mubr.bf16.mxu0 %v4238_v2  ;;  %2249 = vmatprep.mubr.bf16.mxu1 %v4238_v2 }
  0xf9   : > { %3240 = vperm.xlu1 %4091, %v3138_v56  }
  0xfb   : > { %v5364_v27 = vpop.permute.xlu1 %1975 }
  0xfe   : > { %3962 = vmatmul.mubr.msk.bf16.gmra.mxu0 %vm2078_vm0, %v4094_v0 }
  0xff   : > { %3970 = vmatmul.mubr.msk.bf16.gmra.mxu1 %vm2078_vm0, %v4095_v16  ;;  %2179 = vmatprep.mubr.bf16.mxu0 %v4238_v2  ;;  %v5368_v6 = vpop.permute.xlu1 %1965 }
 0x100   : > { %2259 = vmatprep.mubr.bf16.mxu1 %v4238_v2  ;;  %6132 = vst [vmem:[#allocation3_spill] sm:$0xff] %v5368_v6 }
 0x103   : > { %v5372_v26 = vpop.permute.xlu1 %1955 }
 0x104   : > { %6134 = vst [vmem:[#allocation5_spill] sm:$0xff] %v5372_v26 }
 0x106   : > { %3963 = vmatmul.mubr.msk.bf16.gmra.mxu0 %vm2078_vm0, %v4096_v19 }
 0x107   : > { %3971 = vmatmul.mubr.msk.bf16.gmra.mxu1 %vm2078_vm0, %v4097_v54  ;;  %2189 = vmatprep.mubr.bf16.mxu0 %v4238_v2  ;;  %v5376_v51 = vpop.permute.xlu1 %1945 }
 0x108   : > { %2269 = vmatprep.mubr.bf16.mxu1 %v4238_v2  ;;  %6136 = vst [vmem:[#allocation7_spill] sm:$0xff] %v5376_v51 }
 0x10b   : > { %v1936_v30 = vpop.permute.xlu1 %1935 }
 0x10e   : > { %3964 = vmatmul.mubr.msk.bf16.gmra.mxu0 %vm2078_vm0, %v4098_v14 }
 0x10f   : > { %3972 = vmatmul.mubr.msk.bf16.gmra.mxu1 %vm2078_vm0, %v4099_v45  ;;  %2199 = vmatprep.mubr.bf16.mxu0 %v4238_v2  ;;  %v1926_v55 = vpop.permute.xlu1 %1925 }
 0x110   : > { %2279 = vmatprep.mubr.bf16.mxu1 %v4238_v2 }
 0x116   : > { %3965 = vmatmul.mubr.msk.bf16.gmra.mxu0 %vm2078_vm0, %v4100_v3 }
 0x117   : > { %3973 = vmatmul.mubr.msk.bf16.gmra.mxu1 %vm2078_vm0, %v4101_v10  ;;  %2209 = vmatprep.mubr.bf16.mxu0 %v4238_v2 }
 0x118   : > { %2289 = vmatprep.mubr.bf16.mxu1 %v4238_v2 }
 0x11e   : > { %3966 = vmatmul.mubr.msk.bf16.gmra.mxu0 %vm2078_vm0, %v4102_v57 }
 0x11f   : > { %3974 = vmatmul.mubr.msk.bf16.gmra.mxu1 %vm2078_vm0, %v4103_v44  ;;  %2219 = vmatprep.mubr.bf16.mxu0 %v4238_v2 }
 0x120   : > { %2299 = vmatprep.mubr.bf16.mxu1 %v4238_v2 }
 0x126   : > { %3967 = vmatmul.mubr.msk.bf16.gmra.mxu0 %vm2078_vm0, %v4104_v28 }
 0x127   : > { %3975 = vmatmul.mubr.msk.bf16.gmra.mxu1 %vm2078_vm0, %v4105_v59  ;;  %2229 = vmatprep.mubr.bf16.mxu0 %v4238_v2 }
 0x128   : > { %2309 = vmatprep.mubr.bf16.mxu1 %v4238_v2  ;;  %v5336_v2 = vpop.permute.xlu0 %1890 }
 0x12c   : > { %v5340_v25 = vpop.permute.xlu0 %1880 }
 0x12e   : > { %3968 = vmatmul.mubr.msk.bf16.gmra.mxu0 %vm2078_vm0, %v4106_v40 }
 0x12f   : > { %3976 = vmatmul.mubr.msk.bf16.gmra.mxu1 %vm2078_vm0, %v4107_v60 }
 0x130   : > { %v5344_v1 = vpop.permute.xlu0 %1870  ;;  %2832 = vmatprep.mubr.bf16.mxu1 %v4110_v35 }
 0x134   : > { %v5348_v22 = vpop.permute.xlu0 %1860 }
 0x138   : > { %v1851_v52 = vpop.permute.xlu0 %1850 }
 0x13c   : > { %v1841_v17 = vpop.permute.xlu0 %1840 }
 0x140   : > { %v5354_v46 = vpop.permute.xlu0 %1990 }
 0x144   : > { %v5358_v20 = vpop.permute.xlu0 %1980 }
 0x148   : > { %v5362_v42 = vpop.permute.xlu0 %1970 }
 0x14c   : > { %v5366_v24 = vpop.permute.xlu0 %1960 }
 0x150   : > { %v5370_v11 = vpop.permute.xlu0 %1950 }
 0x151   : > { %6133 = vst [vmem:[#allocation4_spill] sm:$0xff] %v5370_v11 }
 0x154   : > { %v5374_v7 = vpop.permute.xlu0 %1940 }
 0x155   : > { %6135 = vst [vmem:[#allocation6_spill] sm:$0xff] %v5374_v7 }
 0x158   : > { %v1931_v61 = vpop.permute.xlu0 %1930 }
 0x15c   : > { %v1921_v5 = vpop.permute.xlu0 %1920 }
 0x1b6   : > { %v2161_v31 = vpop.f32.mrf.mxu0 }
 0x1b7   : > { %v2241_v29 = vpop.f32.mrf.mxu1  ;;  %v2162_v62 = vadd.f32 %v2161_v31, %v1841_v17 }
 0x1b8   : > { %v2242_v58 = vadd.f32 %v2241_v29, %v1921_v5  ;;  %v2163_v18 = vpop.f32.mrf.mxu0 }
 0x1b9   : > { %v2243_v36 = vpop.f32.mrf.mxu1  ;;  %v2164_v15 = vadd.f32 %v2163_v18, %v1841_v17  ;;  %v2320_v34 = vmax.f32 %v2162_v62, 0.0 }
 0x1ba   : > { %v2244_v53 = vadd.f32 %v2243_v36, %v1921_v5  ;;  %v2165_v47 = vpop.f32.mrf.mxu0  ;;  %v2352_v49 = vmax.f32 %v2242_v58, 0.0 }
 0x1bb   : > { %v2245_v41 = vpop.f32.mrf.mxu1  ;;  %v2166_v63 = vadd.f32 %v2165_v47, %v1846_v43  ;;  %v2321_v14 = vmax.f32 %v2164_v15, 0.0 }
 0x1bc   : > { %v2246_v4 = vadd.f32 %v2245_v41, %v1926_v55  ;;  %v2353_v33 = vmax.f32 %v2244_v53, 0.0  ;;  %v2167_v37 = vpop.f32.mrf.mxu0 }
 0x1bd   : > { %v2247_v56 = vpop.f32.mrf.mxu1  ;;  %v2322_v0 = vmax.f32 %v2166_v63, 0.0  ;;  %v2168_v19 = vadd.f32 %v2167_v37, %v1846_v43 }
 0x1be   : > { %v2354_v16 = vmax.f32 %v2246_v4, 0.0  ;;  %v2248_v54 = vadd.f32 %v2247_v56, %v1926_v55  ;;  %v2171_v45 = vpop.f32.mrf.mxu0 }
 0x1bf   : > { %v2251_v3 = vpop.f32.mrf.mxu1  ;;  %v5381_v10 = vpack.c.bf16 %v2322_v0, %v2320_v34  ;;  %v2323_v44 = vmax.f32 %v2168_v19, 0.0  ;;  %v2172_v59 = vadd.f32 %v2171_v45, %v1851_v52 }
 0x1c0   : > { %v5383_v57 = vpack.c.bf16 %v2354_v16, %v2352_v49  ;;  %v2355_v28 = vmax.f32 %v2248_v54, 0.0  ;;  %v2252_v40 = vadd.f32 %v2251_v3, %v1931_v61  ;;  %v2173_v60 = vpop.f32.mrf.mxu0 }
 0x1c1   : > { %v2253_v17 = vpop.f32.mrf.mxu1  ;;  %v5385_v5 = vpack.c.bf16 %v2323_v44, %v2321_v14  ;;  %v2174_v43 = vadd.f32 %v2173_v60, %v1851_v52  ;;  %v2324_v55 = vmax.f32 %v2172_v59, 0.0 }
 0x1c2   : > { %6137 = vst [vmem:[#allocation8_spill] sm:$0xff] %v5383_v57  ;;  %v5387_v31 = vpack.c.bf16 %v2355_v28, %v2353_v33  ;;  %v2254_v29 = vadd.f32 %v2253_v17, %v1931_v61  ;;  %v2175_v58 = vpop.f32.mrf.mxu0  ;;  %v2356_v18 = vmax.f32 %v2252_v40, 0.0 }
 0x1c3   : > { %v2255_v62 = vpop.f32.mrf.mxu1  ;;  %v2176_v36 = vadd.f32 %v2175_v58, %v5352_v50  ;;  %v2325_v34 = vmax.f32 %v2174_v43, 0.0 }
 0x1c4   : > { %6138 = vst [vmem:[#allocation9_spill] sm:$0xff] %v5387_v31  ;;  %v2256_v35 = vadd.f32 %v2255_v62, %v1936_v30  ;;  %v2357_v53 = vmax.f32 %v2254_v29, 0.0  ;;  %v2177_v15 = vpop.f32.mrf.mxu0 }
 0x1c5   : > { %v2257_v47 = vpop.f32.mrf.mxu1  ;;  %v2326_v41 = vmax.f32 %v2176_v36, 0.0  ;;  %v2178_v63 = vadd.f32 %v2177_v15, %v5352_v50 }
 0x1c6   : > { %v2358_v49 = vmax.f32 %v2256_v35, 0.0  ;;  %v2258_v4 = vadd.f32 %v2257_v47, %v1936_v30  ;;  %v5391_v33 = vpop.f32.mrf.mxu0 }
 0x1c7   : > { %v2261_v61 = vpop.f32.mrf.mxu1  ;;  %v5393_v52 = vpack.c.bf16 %v2326_v41, %v2324_v55  ;;  %v2327_v56 = vmax.f32 %v2178_v63, 0.0 }
 0x1c8   : > { %v5395_v37 = vpack.c.bf16 %v2358_v49, %v2356_v18  ;;  %v2359_v0 = vmax.f32 %v2258_v4, 0.0  ;;  %v2262_v16 = vadd.f32 %v2261_v61, %v5374_v7  ;;  %v5398_v19 = vpop.f32.mrf.mxu0 }
 0x1c9   : > { %v5400_v54 = vpop.f32.mrf.mxu1  ;;  %v5402_v14 = vpack.c.bf16 %v2327_v56, %v2325_v34 }
 0x1ca   : > { %6139 = vst [vmem:[#allocation10_spill] sm:$0xff] %v5395_v37  ;;  %6140 = vst [vmem:[#allocation11_spill] sm:$0xff] %v5400_v54  ;;  %v5404_v50 = vpack.c.bf16 %v2359_v0, %v2357_v53  ;;  %v5406_v30 = vpop.f32.mrf.mxu0  ;;  %v2360_v3 = vmax.f32 %v2262_v16, 0.0 }
 0x1cb   : > { %v2265_v45 = vpop.f32.mrf.mxu1 }
 0x1cc   : > { %6141 = vst [vmem:[#allocation12_spill] sm:$0xff] %v5404_v50  ;;  %v2266_v44 = vadd.f32 %v2265_v45, %v5376_v51  ;;  %v5409_v28 = vpop.f32.mrf.mxu0 }
 0x1cd   : > { %v5411_v59 = vpop.f32.mrf.mxu1 }
 0x1ce   : > { %6142 = vst [vmem:[#allocation13_spill] sm:$0xff] %v5411_v59  ;;  %v2362_v40 = vmax.f32 %v2266_v44, 0.0  ;;  %v5413_v60 = vpop.f32.mrf.mxu0 }
 0x1cf   : > { %v5415_v17 = vpop.f32.mrf.mxu1 }
 0x1d0   : > { %6143 = vst [vmem:[#allocation14_spill] sm:$0xff] %v5415_v17  ;;  %v5417_v29 = vpack.c.bf16 %v2362_v40, %v2360_v3  ;;  %v5419_v43 = vpop.f32.mrf.mxu0 }
 0x1d1   : > { %v5421_v58 = vpop.f32.mrf.mxu1 }
 0x1d2   : > { %6144 = vst [vmem:[#allocation15_spill] sm:$0xff] %v5417_v29  ;;  %6145 = vst [vmem:[#allocation16_spill] sm:$0xff] %v5421_v58  ;;  %v5423_v62 = vpop.f32.mrf.mxu0 }
 0x1d3   : > { %v5425_v18 = vpop.f32.mrf.mxu1 }
 0x1d4   : > { %6146 = vst [vmem:[#allocation17_spill] sm:$0xff] %v5425_v18  ;;  %v5427_v36 = vpop.f32.mrf.mxu0 }
 0x1d5   : > { %v5429_v35 = vpop.f32.mrf.mxu1 }
 0x1d6   : > { %6147 = vst [vmem:[#allocation18_spill] sm:$0xff] %v5429_v35  ;;  %v5431_v55 = vpop.f32.mrf.mxu0 }
 0x1d7   : > { %v5433_v53 = vpop.f32.mrf.mxu1 }
 0x1d8   : > { %6148 = vst [vmem:[#allocation19_spill] sm:$0xff] %v5433_v53  ;;  %v2203_v15 = vpop.f32.mrf.mxu0 }
 0x1d9   : > { %v5435_v47 = vpop.f32.mrf.mxu1 }
 0x1da   : > { %6149 = vst [vmem:[#allocation20_spill] sm:$0xff] %v5435_v47  ;;  %v2205_v41 = vpop.f32.mrf.mxu0 }
 0x1db   : > { %v5437_v49 = vpop.f32.mrf.mxu1 }
 0x1dc   : > { %6150 = vst [vmem:[#allocation21_spill] sm:$0xff] %v5437_v49  ;;  %v2207_v63 = vpop.f32.mrf.mxu0 }
 0x1dd   : > { %v5439_v4 = vpop.f32.mrf.mxu1 }
 0x1de   : > { %6151 = vst [vmem:[#allocation22_spill] sm:$0xff] %v5439_v4  ;;  %v2211_v34 = vpop.f32.mrf.mxu0 }
 0x1df   : > { %v5441_v61 = vpop.f32.mrf.mxu1 }
 0x1e0   : > { %6152 = vst [vmem:[#allocation23_spill] sm:$0xff] %v5441_v61  ;;  %v2213_v56 = vpop.f32.mrf.mxu0 }
 0x1e1   : > { %v5443_v16 = vpop.f32.mrf.mxu1 }
 0x1e2   : > { %v2215_v0 = vpop.f32.mrf.mxu0 }
 0x1e3   : > { %v5445_v44 = vpop.f32.mrf.mxu1 }
 0x1e4   : > { %v2217_v45 = vpop.f32.mrf.mxu0  ;;  %6153 = vst [vmem:[#allocation24_spill] sm:$0xff] %v5445_v44 }
 0x1e5   : > { %v5447_v31 = vpop.f32.mrf.mxu1  ;;  %v2218_v4 = vadd.f32 %v2217_v45, %v5338_v23 }
 0x1e6   : > { %v2221_v3 = vpop.f32.mrf.mxu0 }
 0x1e7   : > { %v5449_v29 = vpop.f32.mrf.mxu1 }
 0x1e8   : > { %v2223_v40 = vpop.f32.mrf.mxu0 }
 0x1e9   : > { %v5454_v7 = vpop.f32.mrf.mxu1  ;;  %v2224_v49 = vadd.f32 %v2223_v40, %v5330_v39  ;;  %v2216_v40 = vadd.f32 %v2215_v0, %v5338_v23 }
 0x1ea   : > { %v2225_v57 = vpop.f32.mrf.mxu0 }
 0x1eb   : > { %v2226_v58 = vadd.f32 %v2225_v57, %v5334_v38  ;;  %v2343_v57 = vmax.f32 %v2218_v4, 0.0 }
 0x1ec   : > { %v2227_v37 = vpop.f32.mrf.mxu0 }
 0x1ed   : > { %v2228_v18 = vadd.f32 %v2227_v37, %v5334_v38  ;;  %v2208_v38 = vadd.f32 %v2207_v63, %v5342_v8 }
 0x1ee   : > { %v2231_v50 = vpop.f32.mrf.mxu0 }
 0x1ef   : > { %v2232_v35 = vadd.f32 %v2231_v50, %v5328_v32  ;;  %v2347_v6 = vmax.f32 %v2228_v18, 0.0  ;;  %v2345_v50 = vmax.f32 %v2224_v49, 0.0  ;;  %v2206_v49 = vadd.f32 %v2205_v41, %v5342_v8 }
 0x1f0   : > { %v2233_v59 = vpop.f32.mrf.mxu0  ;;  %v2196_v8 = vadd.f32 %v5423_v62, %v5346_v9 }
 0x1f1   : > { %v2234_v17 = vadd.f32 %v2233_v59, %v5328_v32  ;;  %v2222_v59 = vadd.f32 %v2221_v3, %v5330_v39  ;;  %v2348_v61 = vmax.f32 %v2232_v35, 0.0  ;;  %v2214_v32 = vadd.f32 %v2213_v56, %v5336_v2 }
 0x1f2   : > { %v2235_v51 = vpop.f32.mrf.mxu0  ;;  %v2204_v35 = vadd.f32 %v2203_v15, %v5340_v25  ;;  %v2342_v56 = vmax.f32 %v2216_v40, 0.0  ;;  %v2194_v15 = vadd.f32 %v5419_v43, %v5344_v1  ;;  %v2338_v41 = vmax.f32 %v2206_v49, 0.0 }
 0x1f3   : > { %v2236_v54 = vadd.f32 %v2235_v51, %v5332_v13  ;;  %v2349_v37 = vmax.f32 %v2234_v17, 0.0  ;;  %v5462_v51 = vpop.f32.mrf.mxu1  ;;  %v2212_v17 = vadd.f32 %v2211_v34, %v5336_v2  ;;  %v2344_v18 = vmax.f32 %v2222_v59, 0.0 }
 0x1f4   : > { %v2237_v26 = vpop.f32.mrf.mxu0  ;;  %v2337_v4 = vmax.f32 %v2204_v35, 0.0  ;;  %v2184_v43 = vadd.f32 %v5398_v19, %v5348_v22  ;;  %v2333_v3 = vmax.f32 %v2194_v15, 0.0  ;;  %v2334_v62 = vmax.f32 %v2196_v8, 0.0  ;;  %v6160_v15 = vld [vmem:[#allocation16_spill] sm:$0xff]  ;;  %v6161_v8 = vld [vmem:[#allocation19_spill] sm:$0xff] }
 0x1f5   : > { %v2238_v53 = vadd.f32 %v2237_v26, %v5332_v13  ;;  %v2350_v11 = vmax.f32 %v2236_v54, 0.0  ;;  %v2346_v13 = vmax.f32 %v2226_v58, 0.0  ;;  %v2429_v54 = vpack.c.bf16 %v2347_v6, %v2345_v50  ;;  %v2307_v39 = vpop.f32.mrf.mxu1 }
 0x1f6   : > { %v2339_v58 = vmax.f32 %v2208_v38, 0.0  ;;  %v2202_v6 = vadd.f32 %v5431_v55, %v5340_v25  ;;  %v2340_v2 = vmax.f32 %v2212_v17, 0.0  ;;  %v2192_v25 = vadd.f32 %v5413_v60, %v5344_v1 }
 0x1f7   : > { %v2351_v44 = vmax.f32 %v2238_v53, 0.0  ;;  %v2430_v26 = vpack.c.bf16 %v2350_v11, %v2348_v61  ;;  %v2341_v53 = vmax.f32 %v2214_v32, 0.0  ;;  %v2428_v23 = vpack.c.bf16 %v2346_v13, %v2344_v18 }
 0x1f8   : > { %v2198_v11 = vadd.f32 %v5427_v36, %v5346_v9  ;;  %v2426_v34 = vpack.c.bf16 %v2342_v56, %v2340_v2  ;;  %v2188_v36 = vadd.f32 %v5409_v28, %v5350_v48  ;;  %v2425_v0 = vpack.c.bf16 %v2339_v58, %v2337_v4  ;;  %v6158_v58 = vld [vmem:[#allocation22_spill] sm:$0xff] }
 0x1f9   : > { %v2431_v47 = vpack.c.bf16 %v2351_v44, %v2349_v37  ;;  %v2427_v63 = vpack.c.bf16 %v2343_v57, %v2341_v53  ;;  %v2336_v55 = vmax.f32 %v2202_v6, 0.0  ;;  %v2186_v9 = vadd.f32 %v5406_v30, %v5350_v48 }
 0x1fa   : > { %v2335_v61 = vmax.f32 %v2198_v11, 0.0  ;;  %v2331_v37 = vmax.f32 %v2188_v36, 0.0  ;;  %v2182_v59 = vadd.f32 %v5391_v33, %v5348_v22  ;;  %v2332_v32 = vmax.f32 %v2192_v25, 0.0  ;;  %v6164_v25 = vld [vmem:[#allocation18_spill] sm:$0xff] }
 0x1fb   : > { %2800 = vmatprep.subr.bf16.mxu1 %v2431_v47  ;;  %v2311_v47 = vpop.f32.mrf.mxu1  ;;  %v2424_v44 = vpack.c.bf16 %v2338_v41, %v2336_v55  ;;  %v2329_v60 = vmax.f32 %v2184_v43, 0.0  ;;  %v2330_v50 = vmax.f32 %v2186_v9, 0.0  ;;  %v2304_v33 = vadd.f32 %v5454_v7, %v5358_v20  ;;  %v6162_v41 = vld [vmem:[#allocation21_spill] sm:$0xff]  ;;  %v6165_v9 = vld [vmem:[#allocation6_spill] sm:$0xff] }
 0x1fc   : > { %2801 = vmatpush1.bf16.msra.mxu1 %v2430_v26  ;;  %v2423_v28 = vpack.c.bf16 %v2335_v61, %v2333_v3  ;;  %v2422_v40 = vpack.c.bf16 %v2334_v62, %v2332_v32  ;;  %v2328_v13 = vmax.f32 %v2182_v59, 0.0  ;;  %v2308_v57 = vadd.f32 %v2307_v39, %v5360_v12  ;;  %v6166_v62 = vld [vmem:[#allocation11_spill] sm:$0xff] }
 0x1fd   : > { %2802 = vmatprep.subr.bf16.mxu1 %v2429_v54  ;;  %v2313_v45 = vpop.f32.mrf.mxu1  ;;  %v2421_v19 = vpack.c.bf16 %v2331_v37, %v2329_v60  ;;  %v2312_v17 = vadd.f32 %v2311_v47, %v5354_v46  ;;  %v2294_v35 = vadd.f32 %v5443_v16, %v5362_v42  ;;  %v2298_v39 = vadd.f32 %v5447_v31, %v5364_v27  ;;  %v6155_v16 = vld [vmem:[#allocation23_spill] sm:$0xff]  ;;  %v6167_v37 = vld [vmem:[#allocation14_spill] sm:$0xff] }
 0x1fe   : > { %v2420_v48 = vpack.c.bf16 %v2330_v50, %v2328_v13  ;;  %v2314_v38 = vadd.f32 %v2313_v45, %v5354_v46  ;;  %v2377_v53 = vmax.f32 %v2304_v33, 0.0  ;;  %v2379_v46 = vmax.f32 %v2308_v57, 0.0  ;;  %v6157_v31 = vld [vmem:[#allocation3_spill] sm:$0xff] }
 0x1ff   : > { %v2315_v1 = vpop.f32.mrf.mxu1  ;;  %v2373_v6 = vmax.f32 %v2294_v35, 0.0  ;;  %v2375_v2 = vmax.f32 %v2298_v39, 0.0  ;;  %v6169_v50 = vld [vmem:[#allocation7_spill] sm:$0xff] }
 0x200   : > { %2803 = vmatpush1.bf16.msra.mxu1 %v2428_v23  ;;  %v2316_v22 = vadd.f32 %v2315_v1, %v5356_v21  ;;  %v2381_v18 = vmax.f32 %v2314_v38, 0.0  ;;  %v2292_v23 = vadd.f32 %v6155_v16, %v5362_v42  ;;  %v2445_v47 = vpack.c.bf16 %v2379_v46, %v2377_v53  ;;  %v6171_v35 = vld [vmem:[#allocation15_spill] sm:$0xff]  ;;  %v6175_v53 = vld [vmem:[#allocation8_spill] sm:$0xff]  ;;  %v4111_v46 = vld [vmem:[%s6099_s3 + $0x14] ss:$8 sps:$4 sm:$0xff]  }
 0x201   : > { %2804 = vmatprep.subr.bf16.mxu1 %v2427_v63  ;;  %v2317_v26 = vpop.f32.mrf.mxu1  ;;  %v2288_v63 = vadd.f32 %v6158_v58, %v6157_v31  ;;  %v2282_v42 = vadd.f32 %v6161_v8, %v5366_v24  ;;  %v2443_v3 = vpack.c.bf16 %v2375_v2, %v2373_v6  ;;  %v4108_v39 = vld [vmem:[%s6099_s3] ss:$8 sps:$4 sm:$0xff]   ;;  %v4119_v16 = vld [vmem:[%s6099_s3 + $0x30] ss:$8 sps:$4 sm:$0xff]   ;;  %v4135_v2 = vld [vmem:[%s6099_s3 + $0x94] ss:$8 sps:$4 sm:$0xff]  }
 0x202   : > { %v2318_v30 = vadd.f32 %v2317_v26, %v5356_v21  ;;  %v2306_v21 = vadd.f32 %v5462_v51, %v5360_v12  ;;  %v2382_v7 = vmax.f32 %v2316_v22, 0.0  ;;  %v4131_v58 = vld [vmem:[%s6099_s3 + $0x70] ss:$8 sps:$4 sm:$0xff]   ;;  %v4134_v6 = vld [vmem:[%s6099_s3 + $0x80] ss:$8 sps:$4 sm:$0xff]  }
 0x203   : > { %v2371_v43 = vmax.f32 %v2288_v63, 0.0  ;;  %v2368_v32 = vmax.f32 %v2282_v42, 0.0  ;;  %v4132_v63 = vld [vmem:[%s6099_s3 + $0x84] ss:$8 sps:$4 sm:$0xff]   ;;  %v4143_v8 = vld [vmem:[%s6099_s3 + $0xb0] ss:$8 sps:$4 sm:$0xff]  }
 0x204   : > { %2805 = vmatpush1.bf16.msra.mxu1 %v2426_v34  ;;  %v2383_v54 = vmax.f32 %v2318_v30, 0.0  ;;  %v2378_v51 = vmax.f32 %v2306_v21, 0.0  ;;  %v2372_v34 = vmax.f32 %v2292_v23, 0.0  ;;  %v6173_v21 = vld [vmem:[#allocation10_spill] sm:$0xff]  ;;  %v4120_v23 = vld [vmem:[%s6099_s3 + $0x44] ss:$8 sps:$4 sm:$0xff]  }
 0x205   : > { %2806 = vmatprep.subr.bf16.mxu1 %v2425_v0  ;;  %v6163_v0 = vld [vmem:[#allocation5_spill] sm:$0xff]  ;;  %v4144_v42 = vld [vmem:[%s6099_s3 + $0xc4] ss:$8 sps:$4 sm:$0xff]  }
 0x206   : > { %v2447_v49 = vpack.c.bf16 %v2383_v54, %v2381_v18  ;;  %v2278_v55 = vadd.f32 %v6164_v25, %v6163_v0  ;;  %v4155_v25 = vld [vmem:[%s6099_s3 + $0xf0] ss:$8 sps:$4 sm:$0xff]  }
 0x208   : > { %2807 = vmatpush1.bf16.msra.mxu1 %v2424_v44  ;;  %v2264_v44 = vadd.f32 %v6166_v62, %v6165_v9  ;;  %v2367_v26 = vmax.f32 %v2278_v55, 0.0  ;;  %v5629_v55 = vpop.permute.xlu0 %2552 }
 0x209   : > { %2808 = vmatprep.subr.bf16.mxu1 %v2423_v28  ;;  %v6168_v28 = vld [vmem:[#allocation17_spill] sm:$0xff] }
 0x20a   : > { %v2276_v59 = vadd.f32 %v6168_v28, %v6163_v0  ;;  %v2361_v33 = vmax.f32 %v2264_v44, 0.0  ;;  %v4153_v0 = vld [vmem:[%s6099_s3 + $0xf4] ss:$8 sps:$4 sm:$0xff]  }
 0x20c   : > { %2809 = vmatpush1.bf16.msra.mxu1 %v2422_v40  ;;  %v6170_v40 = vld [vmem:[#allocation13_spill] sm:$0xff]  ;;  %v2366_v38 = vmax.f32 %v2276_v59, 0.0 }
 0x20d   : > { %2810 = vmatprep.subr.bf16.mxu1 %v2421_v19  ;;  %v2268_v19 = vadd.f32 %v6170_v40, %v6169_v50 }
 0x20f   : > { %v2363_v57 = vmax.f32 %v2268_v19, 0.0 }
 0x210   : > { %2811 = vmatpush1.bf16.msra.mxu1 %v2420_v48 }
 0x211   : > { %2812 = vmatprep.subr.bf16.mxu1 %v5402_v14  ;;  %v2302_v14 = vadd.f32 %v5449_v29, %v5358_v20  ;;  %v6156_v20 = vld [vmem:[#allocation24_spill] sm:$0xff]  ;;  %v2437_v18 = vpack.c.bf16 %v2363_v57, %v2361_v33 }
 0x212   : > { %v2296_v12 = vadd.f32 %v6156_v20, %v5364_v27  ;;  %v2286_v27 = vadd.f32 %v6162_v41, %v6157_v31  ;;  %v4122_v20 = vld [vmem:[%s6099_s3 + $0x40] ss:$8 sps:$4 sm:$0xff]   ;;  %v4129_v31 = vld [vmem:[%s6099_s3 + $0x74] ss:$8 sps:$4 sm:$0xff]  }
 0x213   : > { %v2376_v29 = vmax.f32 %v2302_v14, 0.0  ;;  %v6172_v14 = vld [vmem:[#allocation12_spill] sm:$0xff] }
 0x214   : > { %2813 = vmatpush1.bf16.msra.mxu1 %v5393_v52  ;;  %v2380_v52 = vmax.f32 %v2312_v17, 0.0  ;;  %v2374_v36 = vmax.f32 %v2296_v12, 0.0  ;;  %v2370_v1 = vmax.f32 %v2286_v27, 0.0  ;;  %v4123_v12 = vld [vmem:[%s6099_s3 + $0x54] ss:$8 sps:$4 sm:$0xff]  }
 0x215   : > { %2814 = vmatprep.subr.bf16.mxu1 %v5385_v5  ;;  %v6154_v5 = vld [vmem:[#allocation20_spill] sm:$0xff]  ;;  %v2444_v61 = vpack.c.bf16 %v2378_v51, %v2376_v29  ;;  %v4125_v29 = vld [vmem:[%s6099_s3 + $0x50] ss:$8 sps:$4 sm:$0xff]   ;;  %v4147_v27 = vld [vmem:[%s6099_s3 + $0xd4] ss:$8 sps:$4 sm:$0xff]  }
 0x216   : > { %v2284_v56 = vadd.f32 %v6154_v5, %v5366_v24  ;;  %v2446_v11 = vpack.c.bf16 %v2382_v7, %v2380_v52  ;;  %v2442_v60 = vpack.c.bf16 %v2374_v36, %v2372_v34  ;;  %v2440_v22 = vpack.c.bf16 %v2370_v1, %v2368_v32  ;;  %v6174_v7 = vld [vmem:[#allocation9_spill] sm:$0xff]  ;;  %v4114_v52 = vld [vmem:[%s6099_s3 + $0x24] ss:$8 sps:$4 sm:$0xff]   ;;  %v4116_v5 = vld [vmem:[%s6099_s3 + $0x20] ss:$8 sps:$4 sm:$0xff]  }
 0x217   : > { %v4126_v51 = vld [vmem:[%s6099_s3 + $0x64] ss:$8 sps:$4 sm:$0xff]   ;;  %v4146_v41 = vld [vmem:[%s6099_s3 + $0xc0] ss:$8 sps:$4 sm:$0xff]   ;;  %v4149_v34 = vld [vmem:[%s6099_s3 + $0xd0] ss:$8 sps:$4 sm:$0xff]  }
 0x218   : > { %2815 = vmatpush1.bf16.msra.mxu1 %v5381_v10  ;;  %v6159_v10 = vld [vmem:[#allocation4_spill] sm:$0xff]  ;;  %v2369_v45 = vmax.f32 %v2284_v56, 0.0  ;;  %v4117_v56 = vld [vmem:[%s6099_s3 + $0x34] ss:$8 sps:$4 sm:$0xff]  }
 0x219   : > { %2816 = vmatprep.subr.bf16.mxu1 %v2447_v49  ;;  %v2274_v4 = vadd.f32 %v6160_v15, %v6159_v10  ;;  %v2272_v24 = vadd.f32 %v6167_v37, %v6159_v10  ;;  %v4113_v49 = vld [vmem:[%s6099_s3 + $0x10] ss:$8 sps:$4 sm:$0xff]   ;;  %v4138_v10 = vld [vmem:[%s6099_s3 + $0xa4] ss:$8 sps:$4 sm:$0xff]   ;;  %v4140_v15 = vld [vmem:[%s6099_s3 + $0xa0] ss:$8 sps:$4 sm:$0xff]  }
 0x21a   : > { %v2441_v48 = vpack.c.bf16 %v2371_v43, %v2369_v45  ;;  %v4150_v36 = vld [vmem:[%s6099_s3 + $0xe4] ss:$8 sps:$4 sm:$0xff]   ;;  %v5631_v45 = vpop.permute.xlu1 %2557  ;;  %v5633_v43 = vpop.permute.xlu0 %2542 }
 0x21b   : > { %v2365_v13 = vmax.f32 %v2274_v4, 0.0  ;;  %v2364_v30 = vmax.f32 %v2272_v24, 0.0  ;;  %v4141_v4 = vld [vmem:[%s6099_s3 + $0xb4] ss:$8 sps:$4 sm:$0xff]  }
 0x21c   : > { %2817 = vmatpush2.bf16.msra.mxu1 %v2446_v11  ;;  %v4128_v11 = vld [vmem:[%s6099_s3 + $0x60] ss:$8 sps:$4 sm:$0xff]  }
 0x21d   : > { %2818 = vmatprep.subr.bf16.mxu1 %v2445_v47  ;;  %v2439_v54 = vpack.c.bf16 %v2367_v26, %v2365_v13  ;;  %v2438_v17 = vpack.c.bf16 %v2366_v38, %v2364_v30  ;;  %v4137_v47 = vld [vmem:[%s6099_s3 + $0x90] ss:$8 sps:$4 sm:$0xff]  }
 0x21e   : > { %v5637_v9 = vpop.permute.xlu0 %2532 }
 0x220   : > { %2819 = vmatpush2.bf16.msra.mxu1 %v2444_v61  ;;  %v4152_v61 = vld [vmem:[%s6099_s3 + $0xe0] ss:$8 sps:$4 sm:$0xff]  }
 0x221   : > { %2820 = vmatprep.subr.bf16.mxu1 %v2443_v3  ;;  %v5635_v3 = vpop.permute.xlu1 %2547 }
 0x222   : > { %v5641_v44 = vpop.permute.xlu0 %2522 }
 0x224   : > { %2821 = vmatpush2.bf16.msra.mxu1 %v2442_v60 }
 0x225   : > { %2822 = vmatprep.subr.bf16.mxu1 %v2441_v48  ;;  %v5639_v62 = vpop.permute.xlu1 %2537 }
 0x226   : > { %v5645_v24 = vpop.permute.xlu0 %2512 }
 0x228   : > { %2823 = vmatpush2.bf16.msra.mxu1 %v2440_v22 }
 0x229   : > { %2824 = vmatprep.subr.bf16.mxu1 %v2439_v54  ;;  %v5643_v37 = vpop.permute.xlu1 %2527 }
 0x22a   : > { %v5649_v59 = vpop.permute.xlu0 %2502 }
 0x22c   : > { %2825 = vmatpush2.bf16.msra.mxu1 %v2438_v17 }
 0x22d   : > { %2826 = vmatprep.subr.bf16.mxu1 %v2437_v18  ;;  %v5647_v28 = vpop.permute.xlu1 %2517 }
 0x22e   : > { %v2493_v1 = vpop.permute.xlu0 %2492 }
 0x230   : > { %2827 = vmatpush2.bf16.msra.mxu1 %v6171_v35 }
 0x231   : > { %2828 = vmatprep.subr.bf16.mxu1 %v6172_v14  ;;  %v5651_v32 = vpop.permute.xlu1 %2507 }
 0x232   : > { %v2483_v40 = vpop.permute.xlu0 %2482 }
 0x234   : > { %2829 = vmatpush2.bf16.msra.mxu1 %v6173_v21 }
 0x235   : > { %2830 = vmatprep.subr.bf16.mxu1 %v6174_v7  ;;  %v2498_v60 = vpop.permute.xlu1 %2497 }
 0x238   : > { %2831 = vmatpush2.bf16.msra.mxu1 %v6175_v53 }
 0x239   : > { %v2488_v26 = vpop.permute.xlu1 %2487 }
 0x23b   : > { %2833 = vmatmul.mubr.bf16.vlgmr.msra.gmra.mxu1 %v4108_v39 }
 0x23c   : > { %2842 = vmatprep.mubr.bf16.mxu1 %v4111_v46 }
 0x243   : > { %2843 = vmatmul.mubr.bf16.gmra.mxu1 %v4113_v49 }
 0x244   : > { %2852 = vmatprep.mubr.bf16.mxu1 %v4114_v52 }
 0x24b   : > { %2853 = vmatmul.mubr.bf16.gmra.mxu1 %v4116_v5 }
 0x24c   : > { %2862 = vmatprep.mubr.bf16.mxu1 %v4117_v56 }
 0x253   : > { %2863 = vmatmul.mubr.bf16.gmra.mxu1 %v4119_v16 }
 0x254   : > { %2872 = vmatprep.mubr.bf16.mxu1 %v4120_v23 }
 0x25b   : > { %2873 = vmatmul.mubr.bf16.gmra.mxu1 %v4122_v20 }
 0x25c   : > { %2882 = vmatprep.mubr.bf16.mxu1 %v4123_v12 }
 0x263   : > { %2883 = vmatmul.mubr.bf16.gmra.mxu1 %v4125_v29 }
 0x264   : > { %2892 = vmatprep.mubr.bf16.mxu1 %v4126_v51 }
 0x26b   : > { %2893 = vmatmul.mubr.bf16.gmra.mxu1 %v4128_v11 }
 0x26c   : > { %2902 = vmatprep.mubr.bf16.mxu1 %v4129_v31 }
 0x273   : > { %2903 = vmatmul.mubr.bf16.gmra.mxu1 %v4131_v58 }
 0x274   : > { %2912 = vmatprep.mubr.bf16.mxu1 %v4132_v63  ;;  %v5669_v63 = vpop.permute.xlu0 %2632 }
 0x27b   : > { %2913 = vmatmul.mubr.bf16.gmra.mxu1 %v4134_v6 }
 0x27c   : > { %2922 = vmatprep.mubr.bf16.mxu1 %v4135_v2  ;;  %v5673_v2 = vpop.permute.xlu1 %2637 }
 0x283   : > { %2923 = vmatmul.mubr.bf16.gmra.mxu1 %v4137_v47 }
 0x284   : > { %2932 = vmatprep.mubr.bf16.mxu1 %v4138_v10 }
 0x28b   : > { %2933 = vmatmul.mubr.bf16.gmra.mxu1 %v4140_v15  ;;  %v5679_v15 = vpop.permute.xlu0 %2622 }
 0x28c   : > { %2942 = vmatprep.mubr.bf16.mxu1 %v4141_v4 }
 0x293   : > { %2943 = vmatmul.mubr.bf16.gmra.mxu1 %v4143_v8  ;;  %v5681_v8 = vpop.permute.xlu1 %2627 }
 0x294   : > { %2952 = vmatprep.mubr.bf16.mxu1 %v4144_v42 }
 0x29b   : > { %2953 = vmatmul.mubr.bf16.gmra.mxu1 %v4146_v41 }
 0x29c   : > { %2962 = vmatprep.mubr.bf16.mxu1 %v4147_v27  ;;  %v4158_v27 = vld [vmem:[%s6101_s5 + $0x4] ss:$8 sps:$4 sm:$0xff]  }
 0x29d   : > { %3505 = vmatprep.mubr.bf16.mxu0 %v4158_v27 }
 0x2a3   : > { %2963 = vmatmul.mubr.bf16.gmra.mxu1 %v4149_v34  ;;  %v5688_v34 = vpop.permute.xlu0 %2612 }
 0x2a4   : > { %2972 = vmatprep.mubr.bf16.mxu1 %v4150_v36 }
 0x2ab   : > { %2973 = vmatmul.mubr.bf16.gmra.mxu1 %v4152_v61  ;;  %v5692_v61 = vpop.permute.xlu1 %2617 }
 0x2ac   : > { %2982 = vmatprep.mubr.bf16.mxu1 %v4153_v0 }
 0x2b3   : > { %2983 = vmatmul.mubr.bf16.gmra.mxu1 %v4155_v25 }
 0x2fb   : > { %v2834_v50 = vpop.f32.mrf.mxu1 }
 0x2fc   : > { %v2835_v13 = vadd.f32 %v2834_v50, %v2483_v40  ;;  %v5696_v50 = vpop.permute.xlu1 %2607 }
 0x2fd   : > { %v2836_v19 = vpop.f32.mrf.mxu1  ;;  %6177 = vst [vmem:[#allocation23_spill] sm:$0xff] %v5696_v50 }
 0x2fe   : > { %v2837_v30 = vadd.f32 %v2836_v19, %v2483_v40  ;;  %v2993_v33 = vmax.f32 %v2835_v13, 0.0 }
 0x2ff   : > { %v2838_v48 = vpop.f32.mrf.mxu1 }
 0x300   : > { %v2839_v38 = vadd.f32 %v2838_v48, %v2488_v26  ;;  %v2994_v18 = vmax.f32 %v2837_v30, 0.0  ;;  %v5700_v48 = vpop.permute.xlu1 %2597 }
 0x301   : > { %v2840_v22 = vpop.f32.mrf.mxu1  ;;  %6179 = vst [vmem:[#allocation3_spill] sm:$0xff] %v5700_v48 }
 0x302   : > { %v2995_v57 = vmax.f32 %v2839_v38, 0.0  ;;  %v2841_v54 = vadd.f32 %v2840_v22, %v2488_v26 }
 0x303   : > { %v2844_v17 = vpop.f32.mrf.mxu1 }
 0x304   : > { %v5653_v35 = vpack.c.bf16 %v2995_v57, %v2993_v33  ;;  %v2996_v14 = vmax.f32 %v2841_v54, 0.0  ;;  %v2845_v39 = vadd.f32 %v2844_v17, %v2493_v1  ;;  %v5704_v57 = vpop.permute.xlu1 %2587 }
 0x305   : > { %v2846_v21 = vpop.f32.mrf.mxu1  ;;  %6181 = vst [vmem:[#allocation4_spill] sm:$0xff] %v5704_v57 }
 0x306   : > { %v5655_v7 = vpack.c.bf16 %v2996_v14, %v2994_v18  ;;  %v2847_v46 = vadd.f32 %v2846_v21, %v2493_v1  ;;  %v2997_v5 = vmax.f32 %v2845_v39, 0.0  ;;  %v5694_v1 = vpop.permute.xlu0 %2602 }
 0x307   : > { %v2848_v53 = vpop.f32.mrf.mxu1  ;;  %6176 = vst [vmem:[#allocation20_spill] sm:$0xff] %v5694_v1 }
 0x308   : > { %v2849_v49 = vadd.f32 %v2848_v53, %v2498_v60  ;;  %v2998_v20 = vmax.f32 %v2847_v46, 0.0  ;;  %v5711_v46 = vpop.permute.xlu1 %2577 }
 0x309   : > { %v2850_v52 = vpop.f32.mrf.mxu1 }
 0x30a   : > { %v2999_v56 = vmax.f32 %v2849_v49, 0.0  ;;  %v2851_v16 = vadd.f32 %v2850_v52, %v2498_v60  ;;  %v5698_v13 = vpop.permute.xlu0 %2592 }
 0x30b   : > { %v5657_v23 = vpop.f32.mrf.mxu1  ;;  %6178 = vst [vmem:[#allocation24_spill] sm:$0xff] %v5698_v13 }
 0x30c   : > { %v5659_v12 = vpack.c.bf16 %v2999_v56, %v2997_v5  ;;  %v3000_v29 = vmax.f32 %v2851_v16, 0.0 }
 0x30d   : > { %v5661_v51 = vpop.f32.mrf.mxu1 }
 0x30e   : > { %v5663_v11 = vpack.c.bf16 %v3000_v29, %v2998_v20  ;;  %v5702_v22 = vpop.permute.xlu0 %2582 }
 0x30f   : > { %v5665_v31 = vpop.f32.mrf.mxu1  ;;  %6180 = vst [vmem:[#allocation22_spill] sm:$0xff] %v5702_v22 }
 0x311   : > { %v5667_v58 = vpop.f32.mrf.mxu1 }
 0x312   : > { %v5706_v18 = vpop.permute.xlu0 %2572 }
 0x313   : > { %v5671_v6 = vpop.f32.mrf.mxu1 }
 0x315   : > { %v5675_v47 = vpop.f32.mrf.mxu1 }
 0x316   : > { %v2563_v57 = vpop.permute.xlu0 %2562 }
 0x317   : > { %v5677_v10 = vpop.f32.mrf.mxu1 }
 0x319   : > { %v2870_v4 = vpop.f32.mrf.mxu1 }
 0x31b   : > { %v5683_v42 = vpop.f32.mrf.mxu1 }
 0x31d   : > { %v2876_v41 = vpop.f32.mrf.mxu1 }
 0x31f   : > { %v5690_v36 = vpop.f32.mrf.mxu1 }
 0x321   : > { %v2880_v0 = vpop.f32.mrf.mxu1 }
 0x323   : > { %v2884_v25 = vpop.f32.mrf.mxu1 }
 0x325   : > { %v2886_v60 = vpop.f32.mrf.mxu1 }
 0x327   : > { %v2888_v40 = vpop.f32.mrf.mxu1 }
 0x329   : > { %v2890_v19 = vpop.f32.mrf.mxu1 }
 0x32a   : > { %v2891_v27 = vadd.f32 %v2890_v19, %v5639_v62 }
 0x32b   : > { %v2894_v26 = vpop.f32.mrf.mxu1 }
 0x32d   : > { %v2896_v30 = vpop.f32.mrf.mxu1 }
 0x32e   : > { %v2897_v5 = vadd.f32 %v2896_v30, %v5633_v43 }
 0x32f   : > { %v2898_v38 = vpop.f32.mrf.mxu1 }
 0x330   : > { %v2899_v16 = vadd.f32 %v2898_v38, %v5635_v3  ;;  %v2889_v38 = vadd.f32 %v2888_v40, %v5639_v62 }
 0x331   : > { %v2900_v33 = vpop.f32.mrf.mxu1 }
 0x332   : > { %v2901_v21 = vadd.f32 %v2900_v33, %v5635_v3  ;;  %v2881_v3 = vadd.f32 %v2880_v0, %v5643_v37 }
 0x333   : > { %v2904_v54 = vpop.f32.mrf.mxu1 }
 0x334   : > { %v2905_v49 = vadd.f32 %v2904_v54, %v5629_v55  ;;  %v3020_v33 = vmax.f32 %v2901_v21, 0.0  ;;  %v3018_v54 = vmax.f32 %v2897_v5, 0.0 }
 0x335   : > { %v2906_v17 = vpop.f32.mrf.mxu1 }
 0x336   : > { %v2907_v39 = vadd.f32 %v2906_v17, %v5629_v55  ;;  %v3021_v13 = vmax.f32 %v2905_v49, 0.0  ;;  %v2887_v55 = vadd.f32 %v2886_v60, %v5637_v9  ;;  %v2877_v60 = vadd.f32 %v2876_v41, %v5641_v44 }
 0x337   : > { %v2908_v14 = vpop.f32.mrf.mxu1 }
 0x338   : > { %v2909_v53 = vadd.f32 %v2908_v14, %v5631_v45  ;;  %v3022_v22 = vmax.f32 %v2907_v39, 0.0  ;;  %v2895_v14 = vadd.f32 %v2894_v26, %v5633_v43  ;;  %v3016_v39 = vmax.f32 %v2891_v27, 0.0 }
 0x339   : > { %v2910_v52 = vpop.f32.mrf.mxu1  ;;  %v2871_v43 = vadd.f32 %v2870_v4, %v5647_v28  ;;  %v2885_v26 = vadd.f32 %v2884_v25, %v5637_v9  ;;  %v3014_v0 = vmax.f32 %v2887_v55, 0.0  ;;  %v2875_v25 = vadd.f32 %v5683_v42, %v5641_v44 }
 0x33a   : > { %v2911_v56 = vadd.f32 %v2910_v52, %v5631_v45  ;;  %v3023_v20 = vmax.f32 %v2909_v53, 0.0  ;;  %v2568_v45 = vpop.permute.xlu1 %2567  ;;  %v3019_v53 = vmax.f32 %v2899_v16, 0.0  ;;  %v3102_v52 = vpack.c.bf16 %v3020_v33, %v3018_v54 }
 0x33b   : > { %v2914_v29 = vpop.f32.mrf.mxu1  ;;  %v3100_v4 = vpack.c.bf16 %v3016_v39, %v3014_v0  ;;  %v3013_v27 = vmax.f32 %v2885_v26, 0.0  ;;  %v3010_v33 = vmax.f32 %v2877_v60, 0.0  ;;  %v3008_v54 = vmax.f32 %v2871_v43, 0.0 }
 0x33c   : > { %v3024_v17 = vmax.f32 %v2911_v56, 0.0  ;;  %v2915_v1 = vadd.f32 %v2914_v29, %v2563_v57  ;;  %v3103_v19 = vpack.c.bf16 %v3023_v20, %v3021_v13  ;;  %v2879_v13 = vadd.f32 %v5690_v36, %v5643_v37 }
 0x33d   : > { %v2916_v48 = vpop.f32.mrf.mxu1  ;;  %v2855_v26 = vadd.f32 %v5657_v23, %v5649_v59 }
 0x33e   : > { %v3104_v30 = vpack.c.bf16 %v3024_v17, %v3022_v22  ;;  %v2917_v56 = vadd.f32 %v2916_v48, %v2563_v57  ;;  %v3017_v22 = vmax.f32 %v2895_v14, 0.0  ;;  %v3025_v5 = vmax.f32 %v2915_v1, 0.0 }
 0x33f   : > { %v2918_v21 = vpop.f32.mrf.mxu1  ;;  %v3012_v48 = vmax.f32 %v2881_v3, 0.0  ;;  %v3015_v57 = vmax.f32 %v2889_v38, 0.0  ;;  %v2861_v17 = vadd.f32 %v5667_v58, %v5651_v32  ;;  %v2869_v14 = vadd.f32 %v5677_v10, %v5647_v28 }
 0x340   : > { %v2919_v50 = vadd.f32 %v2918_v21, %v2568_v45  ;;  %3473 = vmatprep.subr.bf16.mxu0 %v3104_v30  ;;  %v3101_v16 = vpack.c.bf16 %v3019_v53, %v3017_v22  ;;  %v3026_v29 = vmax.f32 %v2917_v56, 0.0  ;;  %v3011_v55 = vmax.f32 %v2879_v13, 0.0 }
 0x341   : > { %v2920_v49 = vpop.f32.mrf.mxu1  ;;  %3474 = vmatpush1.bf16.msra.mxu0 %v3103_v19  ;;  %v3099_v44 = vpack.c.bf16 %v3015_v57, %v3013_v27  ;;  %v3098_v30 = vpack.c.bf16 %v3012_v48, %v3010_v33  ;;  %v2857_v3 = vadd.f32 %v5661_v51, %v5649_v59  ;;  %v2865_v38 = vadd.f32 %v5671_v6, %v5645_v24 }
 0x342   : > { %v3027_v62 = vmax.f32 %v2919_v50, 0.0  ;;  %v2921_v40 = vadd.f32 %v2920_v49, %v2568_v45  ;;  %3475 = vmatprep.subr.bf16.mxu0 %v3102_v52  ;;  %v2867_v50 = vadd.f32 %v5675_v47, %v5645_v24  ;;  %v3009_v53 = vmax.f32 %v2875_v25, 0.0 }
 0x343   : > { %v2924_v20 = vpop.f32.mrf.mxu1  ;;  %v3004_v39 = vmax.f32 %v2861_v17, 0.0  ;;  %v3007_v52 = vmax.f32 %v2869_v14, 0.0  ;;  %v3005_v22 = vmax.f32 %v2865_v38, 0.0 }
 0x344   : > { %v5727_v41 = vpack.c.bf16 %v3027_v62, %v3025_v5  ;;  %v3028_v9 = vmax.f32 %v2921_v40, 0.0  ;;  %v2925_v36 = vadd.f32 %v2924_v20, %v5706_v18  ;;  %v3006_v19 = vmax.f32 %v2867_v50, 0.0 }
 0x345   : > { %v2926_v1 = vpop.f32.mrf.mxu1  ;;  %3476 = vmatpush1.bf16.msra.mxu0 %v3101_v16  ;;  %v3097_v56 = vpack.c.bf16 %v3011_v55, %v3009_v53  ;;  %v3001_v40 = vmax.f32 %v2855_v26, 0.0 }
 0x346   : > { %v5733_v37 = vpack.c.bf16 %v3028_v9, %v3026_v29  ;;  %3477 = vmatprep.subr.bf16.mxu0 %v3100_v4  ;;  %v2927_v45 = vadd.f32 %v2926_v1, %v5706_v18  ;;  %v3029_v28 = vmax.f32 %v2925_v36, 0.0  ;;  %v2859_v18 = vadd.f32 %v5665_v31, %v5651_v32 }
 0x347   : > { %v2928_v42 = vpop.f32.mrf.mxu1  ;;  %v3096_v51 = vpack.c.bf16 %v3008_v54, %v3006_v19  ;;  %v3095_v31 = vpack.c.bf16 %v3007_v52, %v3005_v22  ;;  %v6183_v22 = vld [vmem:[#allocation20_spill] sm:$0xff] }
 0x348   : > { %v2929_v47 = vadd.f32 %v2928_v42, %v5711_v46  ;;  %v3030_v60 = vmax.f32 %v2927_v45, 0.0  ;;  %v3003_v32 = vmax.f32 %v2859_v18, 0.0 }
 0x349   : > { %v2930_v58 = vpop.f32.mrf.mxu1  ;;  %3478 = vmatpush1.bf16.msra.mxu0 %v3099_v44 }
 0x34a   : > { %v3031_v10 = vmax.f32 %v2929_v47, 0.0  ;;  %v2931_v21 = vadd.f32 %v2930_v58, %v5711_v46  ;;  %3479 = vmatprep.subr.bf16.mxu0 %v3098_v30  ;;  %v3002_v46 = vmax.f32 %v2857_v3, 0.0  ;;  %v3093_v48 = vpack.c.bf16 %v3003_v32, %v3001_v40 }
 0x34b   : > { %v5749_v43 = vpop.f32.mrf.mxu1 }
 0x34c   : > { %v5751_v24 = vpack.c.bf16 %v3031_v10, %v3029_v28  ;;  %v3032_v6 = vmax.f32 %v2931_v21, 0.0  ;;  %v3094_v62 = vpack.c.bf16 %v3004_v39, %v3002_v46 }
 0x34d   : > { %v5755_v49 = vpop.f32.mrf.mxu1  ;;  %3480 = vmatpush1.bf16.msra.mxu0 %v3097_v56 }
 0x34e   : > { %v5757_v0 = vpack.c.bf16 %v3032_v6, %v3030_v60  ;;  %3481 = vmatprep.subr.bf16.mxu0 %v3096_v51 }
 0x34f   : > { %v5759_v5 = vpop.f32.mrf.mxu1 }
 0x351   : > { %v5761_v13 = vpop.f32.mrf.mxu1  ;;  %3482 = vmatpush1.bf16.msra.mxu0 %v3095_v31 }
 0x352   : > { %3483 = vmatprep.subr.bf16.mxu0 %v3094_v62 }
 0x353   : > { %v5763_v59 = vpop.f32.mrf.mxu1 }
 0x355   : > { %v5765_v23 = vpop.f32.mrf.mxu1  ;;  %3484 = vmatpush1.bf16.msra.mxu0 %v3093_v48 }
 0x356   : > { %3485 = vmatprep.subr.bf16.mxu0 %v5663_v11 }
 0x357   : > { %v5768_v57 = vpop.f32.mrf.mxu1 }
 0x359   : > { %v2950_v16 = vpop.f32.mrf.mxu1  ;;  %3486 = vmatpush1.bf16.msra.mxu0 %v5659_v12 }
 0x35a   : > { %3487 = vmatprep.subr.bf16.mxu0 %v5655_v7 }
 0x35b   : > { %v2954_v20 = vpop.f32.mrf.mxu1 }
 0x35d   : > { %v2956_v4 = vpop.f32.mrf.mxu1  ;;  %3488 = vmatpush1.bf16.msra.mxu0 %v5653_v35 }
 0x35f   : > { %v2958_v29 = vpop.f32.mrf.mxu1 }
 0x361   : > { %v2960_v9 = vpop.f32.mrf.mxu1 }
 0x363   : > { %v2964_v25 = vpop.f32.mrf.mxu1 }
 0x364   : > { %v2965_v6 = vadd.f32 %v2964_v25, %v5688_v34 }
 0x365   : > { %v2966_v27 = vpop.f32.mrf.mxu1 }
 0x366   : > { %v2967_v21 = vadd.f32 %v2966_v27, %v5688_v34 }
 0x367   : > { %v2968_v1 = vpop.f32.mrf.mxu1 }
 0x368   : > { %v2969_v39 = vadd.f32 %v2968_v1, %v5692_v61  ;;  %v3046_v46 = vmax.f32 %v2967_v21, 0.0  ;;  %v3045_v1 = vmax.f32 %v2965_v6, 0.0  ;;  %v4176_v21 = vld [vmem:[%s6101_s5 + $0x60] ss:$8 sps:$4 sm:$0xff]   ;;  %v4191_v6 = vld [vmem:[%s6101_s5 + $0xb0] ss:$8 sps:$4 sm:$0xff]  }
 0x369   : > { %v2970_v50 = vpop.f32.mrf.mxu1 }
 0x36a   : > { %v2971_v38 = vadd.f32 %v2970_v50, %v5692_v61  ;;  %v3047_v31 = vmax.f32 %v2969_v39, 0.0  ;;  %v6184_v61 = vld [vmem:[#allocation3_spill] sm:$0xff]  ;;  %v6185_v50 = vld [vmem:[#allocation24_spill] sm:$0xff] }
 0x36b   : > { %v2974_v33 = vpop.f32.mrf.mxu1  ;;  %v2951_v40 = vadd.f32 %v2950_v16, %v6184_v61  ;;  %v2947_v34 = vadd.f32 %v5765_v23, %v6185_v50  ;;  %v4180_v39 = vld [vmem:[%s6101_s5 + $0x84] ss:$8 sps:$4 sm:$0xff]  }
 0x36c   : > { %v2975_v28 = vadd.f32 %v2974_v33, %v5679_v15 }
 0x36d   : > { %v2976_v36 = vpop.f32.mrf.mxu1  ;;  %v3040_v16 = vmax.f32 %v2951_v40, 0.0  ;;  %v5901_v40 = vpop.permute.xlu0 %3225 }
 0x36e   : > { %v2977_v30 = vadd.f32 %v2976_v36, %v5679_v15  ;;  %v3049_v26 = vmax.f32 %v2975_v28, 0.0  ;;  %v2957_v15 = vadd.f32 %v2956_v4, %v6183_v22  ;;  %v2949_v4 = vadd.f32 %v5768_v57, %v6184_v61  ;;  %v6186_v36 = vld [vmem:[#allocation4_spill] sm:$0xff]  ;;  %v4173_v28 = vld [vmem:[%s6101_s5 + $0x50] ss:$8 sps:$4 sm:$0xff]  }
 0x36f   : > { %v2978_v11 = vpop.f32.mrf.mxu1  ;;  %v2939_v57 = vadd.f32 %v5759_v5, %v6186_v36  ;;  %v4159_v5 = vld [vmem:[%s6101_s5 + $0x14] ss:$8 sps:$4 sm:$0xff]   ;;  %v4203_v61 = vld [vmem:[%s6101_s5 + $0xf0] ss:$8 sps:$4 sm:$0xff]  }
 0x370   : > { %v2979_v47 = vadd.f32 %v2978_v11, %v5681_v8  ;;  %v3050_v18 = vmax.f32 %v2977_v30, 0.0  ;;  %v3042_v25 = vmax.f32 %v2957_v15, 0.0  ;;  %v2941_v11 = vadd.f32 %v5761_v13, %v6186_v36  ;;  %v4195_v15 = vld [vmem:[%s6101_s5 + $0xd4] ss:$8 sps:$4 sm:$0xff]  }
 0x371   : > { %v2980_v17 = vpop.f32.mrf.mxu1  ;;  %v3035_v30 = vmax.f32 %v2939_v57, 0.0 }
 0x372   : > { %v2981_v12 = vadd.f32 %v2980_v17, %v5681_v8  ;;  %v3051_v52 = vmax.f32 %v2979_v47, 0.0  ;;  %v3048_v8 = vmax.f32 %v2971_v38, 0.0  ;;  %v4167_v38 = vld [vmem:[%s6101_s5 + $0x30] ss:$8 sps:$4 sm:$0xff]  }
 0x373   : > { %v2984_v14 = vpop.f32.mrf.mxu1 }
 0x374   : > { %v2985_v35 = vadd.f32 %v2984_v14, %v5669_v63  ;;  %v3052_v53 = vmax.f32 %v2981_v12, 0.0  ;;  %v3117_v62 = vpack.c.bf16 %v3051_v52, %v3049_v26  ;;  %v3116_v27 = vpack.c.bf16 %v3048_v8, %v3046_v46  ;;  %v4182_v52 = vld [vmem:[%s6101_s5 + $0x80] ss:$8 sps:$4 sm:$0xff]   ;;  %v4192_v26 = vld [vmem:[%s6101_s5 + $0xc4] ss:$8 sps:$4 sm:$0xff]  }
 0x375   : > { %v2986_v55 = vpop.f32.mrf.mxu1  ;;  %v3039_v12 = vmax.f32 %v2949_v4, 0.0  ;;  %v4188_v8 = vld [vmem:[%s6101_s5 + $0xa0] ss:$8 sps:$4 sm:$0xff]   ;;  %v4197_v46 = vld [vmem:[%s6101_s5 + $0xd0] ss:$8 sps:$4 sm:$0xff]  }
 0x376   : > { %v2987_v7 = vadd.f32 %v2986_v55, %v5669_v63  ;;  %v3053_v10 = vmax.f32 %v2985_v35, 0.0  ;;  %v3118_v60 = vpack.c.bf16 %v3052_v53, %v3050_v18  ;;  %v6187_v55 = vld [vmem:[#allocation22_spill] sm:$0xff]  ;;  %v4168_v53 = vld [vmem:[%s6101_s5 + $0x44] ss:$8 sps:$4 sm:$0xff]  }
 0x377   : > { %v2988_v44 = vpop.f32.mrf.mxu1  ;;  %v2937_v23 = vadd.f32 %v5755_v49, %v6187_v55  ;;  %v2935_v13 = vadd.f32 %v5749_v43, %v6187_v55  ;;  %v4156_v43 = vld [vmem:[%s6101_s5] ss:$8 sps:$4 sm:$0xff]   ;;  %v4177_v18 = vld [vmem:[%s6101_s5 + $0x74] ss:$8 sps:$4 sm:$0xff]  }
 0x378   : > { %v2989_v42 = vadd.f32 %v2988_v44, %v5673_v2  ;;  %v3054_v58 = vmax.f32 %v2987_v7, 0.0  ;;  %v3038_v44 = vmax.f32 %v2947_v34, 0.0 }
 0x379   : > { %v2990_v54 = vpop.f32.mrf.mxu1  ;;  %v3033_v49 = vmax.f32 %v2935_v13, 0.0 }
 0x37a   : > { %v2991_v45 = vadd.f32 %v2990_v54, %v5673_v2  ;;  %v3055_v3 = vmax.f32 %v2989_v42, 0.0  ;;  %v6182_v2 = vld [vmem:[#allocation23_spill] sm:$0xff]  ;;  %v3036_v42 = vmax.f32 %v2941_v11, 0.0  ;;  %v3112_v35 = vpack.c.bf16 %v3040_v16, %v3038_v44 }
 0x37b   : > { %v2961_v51 = vadd.f32 %v2960_v9, %v6182_v2  ;;  %v2959_v32 = vadd.f32 %v2958_v29, %v6182_v2  ;;  %v2955_v9 = vadd.f32 %v2954_v20, %v6183_v22  ;;  %v3115_v29 = vpack.c.bf16 %v3047_v31, %v3045_v1  ;;  %v4185_v2 = vld [vmem:[%s6101_s5 + $0x90] ss:$8 sps:$4 sm:$0xff]   ;;  %v4194_v22 = vld [vmem:[%s6101_s5 + $0xc0] ss:$8 sps:$4 sm:$0xff]  }
 0x37c   : > { %v3056_v19 = vmax.f32 %v2991_v45, 0.0  ;;  %v3119_v56 = vpack.c.bf16 %v3055_v3, %v3053_v10  ;;  %v2945_v20 = vadd.f32 %v5763_v59, %v6185_v50  ;;  %v3034_v59 = vmax.f32 %v2937_v23, 0.0  ;;  %v4174_v10 = vld [vmem:[%s6101_s5 + $0x64] ss:$8 sps:$4 sm:$0xff]   ;;  %v4200_v31 = vld [vmem:[%s6101_s5 + $0xe0] ss:$8 sps:$4 sm:$0xff]  }
 0x37d   : > { %v3044_v48 = vmax.f32 %v2961_v51, 0.0  ;;  %v3043_v33 = vmax.f32 %v2959_v32, 0.0  ;;  %v3041_v14 = vmax.f32 %v2955_v9, 0.0  ;;  %v3109_v3 = vpack.c.bf16 %v3035_v30, %v3033_v49  ;;  %v4186_v51 = vld [vmem:[%s6101_s5 + $0xa4] ss:$8 sps:$4 sm:$0xff]  }
 0x37e   : > { %v3120_v63 = vpack.c.bf16 %v3056_v19, %v3054_v58  ;;  %v3037_v54 = vmax.f32 %v2945_v20, 0.0  ;;  %v3110_v47 = vpack.c.bf16 %v3036_v42, %v3034_v59  ;;  %v4170_v58 = vld [vmem:[%s6101_s5 + $0x40] ss:$8 sps:$4 sm:$0xff]   ;;  %v4171_v19 = vld [vmem:[%s6101_s5 + $0x54] ss:$8 sps:$4 sm:$0xff]  }
 0x37f   : > { %v3114_v17 = vpack.c.bf16 %v3044_v48, %v3042_v25  ;;  %v3113_v7 = vpack.c.bf16 %v3043_v33, %v3041_v14  ;;  %v4198_v32 = vld [vmem:[%s6101_s5 + $0xe4] ss:$8 sps:$4 sm:$0xff]   ;;  %v5903_v48 = vpop.permute.xlu1 %3230 }
 0x380   : > { %3489 = vmatprep.subr.bf16.mxu0 %v3120_v63  ;;  %v3111_v45 = vpack.c.bf16 %v3039_v12, %v3037_v54  ;;  %v4179_v63 = vld [vmem:[%s6101_s5 + $0x70] ss:$8 sps:$4 sm:$0xff]  }
 0x381   : > { %3490 = vmatpush2.bf16.msra.mxu0 %v3119_v56  ;;  %v4183_v56 = vld [vmem:[%s6101_s5 + $0x94] ss:$8 sps:$4 sm:$0xff]  }
 0x382   : > { %3491 = vmatprep.subr.bf16.mxu0 %v3118_v60  ;;  %v4189_v60 = vld [vmem:[%s6101_s5 + $0xb4] ss:$8 sps:$4 sm:$0xff]  }
 0x383   : > { %v5907_v9 = vpop.permute.xlu1 %3220 }
 0x385   : > { %3492 = vmatpush2.bf16.msra.mxu0 %v3117_v62  ;;  %v4201_v62 = vld [vmem:[%s6101_s5 + $0xf4] ss:$8 sps:$4 sm:$0xff]  }
 0x386   : > { %3493 = vmatprep.subr.bf16.mxu0 %v3116_v27  ;;  %v5905_v27 = vpop.permute.xlu0 %3215 }
 0x387   : > { %v5911_v50 = vpop.permute.xlu1 %3210 }
 0x389   : > { %3494 = vmatpush2.bf16.msra.mxu0 %v3115_v29 }
 0x38a   : > { %3495 = vmatprep.subr.bf16.mxu0 %v3114_v17  ;;  %v5909_v1 = vpop.permute.xlu0 %3205 }
 0x38b   : > { %v5915_v25 = vpop.permute.xlu1 %3200 }
 0x38d   : > { %3496 = vmatpush2.bf16.msra.mxu0 %v3113_v7 }
 0x38e   : > { %3497 = vmatprep.subr.bf16.mxu0 %v3112_v35  ;;  %v5913_v34 = vpop.permute.xlu0 %3195 }
 0x38f   : > { %v5919_v33 = vpop.permute.xlu1 %3190 }
 0x391   : > { %3498 = vmatpush2.bf16.msra.mxu0 %v3111_v45 }
 0x392   : > { %3499 = vmatprep.subr.bf16.mxu0 %v3110_v47  ;;  %v5917_v4 = vpop.permute.xlu0 %3185 }
 0x393   : > { %v5923_v36 = vpop.permute.xlu1 %3180 }
 0x395   : > { %3500 = vmatpush2.bf16.msra.mxu0 %v3109_v3 }
 0x396   : > { %3501 = vmatprep.subr.bf16.mxu0 %v5757_v0  ;;  %v4161_v0 = vld [vmem:[%s6101_s5 + $0x10] ss:$8 sps:$4 sm:$0xff]   ;;  %v5921_v29 = vpop.permute.xlu0 %3175 }
 0x397   : > { %v3171_v16 = vpop.permute.xlu1 %3170 }
 0x399   : > { %3502 = vmatpush2.bf16.msra.mxu0 %v5751_v24  ;;  %v4165_v24 = vld [vmem:[%s6101_s5 + $0x34] ss:$8 sps:$4 sm:$0xff]  }
 0x39a   : > { %3503 = vmatprep.subr.bf16.mxu0 %v5733_v37  ;;  %v4162_v37 = vld [vmem:[%s6101_s5 + $0x24] ss:$8 sps:$4 sm:$0xff]   ;;  %v3166_v11 = vpop.permute.xlu0 %3165 }
 0x39b   : > { %v3161_v23 = vpop.permute.xlu1 %3160 }
 0x39d   : > { %3504 = vmatpush2.bf16.msra.mxu0 %v5727_v41  ;;  %v4164_v41 = vld [vmem:[%s6101_s5 + $0x20] ss:$8 sps:$4 sm:$0xff]  }
 0x39e   : > { %v3156_v20 = vpop.permute.xlu0 %3155 }
 0x3a0   : > { %3506 = vmatmul.mubr.bf16.vlgmr.msra.gmra.mxu0 %v4156_v43 }
 0x3a1   : > { %3515 = vmatprep.mubr.bf16.mxu0 %v4159_v5 }
 0x3a8   : > { %3516 = vmatmul.mubr.bf16.gmra.mxu0 %v4161_v0 }
 0x3a9   : > { %3525 = vmatprep.mubr.bf16.mxu0 %v4162_v37 }
 0x3b0   : > { %3526 = vmatmul.mubr.bf16.gmra.mxu0 %v4164_v41 }
 0x3b1   : > { %3535 = vmatprep.mubr.bf16.mxu0 %v4165_v24 }
 0x3b8   : > { %3536 = vmatmul.mubr.bf16.gmra.mxu0 %v4167_v38 }
 0x3b9   : > { %3545 = vmatprep.mubr.bf16.mxu0 %v4168_v53 }
 0x3c0   : > { %3546 = vmatmul.mubr.bf16.gmra.mxu0 %v4170_v58 }
 0x3c1   : > { %3555 = vmatprep.mubr.bf16.mxu0 %v4171_v19 }
 0x3c8   : > { %3556 = vmatmul.mubr.bf16.gmra.mxu0 %v4173_v28 }
 0x3c9   : > { %3565 = vmatprep.mubr.bf16.mxu0 %v4174_v10 }
 0x3d0   : > { %3566 = vmatmul.mubr.bf16.gmra.mxu0 %v4176_v21 }
 0x3d1   : > { %3575 = vmatprep.mubr.bf16.mxu0 %v4177_v18 }
 0x3d8   : > { %3576 = vmatmul.mubr.bf16.gmra.mxu0 %v4179_v63 }
 0x3d9   : > { %3585 = vmatprep.mubr.bf16.mxu0 %v4180_v39  ;;  %v5941_v39 = vpop.permute.xlu0 %3305 }
 0x3e0   : > { %3586 = vmatmul.mubr.bf16.gmra.mxu0 %v4182_v52 }
 0x3e1   : > { %3595 = vmatprep.mubr.bf16.mxu0 %v4183_v56  ;;  %v5945_v56 = vpop.permute.xlu1 %3310 }
 0x3e8   : > { %3596 = vmatmul.mubr.bf16.gmra.mxu0 %v4185_v2 }
 0x3e9   : > { %3605 = vmatprep.mubr.bf16.mxu0 %v4186_v51 }
 0x3f0   : > { %3606 = vmatmul.mubr.bf16.gmra.mxu0 %v4188_v8  ;;  %v5951_v8 = vpop.permute.xlu0 %3295 }
 0x3f1   : > { %3615 = vmatprep.mubr.bf16.mxu0 %v4189_v60 }
 0x3f8   : > { %3616 = vmatmul.mubr.bf16.gmra.mxu0 %v4191_v6  ;;  %v5955_v6 = vpop.permute.xlu1 %3300 }
 0x3f9   : > { %3625 = vmatprep.mubr.bf16.mxu0 %v4192_v26 }
 0x400   : > { %3626 = vmatmul.mubr.bf16.gmra.mxu0 %v4194_v22 }
 0x401   : > { %3635 = vmatprep.mubr.bf16.mxu0 %v4195_v15  ;;  %v5962_v15 = vld [vmem:[%s6103_s7] sm:$0xff] }
 0x402   : > { %6188 = vst [vmem:[#allocation16_spill] sm:$0xff] %v5962_v15 }
 0x408   : > { %3636 = vmatmul.mubr.bf16.gmra.mxu0 %v4197_v46  ;;  %v5964_v46 = vpop.permute.xlu0 %3285 }
 0x409   : > { %3645 = vmatprep.mubr.bf16.mxu0 %v4198_v32 }
 0x410   : > { %3646 = vmatmul.mubr.bf16.gmra.mxu0 %v4200_v31  ;;  %v4042_v31 = vcombine.high %v5962_v15, %v5962_v15 }
 0x411   : > { %3655 = vmatprep.mubr.bf16.mxu0 %v4201_v62  ;;  %v5970_v62 = vpop.permute.xlu1 %3290 }
 0x412   : > { %3808 = vmatprep.mubr.bf16.mxu1 %v4042_v31 }
 0x418   : > { %3656 = vmatmul.mubr.bf16.gmra.mxu0 %v4203_v61 }
 0x460   : > { %v3507_v17 = vpop.f32.mrf.mxu0 }
 0x461   : > { %v3508_v55 = vadd.f32 %v3507_v17, %v3156_v20 }
 0x462   : > { %v3509_v14 = vpop.f32.mrf.mxu0 }
 0x463   : > { %v3510_v57 = vadd.f32 %v3509_v14, %v3156_v20  ;;  %v3666_v42 = vmax.f32 %v3508_v55, 0.0  ;;  %v5974_v20 = vpop.permute.xlu1 %3280 }
 0x464   : > { %v3511_v44 = vpop.f32.mrf.mxu0  ;;  %6190 = vst [vmem:[#allocation21_spill] sm:$0xff] %v5974_v20 }
 0x465   : > { %v3512_v12 = vadd.f32 %v3511_v44, %v3161_v23  ;;  %v3667_v59 = vmax.f32 %v3510_v57, 0.0 }
 0x466   : > { %v3513_v7 = vpop.f32.mrf.mxu0 }
 0x467   : > { %v3668_v35 = vmax.f32 %v3512_v12, 0.0  ;;  %v3514_v13 = vadd.f32 %v3513_v7, %v3161_v23  ;;  %v5978_v57 = vpop.permute.xlu1 %3270 }
 0x468   : > { %v3517_v54 = vpop.f32.mrf.mxu0  ;;  %6192 = vst [vmem:[#allocation18_spill] sm:$0xff] %v5978_v57 }
 0x469   : > { %v5925_v30 = vpack.c.bf16 %v3668_v35, %v3666_v42  ;;  %v3669_v45 = vmax.f32 %v3514_v13, 0.0  ;;  %v3518_v3 = vadd.f32 %v3517_v54, %v3166_v11 }
 0x46a   : > { %v3519_v47 = vpop.f32.mrf.mxu0 }
 0x46b   : > { %v5927_v49 = vpack.c.bf16 %v3669_v45, %v3667_v59  ;;  %v3520_v5 = vadd.f32 %v3519_v47, %v3166_v11  ;;  %v3670_v41 = vmax.f32 %v3518_v3, 0.0  ;;  %v5982_v13 = vpop.permute.xlu1 %3260 }
 0x46c   : > { %v3521_v43 = vpop.f32.mrf.mxu0  ;;  %6194 = vst [vmem:[#allocation11_spill] sm:$0xff] %v5982_v13 }
 0x46d   : > { %v3522_v0 = vadd.f32 %v3521_v43, %v3171_v16  ;;  %v3671_v58 = vmax.f32 %v3520_v5, 0.0 }
 0x46e   : > { %v3523_v37 = vpop.f32.mrf.mxu0 }
 0x46f   : > { %v3672_v24 = vmax.f32 %v3522_v0, 0.0  ;;  %v3524_v38 = vadd.f32 %v3523_v37, %v3171_v16  ;;  %v5972_v16 = vpop.permute.xlu0 %3275  ;;  %v5989_v0 = vpop.permute.xlu1 %3250 }
 0x470   : > { %v5929_v53 = vpop.f32.mrf.mxu0  ;;  %6189 = vst [vmem:[#allocation19_spill] sm:$0xff] %v5972_v16 }
 0x471   : > { %v5931_v19 = vpack.c.bf16 %v3672_v24, %v3670_v41  ;;  %v3673_v28 = vmax.f32 %v3524_v38, 0.0 }
 0x472   : > { %v5933_v10 = vpop.f32.mrf.mxu0 }
 0x473   : > { %v5935_v21 = vpack.c.bf16 %v3673_v28, %v3671_v58  ;;  %v5976_v23 = vpop.permute.xlu0 %3265 }
 0x474   : > { %v5937_v18 = vpop.f32.mrf.mxu0  ;;  %6191 = vst [vmem:[#allocation5_spill] sm:$0xff] %v5976_v23 }
 0x476   : > { %v5939_v63 = vpop.f32.mrf.mxu0 }
 0x477   : > { %v5980_v42 = vpop.permute.xlu0 %3255 }
 0x478   : > { %v5943_v52 = vpop.f32.mrf.mxu0  ;;  %6193 = vst [vmem:[#allocation6_spill] sm:$0xff] %v5980_v42 }
 0x47a   : > { %v5947_v2 = vpop.f32.mrf.mxu0 }
 0x47b   : > { %v5984_v45 = vpop.permute.xlu0 %3245 }
 0x47c   : > { %v5949_v51 = vpop.f32.mrf.mxu0 }
 0x47e   : > { %v5953_v60 = vpop.f32.mrf.mxu0 }
 0x47f   : > { %v3236_v13 = vpop.permute.xlu0 %3235 }
 0x480   : > { %v5957_v26 = vpop.f32.mrf.mxu0 }
 0x482   : > { %v3549_v22 = vpop.f32.mrf.mxu0 }
 0x484   : > { %v5966_v32 = vpop.f32.mrf.mxu0 }
 0x486   : > { %v3553_v61 = vpop.f32.mrf.mxu0 }
 0x488   : > { %v3557_v11 = vpop.f32.mrf.mxu0 }
 0x48a   : > { %v3559_v17 = vpop.f32.mrf.mxu0 }
 0x48c   : > { %v3561_v14 = vpop.f32.mrf.mxu0 }
 0x48e   : > { %v3563_v55 = vpop.f32.mrf.mxu0 }
 0x48f   : > { %v3564_v15 = vadd.f32 %v3563_v55, %v5911_v50 }
 0x490   : > { %v3567_v44 = vpop.f32.mrf.mxu0 }
 0x492   : > { %v3569_v12 = vpop.f32.mrf.mxu0 }
 0x493   : > { %v3570_v24 = vadd.f32 %v3569_v12, %v5905_v27 }
 0x494   : > { %v3571_v7 = vpop.f32.mrf.mxu0 }
 0x495   : > { %v3572_v58 = vadd.f32 %v3571_v7, %v5907_v9  ;;  %v3562_v7 = vadd.f32 %v3561_v14, %v5911_v50 }
 0x496   : > { %v3573_v35 = vpop.f32.mrf.mxu0 }
 0x497   : > { %v3574_v3 = vadd.f32 %v3573_v35, %v5907_v9  ;;  %v3554_v9 = vadd.f32 %v3553_v61, %v5915_v25 }
 0x498   : > { %v3577_v54 = vpop.f32.mrf.mxu0 }
 0x499   : > { %v3578_v37 = vadd.f32 %v3577_v54, %v5901_v40  ;;  %v3693_v35 = vmax.f32 %v3574_v3, 0.0  ;;  %v3691_v54 = vmax.f32 %v3570_v24, 0.0 }
 0x49a   : > { %v3579_v59 = vpop.f32.mrf.mxu0 }
 0x49b   : > { %v3580_v43 = vadd.f32 %v3579_v59, %v5901_v40  ;;  %v3694_v23 = vmax.f32 %v3578_v37, 0.0  ;;  %v3560_v40 = vadd.f32 %v3559_v17, %v5909_v1  ;;  %v3550_v17 = vadd.f32 %v3549_v22, %v5913_v34 }
 0x49c   : > { %v3581_v47 = vpop.f32.mrf.mxu0 }
 0x49d   : > { %v3582_v5 = vadd.f32 %v3581_v47, %v5903_v48  ;;  %v3695_v42 = vmax.f32 %v3580_v43, 0.0  ;;  %v3568_v47 = vadd.f32 %v3567_v44, %v5905_v27  ;;  %v3689_v43 = vmax.f32 %v3564_v15, 0.0 }
 0x49e   : > { %v3583_v41 = vpop.f32.mrf.mxu0  ;;  %v3544_v27 = vadd.f32 %v5953_v60, %v5919_v33  ;;  %v3558_v44 = vadd.f32 %v3557_v11, %v5909_v1  ;;  %v3687_v61 = vmax.f32 %v3560_v40, 0.0  ;;  %v3552_v15 = vadd.f32 %v5966_v32, %v5915_v25 }
 0x49f   : > { %v3584_v38 = vadd.f32 %v3583_v41, %v5903_v48  ;;  %v3696_v28 = vmax.f32 %v3582_v5, 0.0  ;;  %v3241_v48 = vpop.permute.xlu1 %3240  ;;  %v3692_v5 = vmax.f32 %v3572_v58, 0.0  ;;  %v3744_v41 = vpack.c.bf16 %v3693_v35, %v3691_v54 }
 0x4a0   : > { %v3587_v31 = vpop.f32.mrf.mxu0  ;;  %v3742_v60 = vpack.c.bf16 %v3689_v43, %v3687_v61  ;;  %v3548_v11 = vadd.f32 %v5957_v26, %v5913_v34  ;;  %v3683_v35 = vmax.f32 %v3550_v17, 0.0  ;;  %v3684_v40 = vmax.f32 %v3552_v15, 0.0 }
 0x4a1   : > { %v3697_v59 = vmax.f32 %v3584_v38, 0.0  ;;  %v3588_v16 = vadd.f32 %v3587_v31, %v3236_v13  ;;  %v3745_v55 = vpack.c.bf16 %v3696_v28, %v3694_v23  ;;  %v3686_v31 = vmax.f32 %v3558_v44, 0.0 }
 0x4a2   : > { %v3589_v57 = vpop.f32.mrf.mxu0  ;;  %v3681_v54 = vmax.f32 %v3544_v27, 0.0  ;;  %v3528_v44 = vadd.f32 %v5929_v53, %v5921_v29 }
 0x4a3   : > { %v3746_v12 = vpack.c.bf16 %v3697_v59, %v3695_v42  ;;  %v3590_v38 = vadd.f32 %v3589_v57, %v3236_v13  ;;  %v3690_v42 = vmax.f32 %v3568_v47, 0.0  ;;  %v3698_v50 = vmax.f32 %v3588_v16, 0.0 }
 0x4a4   : > { %v3591_v3 = vpop.f32.mrf.mxu0  ;;  %v3685_v57 = vmax.f32 %v3554_v9, 0.0  ;;  %v3688_v13 = vmax.f32 %v3562_v7, 0.0  ;;  %v3534_v59 = vadd.f32 %v5939_v63, %v5923_v36  ;;  %v3542_v47 = vadd.f32 %v5949_v51, %v5919_v33 }
 0x4a5   : > { %v3592_v20 = vadd.f32 %v3591_v3, %v3241_v48  ;;  %3776 = vmatprep.subr.bf16.mxu1 %v3746_v12  ;;  %v3743_v24 = vpack.c.bf16 %v3692_v5, %v3690_v42  ;;  %v3699_v28 = vmax.f32 %v3590_v38, 0.0  ;;  %v3530_v9 = vadd.f32 %v5933_v10, %v5921_v29 }
 0x4a6   : > { %v3593_v37 = vpop.f32.mrf.mxu0  ;;  %3777 = vmatpush1.bf16.msra.mxu1 %v3745_v55  ;;  %v3741_v34 = vpack.c.bf16 %v3688_v13, %v3686_v31  ;;  %v3740_v12 = vpack.c.bf16 %v3685_v57, %v3683_v35  ;;  %v3538_v7 = vadd.f32 %v5943_v52, %v5917_v4  ;;  %v3682_v5 = vmax.f32 %v3548_v11, 0.0 }
 0x4a7   : > { %v3700_v14 = vmax.f32 %v3592_v20, 0.0  ;;  %v3594_v23 = vadd.f32 %v3593_v37, %v3241_v48  ;;  %3778 = vmatprep.subr.bf16.mxu1 %v3744_v41  ;;  %v3540_v20 = vadd.f32 %v5947_v2, %v5917_v4  ;;  %v3677_v43 = vmax.f32 %v3534_v59, 0.0 }
 0x4a8   : > { %v3597_v58 = vpop.f32.mrf.mxu0  ;;  %v3680_v41 = vmax.f32 %v3542_v47, 0.0  ;;  %v3739_v38 = vpack.c.bf16 %v3684_v40, %v3682_v5  ;;  %v3678_v42 = vmax.f32 %v3538_v7, 0.0 }
 0x4a9   : > { %v6006_v22 = vpack.c.bf16 %v3700_v14, %v3698_v50  ;;  %v3701_v1 = vmax.f32 %v3594_v23, 0.0  ;;  %v3598_v32 = vadd.f32 %v3597_v58, %v5984_v45  ;;  %v3679_v55 = vmax.f32 %v3540_v20, 0.0 }
 0x4aa   : > { %v3599_v16 = vpop.f32.mrf.mxu0  ;;  %3779 = vmatpush1.bf16.msra.mxu1 %v3743_v24  ;;  %v3674_v23 = vmax.f32 %v3528_v44, 0.0 }
 0x4ab   : > { %v6012_v25 = vpack.c.bf16 %v3701_v1, %v3699_v28  ;;  %3780 = vmatprep.subr.bf16.mxu1 %v3742_v60  ;;  %v3600_v48 = vadd.f32 %v3599_v16, %v5984_v45  ;;  %v3702_v33 = vmax.f32 %v3598_v32, 0.0  ;;  %v3532_v45 = vadd.f32 %v5937_v18, %v5923_v36 }
 0x4ac   : > { %v3601_v26 = vpop.f32.mrf.mxu0  ;;  %v3738_v10 = vpack.c.bf16 %v3681_v54, %v3679_v55  ;;  %v3737_v18 = vpack.c.bf16 %v3680_v41, %v3678_v42  ;;  %v6196_v42 = vld [vmem:[#allocation19_spill] sm:$0xff] }
 0x4ad   : > { %v3602_v2 = vadd.f32 %v3601_v26, %v5989_v0  ;;  %v3703_v17 = vmax.f32 %v3600_v48, 0.0  ;;  %v3676_v36 = vmax.f32 %v3532_v45, 0.0 }
 0x4ae   : > { %v3603_v63 = vpop.f32.mrf.mxu0  ;;  %3781 = vmatpush1.bf16.msra.mxu1 %v3741_v34 }
 0x4af   : > { %v3704_v51 = vmax.f32 %v3602_v2, 0.0  ;;  %v3604_v3 = vadd.f32 %v3603_v63, %v5989_v0  ;;  %3782 = vmatprep.subr.bf16.mxu1 %v3740_v12  ;;  %v3675_v0 = vmax.f32 %v3530_v9, 0.0  ;;  %v3735_v57 = vpack.c.bf16 %v3676_v36, %v3674_v23 }
 0x4b0   : > { %v6028_v27 = vpop.f32.mrf.mxu0 }
 0x4b1   : > { %v6030_v4 = vpack.c.bf16 %v3704_v51, %v3702_v33  ;;  %v3705_v52 = vmax.f32 %v3604_v3, 0.0  ;;  %v3736_v14 = vpack.c.bf16 %v3677_v43, %v3675_v0 }
 0x4b2   : > { %v6034_v37 = vpop.f32.mrf.mxu0  ;;  %3783 = vmatpush1.bf16.msra.mxu1 %v3739_v38 }
 0x4b3   : > { %v6036_v61 = vpack.c.bf16 %v3705_v52, %v3703_v17  ;;  %3784 = vmatprep.subr.bf16.mxu1 %v3738_v10 }
 0x4b4   : > { %v6038_v50 = vpop.f32.mrf.mxu0 }
 0x4b6   : > { %v6040_v15 = vpop.f32.mrf.mxu0  ;;  %3785 = vmatpush1.bf16.msra.mxu1 %v3737_v18 }
 0x4b7   : > { %3786 = vmatprep.subr.bf16.mxu1 %v3736_v14 }
 0x4b8   : > { %v6042_v29 = vpop.f32.mrf.mxu0 }
 0x4ba   : > { %v6044_v53 = vpop.f32.mrf.mxu0  ;;  %3787 = vmatpush1.bf16.msra.mxu1 %v3735_v57 }
 0x4bb   : > { %3788 = vmatprep.subr.bf16.mxu1 %v5935_v21 }
 0x4bc   : > { %v6047_v13 = vpop.f32.mrf.mxu0 }
 0x4be   : > { %v3623_v24 = vpop.f32.mrf.mxu0  ;;  %3789 = vmatpush1.bf16.msra.mxu1 %v5931_v19 }
 0x4bf   : > { %3790 = vmatprep.subr.bf16.mxu1 %v5927_v49 }
 0x4c0   : > { %v3627_v58 = vpop.f32.mrf.mxu0 }
 0x4c2   : > { %v3629_v60 = vpop.f32.mrf.mxu0  ;;  %3791 = vmatpush1.bf16.msra.mxu1 %v5925_v30 }
 0x4c4   : > { %v3631_v28 = vpop.f32.mrf.mxu0 }
 0x4c6   : > { %v3633_v1 = vpop.f32.mrf.mxu0 }
 0x4c8   : > { %v3637_v11 = vpop.f32.mrf.mxu0 }
 0x4c9   : > { %v3638_v52 = vadd.f32 %v3637_v11, %v5964_v46 }
 0x4ca   : > { %v3639_v31 = vpop.f32.mrf.mxu0 }
 0x4cb   : > { %v3640_v3 = vadd.f32 %v3639_v31, %v5964_v46 }
 0x4cc   : > { %v3641_v16 = vpop.f32.mrf.mxu0 }
 0x4cd   : > { %v3642_v43 = vadd.f32 %v3641_v16, %v5970_v62  ;;  %v3719_v0 = vmax.f32 %v3640_v3, 0.0  ;;  %v3718_v16 = vmax.f32 %v3638_v52, 0.0 }
 0x4ce   : > { %v3643_v20 = vpop.f32.mrf.mxu0 }
 0x4cf   : > { %v3644_v7 = vadd.f32 %v3643_v20, %v5970_v62  ;;  %v3720_v18 = vmax.f32 %v3642_v43, 0.0  ;;  %v6197_v62 = vld [vmem:[#allocation18_spill] sm:$0xff]  ;;  %v6198_v20 = vld [vmem:[#allocation5_spill] sm:$0xff] }
 0x4d0   : > { %v3647_v35 = vpop.f32.mrf.mxu0  ;;  %v3624_v23 = vadd.f32 %v3623_v24, %v6197_v62  ;;  %v3620_v46 = vadd.f32 %v6044_v53, %v6198_v20 }
 0x4d1   : > { %v3648_v33 = vadd.f32 %v3647_v35, %v5951_v8 }
 0x4d2   : > { %v3649_v32 = vpop.f32.mrf.mxu0  ;;  %v3713_v24 = vmax.f32 %v3624_v23, 0.0 }
 0x4d3   : > { %v3650_v12 = vadd.f32 %v3649_v32, %v5951_v8  ;;  %v3722_v44 = vmax.f32 %v3648_v33, 0.0  ;;  %v3630_v8 = vadd.f32 %v3629_v60, %v6196_v42  ;;  %v3622_v60 = vadd.f32 %v6047_v13, %v6197_v62  ;;  %v6199_v32 = vld [vmem:[#allocation11_spill] sm:$0xff] }
 0x4d4   : > { %v3651_v21 = vpop.f32.mrf.mxu0  ;;  %v3612_v13 = vadd.f32 %v6038_v50, %v6199_v32 }
 0x4d5   : > { %v3652_v2 = vadd.f32 %v3651_v21, %v5955_v6  ;;  %v3723_v45 = vmax.f32 %v3650_v12, 0.0  ;;  %v3715_v11 = vmax.f32 %v3630_v8, 0.0  ;;  %v3614_v21 = vadd.f32 %v6040_v15, %v6199_v32 }
 0x4d6   : > { %v3653_v59 = vpop.f32.mrf.mxu0  ;;  %v3708_v12 = vmax.f32 %v3612_v13, 0.0 }
 0x4d7   : > { %v3654_v19 = vadd.f32 %v3653_v59, %v5955_v6  ;;  %v3724_v41 = vmax.f32 %v3652_v2, 0.0  ;;  %v3721_v6 = vmax.f32 %v3644_v7, 0.0  ;;  %v3767_v7 = vpop.permute.xlu0 %3766 }
 0x4d8   : > { %v3657_v47 = vpop.f32.mrf.mxu0 }
 0x4d9   : > { %v3658_v30 = vadd.f32 %v3657_v47, %v5941_v39  ;;  %v3725_v5 = vmax.f32 %v3654_v19, 0.0  ;;  %v3759_v14 = vpack.c.bf16 %v3724_v41, %v3722_v44  ;;  %v3758_v31 = vpack.c.bf16 %v3721_v6, %v3719_v0 }
 0x4da   : > { %v3659_v40 = vpop.f32.mrf.mxu0  ;;  %v3712_v19 = vmax.f32 %v3622_v60, 0.0 }
 0x4db   : > { %v3660_v49 = vadd.f32 %v3659_v40, %v5941_v39  ;;  %v3726_v51 = vmax.f32 %v3658_v30, 0.0  ;;  %v3760_v17 = vpack.c.bf16 %v3725_v5, %v3723_v45  ;;  %v6200_v40 = vld [vmem:[#allocation6_spill] sm:$0xff] }
 0x4dc   : > { %v3661_v34 = vpop.f32.mrf.mxu0  ;;  %v3610_v53 = vadd.f32 %v6034_v37, %v6200_v40  ;;  %v3608_v15 = vadd.f32 %v6028_v27, %v6200_v40  ;;  %v6201_v27 = vld [vmem:[#allocation16_spill] sm:$0xff] }
 0x4dd   : > { %v3662_v26 = vadd.f32 %v3661_v34, %v5945_v56  ;;  %v3727_v63 = vmax.f32 %v3660_v49, 0.0  ;;  %v3711_v34 = vmax.f32 %v3620_v46, 0.0  ;;  %v4041_v50 = vcombine.low %v6201_v27, %v6201_v27 }
 0x4de   : > { %v3663_v54 = vpop.f32.mrf.mxu0  ;;  %v3706_v2 = vmax.f32 %v3608_v15, 0.0 }
 0x4df   : > { %v3664_v48 = vadd.f32 %v3663_v54, %v5945_v56  ;;  %v3728_v9 = vmax.f32 %v3662_v26, 0.0  ;;  %v6195_v56 = vld [vmem:[#allocation21_spill] sm:$0xff]  ;;  %v3709_v26 = vmax.f32 %v3614_v21, 0.0  ;;  %v3754_v30 = vpack.c.bf16 %v3713_v24, %v3711_v34 }
 0x4e0   : > { %v3634_v10 = vadd.f32 %v3633_v1, %v6195_v56  ;;  %v3632_v36 = vadd.f32 %v3631_v28, %v6195_v56  ;;  %v3628_v1 = vadd.f32 %v3627_v58, %v6196_v42  ;;  %v3757_v28 = vpack.c.bf16 %v3720_v18, %v3718_v16 }
 0x4e1   : > { %v3729_v55 = vmax.f32 %v3664_v48, 0.0  ;;  %v3761_v38 = vpack.c.bf16 %v3728_v9, %v3726_v51  ;;  %v3618_v58 = vadd.f32 %v6042_v29, %v6198_v20  ;;  %v3707_v29 = vmax.f32 %v3610_v53, 0.0 }
 0x4e2   : > { %v3717_v57 = vmax.f32 %v3634_v10, 0.0  ;;  %v3716_v35 = vmax.f32 %v3632_v36, 0.0  ;;  %v3714_v47 = vmax.f32 %v3628_v1, 0.0  ;;  %v3751_v9 = vpack.c.bf16 %v3708_v12, %v3706_v2 }
 0x4e3   : > { %v3762_v39 = vpack.c.bf16 %v3729_v55, %v3727_v63  ;;  %v3710_v54 = vmax.f32 %v3618_v58, 0.0  ;;  %v3752_v37 = vpack.c.bf16 %v3709_v26, %v3707_v29 }
 0x4e4   : > { %v3756_v59 = vpack.c.bf16 %v3717_v57, %v3715_v11  ;;  %v3755_v49 = vpack.c.bf16 %v3716_v35, %v3714_v47 }
 0x4e5   : > { %3792 = vmatprep.subr.bf16.mxu1 %v3762_v39  ;;  %v3753_v48 = vpack.c.bf16 %v3712_v19, %v3710_v54 }
 0x4e6   : > { %3793 = vmatpush2.bf16.msra.mxu1 %v3761_v38 }
 0x4e7   : > { %3794 = vmatprep.subr.bf16.mxu1 %v3760_v17 }
 0x4ea   : > { %3795 = vmatpush2.bf16.msra.mxu1 %v3759_v14 }
 0x4eb   : > { %3796 = vmatprep.subr.bf16.mxu1 %v3758_v31 }
 0x4ee   : > { %3797 = vmatpush2.bf16.msra.mxu1 %v3757_v28 }
 0x4ef   : > { %3798 = vmatprep.subr.bf16.mxu1 %v3756_v59 }
 0x4f2   : > { %3799 = vmatpush2.bf16.msra.mxu1 %v3755_v49 }
 0x4f3   : > { %3800 = vmatprep.subr.bf16.mxu1 %v3754_v30 }
 0x4f6   : > { %3801 = vmatpush2.bf16.msra.mxu1 %v3753_v48 }
 0x4f7   : > { %3802 = vmatprep.subr.bf16.mxu1 %v3752_v37 }
 0x4fa   : > { %3803 = vmatpush2.bf16.msra.mxu1 %v3751_v9 }
 0x4fb   : > { %3804 = vmatprep.subr.bf16.mxu1 %v6036_v61 }
 0x4fe   : > { %3805 = vmatpush2.bf16.msra.mxu1 %v6030_v4 }
 0x4ff   : > { %3806 = vmatprep.subr.bf16.mxu1 %v6012_v25 }
 0x502   : > { %3807 = vmatpush2.bf16.msra.mxu1 %v6006_v22 }
 0x505   : > { %3809 = vmatmul.mubr.bf16.vlgmr.msra.gmra.mxu1 %v4041_v50 }
 0x5c5   : > { %v3810_v5 = vpop.f32.mrf.mxu1 }
 0x5c6   : > { %v3811_v63 = vadd.f32 %v3810_v5, %v3767_v7 }
 0x5c7   : > { %v3812_v55 = vpop.f32.mrf.mxu1 }
 0x5c8   : > { %3817 = vst [vmem:[%s334_s13] sm:$0xff] %v3811_v63  ;;  %v3813_v61 = vadd.f32 %v3812_v55, %v3767_v7 }
 0x5c9   : > { %v3814_v4 = vpop.f32.mrf.mxu1 }
 0x5ca   : > { %3818 = vst [vmem:[%s334_s13 + $0x8] sm:$0xff] %v3813_v61 }
 0x5cb   : > { %v3815_v25 = vpop.f32.mrf.mxu1 }
 0x5cc PF: > { %s19_s30 = sadd.s32 1, %s4236_s30  }
 0x5cd   : > { %p16_p4 = scmp.ge.s32.totalorder %s19_s30, 6  }
 0x5cf   :  { %18 = sbr.rel (!%p16_p4) target bundleno = 1 (0x1), region = 86 }

</bundles_post_ra>
